<compile_context>
chip_gen: v5e
topology: v5e:2x2
jax: 0.10.0
libtpu: 0.0.40
codegen_flags: <defaults>
</compile_context>

<pallas_src>
import functools

import jax
import jax.numpy as jnp
from jax import lax
from jax.experimental import pallas as pl
from jax.experimental.pallas import tpu as pltpu

# ----------------------------- model dims (small) ----------------------------
B = 2               # batch
S = 8               # seq_len
H = 32              # bert hidden_size == lstm hidden_size
NH = 4              # attention heads
HD = H // NH        # head dim
I_FF = 64           # bert intermediate size
VOCAB = 100
MAXPOS = 32
N_BERT_LAYERS = 2
N_LSTM_LAYERS = 4
OUT_DIM = 16
EPS = 1e-12


# ----------------------------- in-kernel helpers ------------------------------
def _ln(x, g, b):
    mu = jnp.mean(x, axis=-1, keepdims=True)
    var = jnp.mean((x - mu) * (x - mu), axis=-1, keepdims=True)
    return (x - mu) * lax.rsqrt(var + EPS) * g + b


def _gelu(x):
    # tanh-approx GELU (real BERT uses erf GELU; weights here are synthetic).
    return 0.5 * x * (1.0 + jnp.tanh(0.7978845608028654 * (x + 0.044715 * x * x * x)))


# ----------------------------- fused BERT encoder -----------------------------
def _bert_encoder_kernel(x_ref, mask_ref, eg_ref, eb_ref,
                         wqkv_ref, bqkv_ref, wo_ref, bo_ref,
                         ln1g_ref, ln1b_ref, wf1_ref, bf1_ref,
                         wf2_ref, bf2_ref, ln2g_ref, ln2b_ref,
                         o_ref, ctx_sc,
                         *, n_layers, batch, seq, heads, head_dim):
    hidden = heads * head_dim
    scale = 1.0 / (head_dim ** 0.5)
    mask = mask_ref[...]                                     # (B, S) additive mask

    x = _ln(x_ref[...], eg_ref[...], eb_ref[...])            # embedding LayerNorm

    for l in range(n_layers):
        # Fused Q|K|V projection: one (B*S, H) @ (H, 3H) matmul.
        qkv = jnp.dot(x, wqkv_ref[l], preferred_element_type=jnp.float32) + bqkv_ref[l]
        q = qkv[:, 0:hidden]
        k = qkv[:, hidden:2 * hidden]
        v = qkv[:, 2 * hidden:3 * hidden]

        # Per-(batch, head) attention on VMEM-resident data; results are written
        # straight into a context scratch slab (no wrapper-side head transposes).
        for b in range(batch):
            rows = slice(b * seq, (b + 1) * seq)
            add_b = mask[b:b + 1, :]                         # (1, S)
            for hh in range(heads):
                cols = slice(hh * head_dim, (hh + 1) * head_dim)
                qh, kh, vh = q[rows, cols], k[rows, cols], v[rows, cols]
                s = jnp.dot(qh, kh.T, preferred_element_type=jnp.float32) * scale + add_b
                s = s - jnp.max(s, axis=-1, keepdims=True)
                p = jnp.exp(s)
                p = p * pl.reciprocal(jnp.sum(p, axis=-1, keepdims=True), approx=True)
                ctx_sc[rows, cols] = jnp.dot(p, vh, preferred_element_type=jnp.float32)

        attn_out = (jnp.dot(ctx_sc[...], wo_ref[l], preferred_element_type=jnp.float32)
                    + bo_ref[l])
        x = _ln(x + attn_out, ln1g_ref[l], ln1b_ref[l])

        ff = _gelu(jnp.dot(x, wf1_ref[l], preferred_element_type=jnp.float32) + bf1_ref[l])
        ff = jnp.dot(ff, wf2_ref[l], preferred_element_type=jnp.float32) + bf2_ref[l]
        x = _ln(x + ff, ln2g_ref[l], ln2b_ref[l])

    o_ref[...] = x


def bert_encoder(params, x_emb, add_mask):
    """x_emb: (B*S, H) pre-LayerNorm embeddings; add_mask: (B, S) additive."""
    kernel = functools.partial(_bert_encoder_kernel, n_layers=N_BERT_LAYERS,
                               batch=B, seq=S, heads=NH, head_dim=HD)
    return pl.pallas_call(
        kernel,
        out_shape=jax.ShapeDtypeStruct((B * S, H), jnp.float32),
        scratch_shapes=[pltpu.VMEM((B * S, H), jnp.float32)],
    )(x_emb, add_mask,
      params["emb_ln_g"], params["emb_ln_b"],
      params["wqkv"], params["bqkv"], params["wo"], params["bo"],
      params["ln1_g"], params["ln1_b"], params["wf1"], params["bf1"],
      params["wf2"], params["bf2"], params["ln2_g"], params["ln2_b"])


# ------------------------ bidirectional LSTM layer -----------------------------
def _bilstm_layer_kernel(x_ref, wih_ref, whh_ref, b_ref,
                         out_ref, hN_ref,
                         gxi, gxf, gxg, gxo, h_sc, c_sc,
                         *, seq_len, batch, hidden):
    d = pl.program_id(0)                  # 0 = forward direction, 1 = backward
    in_sz = x_ref.shape[-1]
    x_flat = x_ref[...].reshape(seq_len * batch, in_sz)

    # Hoisted input projection: one (S*B, In) @ (In, H) matmul per gate, stored
    # as separate lane-aligned (S, B, H) slabs (gate order: i, f, g, o).
    def proj(g):
        y = jnp.dot(x_flat, wih_ref[g], preferred_element_type=jnp.float32) + b_ref[g]
        return y.reshape(seq_len, batch, hidden)

    gxi[...] = proj(0)
    gxf[...] = proj(1)
    gxg[...] = proj(2)
    gxo[...] = proj(3)

    h_sc[...] = jnp.zeros_like(h_sc)
    c_sc[...] = jnp.zeros_like(c_sc)

    rev_base = d * (seq_len - 1)          # fwd: idx = t ; bwd: idx = S-1-t
    sign = 1 - 2 * d

    def step(t, carry):
        idx = rev_base + sign * t
        h = h_sc[...]
        gi = gxi[idx] + jnp.dot(h, whh_ref[0], preferred_element_type=jnp.float32)
        gf = gxf[idx] + jnp.dot(h, whh_ref[1], preferred_element_type=jnp.float32)
        gg = gxg[idx] + jnp.dot(h, whh_ref[2], preferred_element_type=jnp.float32)
        go = gxo[idx] + jnp.dot(h, whh_ref[3], preferred_element_type=jnp.float32)
        i = jax.nn.sigmoid(gi)
        f = jax.nn.sigmoid(gf)
        g = jnp.tanh(gg)
        o = jax.nn.sigmoid(go)
        c = f * c_sc[...] + i * g
        h_new = o * jnp.tanh(c)
        c_sc[...] = c
        h_sc[...] = h_new
        out_ref[idx] = h_new
        return carry

    lax.fori_loop(0, seq_len, step, 0, unroll=True)   # S = 8: fully unrolled
    hN_ref[...] = h_sc[...]


def bilstm_layer(x_seq, w_ih, w_hh, b):
    """One bidirectional LSTM layer.
    x_seq: (S, B, In); w_ih: (2, 4, In, H); w_hh: (2, 4, H, H); b: (2, 4, 1, H)
    laid out as (direction, gate[i,f,g,o], ...), pre-transposed for x @ W.
    Returns (out: (2, S, B, H), hN: (2, B, H))."""
    s, bsz, in_sz = x_seq.shape
    hid = w_hh.shape[-1]
    kernel = functools.partial(_bilstm_layer_kernel, seq_len=s, batch=bsz, hidden=hid)
    return pl.pallas_call(
        kernel,
        out_shape=(jax.ShapeDtypeStruct((2, s, bsz, hid), jnp.float32),
                   jax.ShapeDtypeStruct((2, bsz, hid), jnp.float32)),
        grid=(2,),
        in_specs=[pl.BlockSpec((s, bsz, in_sz), lambda d: (0, 0, 0)),
                  pl.BlockSpec((None, 4, in_sz, hid), lambda d: (d, 0, 0, 0)),
                  pl.BlockSpec((None, 4, hid, hid), lambda d: (d, 0, 0, 0)),
                  pl.BlockSpec((None, 4, 1, hid), lambda d: (d, 0, 0, 0))],
        out_specs=(pl.BlockSpec((None, s, bsz, hid), lambda d: (d, 0, 0, 0)),
                   pl.BlockSpec((None, bsz, hid), lambda d: (d, 0, 0))),
        scratch_shapes=[pltpu.VMEM((s, bsz, hid), jnp.float32),
                        pltpu.VMEM((s, bsz, hid), jnp.float32),
                        pltpu.VMEM((s, bsz, hid), jnp.float32),
                        pltpu.VMEM((s, bsz, hid), jnp.float32),
                        pltpu.VMEM((bsz, hid), jnp.float32),
                        pltpu.VMEM((bsz, hid), jnp.float32)],
        compiler_params=pltpu.CompilerParams(dimension_semantics=("parallel",)),
    )(x_seq, w_ih, w_hh, b)


# ----------------------------- classifier head ---------------------------------
def _head_kernel(h_ref, w_ref, b_ref, o_ref):
    o_ref[...] = (jnp.dot(h_ref[...], w_ref[...], preferred_element_type=jnp.float32)
                  + b_ref[...])


def linear_head(h, w, b):
    return pl.pallas_call(
        _head_kernel,
        out_shape=jax.ShapeDtypeStruct((h.shape[0], w.shape[1]), jnp.float32),
    )(h, w, b)


# ----------------------------- parameter init ----------------------------------
def init_params(key):
    std = 0.05
    keys = iter(jax.random.split(key, 128))

    def nrm(shape):
        return (std * jax.random.normal(next(keys), shape)).astype(jnp.float32)

    p = {
        "word_emb": nrm((VOCAB, H)),
        "pos_emb": nrm((MAXPOS, H)),
        "type_emb": nrm((2, H)),
        "emb_ln_g": jnp.ones((1, H), jnp.float32),
        "emb_ln_b": jnp.zeros((1, H), jnp.float32),
        # BERT layer weights stacked over layers (leading dim = layer).
        "wqkv": nrm((N_BERT_LAYERS, H, 3 * H)),           # fused Q|K|V
        "bqkv": jnp.zeros((N_BERT_LAYERS, 1, 3 * H), jnp.float32),
        "wo":   nrm((N_BERT_LAYERS, H, H)),
        "bo":   jnp.zeros((N_BERT_LAYERS, 1, H), jnp.float32),
        "ln1_g": jnp.ones((N_BERT_LAYERS, 1, H), jnp.float32),
        "ln1_b": jnp.zeros((N_BERT_LAYERS, 1, H), jnp.float32),
        "wf1":  nrm((N_BERT_LAYERS, H, I_FF)),
        "bf1":  jnp.zeros((N_BERT_LAYERS, 1, I_FF), jnp.float32),
        "wf2":  nrm((N_BERT_LAYERS, I_FF, H)),
        "bf2":  jnp.zeros((N_BERT_LAYERS, 1, H), jnp.float32),
        "ln2_g": jnp.ones((N_BERT_LAYERS, 1, H), jnp.float32),
        "ln2_b": jnp.zeros((N_BERT_LAYERS, 1, H), jnp.float32),
        "lstm": [],
        "lin_w": nrm((2 * H, OUT_DIM)),
        "lin_b": jnp.zeros((1, OUT_DIM), jnp.float32),
    }
    for layer in range(N_LSTM_LAYERS):
        in_sz = H if layer == 0 else 2 * H
        p["lstm"].append({
            # (direction, gate[i,f,g,o], ...) layout, pre-transposed for x @ W.
            "w_ih": nrm((2, 4, in_sz, H)),
            "w_hh": nrm((2, 4, H, H)),
            "b":    nrm((2, 4, 1, H)),        # = b_ih + b_hh folded
        })
    return p


# ----------------------------- forward pass ------------------------------------
def bert_multi_lstm_forward(params, input_ids, attention_mask):
    # --- BERT embeddings (gather is XLA glue); everything else runs in Pallas.
    x = jnp.take(params["word_emb"], input_ids, axis=0)            # (B, S, H)
    x = x + params["pos_emb"][:S][None, :, :]
    x = x + params["type_emb"][0][None, None, :]
    add_mask = (1.0 - attention_mask.astype(jnp.float32)) * -1e9   # (B, S)

    encoded = bert_encoder(params, x.reshape(B * S, H), add_mask)  # (B*S, H)

    # permute(1, 0, 2): batch-major -> time-major.  pack_padded_sequence is
    # called with seq_lens == seq_len for every row (full-length sequences),
    # so it is equivalent to running the LSTM over the whole sequence.
    x_seq = encoded.reshape(B, S, H).transpose(1, 0, 2)            # (S, B, H)

    h0 = None
    for lp in params["lstm"]:
        out_dirs, hN = bilstm_layer(x_seq, lp["w_ih"], lp["w_hh"], lp["b"])
        if h0 is None:
            h0 = hN                      # layer-0 final states = h_n[0], h_n[1]
        # next layer input: concat(fwd, bwd); inter-layer dropout(0.1) is
        # identity in eval mode.
        x_seq = jnp.concatenate([out_dirs[0], out_dirs[1]], axis=-1)   # (S, B, 2H)

    # torch h_n layout is [l0_fwd, l0_bwd, l1_fwd, ...]; the module concatenates
    # h_n[0] and h_n[1] (layer-0 fwd/bwd), exactly as in the PyTorch source.
    output_hidden = jnp.concatenate([h0[0], h0[1]], axis=1)        # (B, 2H)
    # TODO(synk): train-mode dropout(0.2) uses torch RNG; eval-mode identity here.
    return linear_head(output_hidden, params["lin_w"], params["lin_b"])


# ----------------------------- main ---------------------------------------------
if __name__ == "__main__":
    key = jax.random.PRNGKey(0)
    k_param, k_ids = jax.random.split(key)

    params = init_params(k_param)
    input_ids = jax.random.randint(k_ids, (B, S), 0, VOCAB, dtype=jnp.int32)
    attention_mask = jnp.ones((B, S), dtype=jnp.int32).at[1, -2:].set(0)

    fwd = jax.jit(bert_multi_lstm_forward)
    logits = fwd(params, input_ids, attention_mask)
    jax.block_until_ready(logits)

    assert logits.shape == (B, OUT_DIM) and logits.dtype == jnp.float32
    assert bool(jnp.all(jnp.isfinite(logits)))
    print("KERNEL_OK")
</pallas_src>

<mosaic_0001>
module attributes {stable_mosaic.version = 11 : i64} {
  func.func @_head_kernel(%arg0: memref<2x64xf32, #tpu.memory_space<vmem>>, %arg1: memref<64x16xf32, #tpu.memory_space<vmem>>, %arg2: memref<1x16xf32, #tpu.memory_space<vmem>>, %arg3: memref<2x16xf32, #tpu.memory_space<vmem>>) attributes {dimension_semantics = [], scalar_prefetch = 0 : i64, scratch_operands = 0 : i64, tpu.core_type = #tpu.core_type<tc>} {
    %c0 = arith.constant 0 : index
    %c0_0 = arith.constant 0 : index
    %0 = vector.load %arg0[%c0, %c0_0] : memref<2x64xf32, #tpu.memory_space<vmem>>, vector<2x64xf32>
    %c0_1 = arith.constant 0 : index
    %c0_2 = arith.constant 0 : index
    %1 = vector.load %arg1[%c0_1, %c0_2] : memref<64x16xf32, #tpu.memory_space<vmem>>, vector<64x16xf32>
    %cst = arith.constant dense<0.000000e+00> : vector<2x16xf32>
    %2 = tpu.matmul %0, %1, %cst {dimension_numbers = #tpu.dot_dimension_numbers<[1], [0], [0], [1], [0, 0, 1, 1], [], []>} : vector<2x64xf32>, vector<64x16xf32>, vector<2x16xf32> -> vector<2x16xf32>
    %c0_3 = arith.constant 0 : index
    %c0_4 = arith.constant 0 : index
    %3 = vector.load %arg2[%c0_3, %c0_4] : memref<1x16xf32, #tpu.memory_space<vmem>>, vector<1x16xf32>
    %4 = vector.broadcast %3 : vector<1x16xf32> to vector<2x16xf32>
    %5 = arith.addf %2, %4 : vector<2x16xf32>
    %c0_5 = arith.constant 0 : index
    %c0_6 = arith.constant 0 : index
    %6 = vector.load %arg3[%c0_5, %c0_6] : memref<2x16xf32, #tpu.memory_space<vmem>>, vector<2x16xf32>
    tpu.vector_store %arg3[%c0_5, %c0_6], %5 {strides = array<i32>} : memref<2x16xf32, #tpu.memory_space<vmem>>, vector<2x16xf32>,
    return
  }
}

module attributes {stable_mosaic.version = 11 : i64} {
  func.func @_bert_encoder_kernel(%arg0: memref<16x32xf32, #tpu.memory_space<vmem>>, %arg1: memref<2x8xf32, #tpu.memory_space<vmem>>, %arg2: memref<1x32xf32, #tpu.memory_space<vmem>>, %arg3: memref<1x32xf32, #tpu.memory_space<vmem>>, %arg4: memref<2x32x96xf32, #tpu.memory_space<vmem>>, %arg5: memref<2x1x96xf32, #tpu.memory_space<vmem>>, %arg6: memref<2x32x32xf32, #tpu.memory_space<vmem>>, %arg7: memref<2x1x32xf32, #tpu.memory_space<vmem>>, %arg8: memref<2x1x32xf32, #tpu.memory_space<vmem>>, %arg9: memref<2x1x32xf32, #tpu.memory_space<vmem>>, %arg10: memref<2x32x64xf32, #tpu.memory_space<vmem>>, %arg11: memref<2x1x64xf32, #tpu.memory_space<vmem>>, %arg12: memref<2x64x32xf32, #tpu.memory_space<vmem>>, %arg13: memref<2x1x32xf32, #tpu.memory_space<vmem>>, %arg14: memref<2x1x32xf32, #tpu.memory_space<vmem>>, %arg15: memref<2x1x32xf32, #tpu.memory_space<vmem>>, %arg16: memref<16x32xf32, #tpu.memory_space<vmem>>, %arg17: memref<16x32xf32, #tpu.memory_space<vmem>>) attributes {dimension_semantics = [], scalar_prefetch = 0 : i64, scratch_operands = 1 : i64, tpu.core_type = #tpu.core_type<tc>} {
    %c0 = arith.constant 0 : index
    %c0_0 = arith.constant 0 : index
    %0 = vector.load %arg1[%c0, %c0_0] : memref<2x8xf32, #tpu.memory_space<vmem>>, vector<2x8xf32>
    %c0_1 = arith.constant 0 : index
    %c0_2 = arith.constant 0 : index
    %1 = vector.load %arg0[%c0_1, %c0_2] : memref<16x32xf32, #tpu.memory_space<vmem>>, vector<16x32xf32>
    %c0_3 = arith.constant 0 : index
    %c0_4 = arith.constant 0 : index
    %2 = vector.load %arg2[%c0_3, %c0_4] : memref<1x32xf32, #tpu.memory_space<vmem>>, vector<1x32xf32>
    %c0_5 = arith.constant 0 : index
    %c0_6 = arith.constant 0 : index
    %3 = vector.load %arg3[%c0_5, %c0_6] : memref<1x32xf32, #tpu.memory_space<vmem>>, vector<1x32xf32>
    %cst = arith.constant dense<0.000000e+00> : vector<16xf32>
    %4 = vector.multi_reduction <add>, %1, %cst [1] : vector<16x32xf32> to vector<16xf32>
    %5 = vector.shape_cast %4 : vector<16xf32> to vector<16x1xf32>
    %cst_7 = arith.constant 3.200000e+01 : f32
    %6 = vector.broadcast %cst_7 : f32 to vector<16x1xf32>
    %7 = arith.divf %5, %6 : vector<16x1xf32>
    %8 = vector.broadcast %7 : vector<16x1xf32> to vector<16x32xf32>
    %9 = arith.subf %1, %8 : vector<16x32xf32>
    %10 = vector.broadcast %7 : vector<16x1xf32> to vector<16x32xf32>
    %11 = arith.subf %1, %10 : vector<16x32xf32>
    %12 = arith.mulf %9, %11 : vector<16x32xf32>
    %cst_8 = arith.constant dense<0.000000e+00> : vector<16xf32>
    %13 = vector.multi_reduction <add>, %12, %cst_8 [1] : vector<16x32xf32> to vector<16xf32>
    %14 = vector.shape_cast %13 : vector<16xf32> to vector<16x1xf32>
    %cst_9 = arith.constant 3.200000e+01 : f32
    %15 = vector.broadcast %cst_9 : f32 to vector<16x1xf32>
    %16 = arith.divf %14, %15 : vector<16x1xf32>
    %17 = vector.broadcast %7 : vector<16x1xf32> to vector<16x32xf32>
    %18 = arith.subf %1, %17 : vector<16x32xf32>
    %cst_10 = arith.constant 9.99999996E-13 : f32
    %19 = vector.broadcast %cst_10 : f32 to vector<16x1xf32>
    %20 = arith.addf %16, %19 : vector<16x1xf32>
    %21 = math.rsqrt %20 : vector<16x1xf32>
    %22 = vector.broadcast %21 : vector<16x1xf32> to vector<16x32xf32>
    %23 = arith.mulf %18, %22 : vector<16x32xf32>
    %24 = vector.broadcast %2 : vector<1x32xf32> to vector<16x32xf32>
    %25 = arith.mulf %23, %24 : vector<16x32xf32>
    %26 = vector.broadcast %3 : vector<1x32xf32> to vector<16x32xf32>
    %27 = arith.addf %25, %26 : vector<16x32xf32>
    %c0_11 = arith.constant 0 : index
    %c0_12 = arith.constant 0 : index
    %c0_13 = arith.constant 0 : index
    %28 = vector.load %arg4[%c0_11, %c0_12, %c0_13] : memref<2x32x96xf32, #tpu.memory_space<vmem>>, vector<1x32x96xf32>
    %29 = vector.shape_cast %28 : vector<1x32x96xf32> to vector<32x96xf32>
    %cst_14 = arith.constant dense<0.000000e+00> : vector<16x96xf32>
    %30 = tpu.matmul %27, %29, %cst_14 {dimension_numbers = #tpu.dot_dimension_numbers<[1], [0], [0], [1], [0, 0, 1, 1], [], []>} : vector<16x32xf32>, vector<32x96xf32>, vector<16x96xf32> -> vector<16x96xf32>
    %c0_15 = arith.constant 0 : index
    %c0_16 = arith.constant 0 : index
    %c0_17 = arith.constant 0 : index
    %31 = vector.load %arg5[%c0_15, %c0_16, %c0_17] : memref<2x1x96xf32, #tpu.memory_space<vmem>>, vector<1x1x96xf32>
    %32 = vector.shape_cast %31 : vector<1x1x96xf32> to vector<1x96xf32>
    %33 = vector.broadcast %32 : vector<1x96xf32> to vector<16x96xf32>
    %34 = arith.addf %30, %33 : vector<16x96xf32>
    %35 = vector.extract_strided_slice %34 {offsets = [0, 0], sizes = [16, 32], strides = [1, 1]} : vector<16x96xf32> to vector<16x32xf32>
    %36 = vector.extract_strided_slice %34 {offsets = [0, 32], sizes = [16, 32], strides = [1, 1]} : vector<16x96xf32> to vector<16x32xf32>
    %37 = vector.extract_strided_slice %34 {offsets = [0, 64], sizes = [16, 32], strides = [1, 1]} : vector<16x96xf32> to vector<16x32xf32>
    %38 = vector.extract_strided_slice %0 {offsets = [0, 0], sizes = [1, 8], strides = [1, 1]} : vector<2x8xf32> to vector<1x8xf32>
    %39 = vector.extract_strided_slice %35 {offsets = [0, 0], sizes = [8, 8], strides = [1, 1]} : vector<16x32xf32> to vector<8x8xf32>
    %40 = vector.extract_strided_slice %36 {offsets = [0, 0], sizes = [8, 8], strides = [1, 1]} : vector<16x32xf32> to vector<8x8xf32>
    %41 = vector.extract_strided_slice %37 {offsets = [0, 0], sizes = [8, 8], strides = [1, 1]} : vector<16x32xf32> to vector<8x8xf32>
    %42 = tpu.transpose %40, [1, 0] : vector<8x8xf32> -> vector<8x8xf32>
    %cst_18 = arith.constant dense<0.000000e+00> : vector<8x8xf32>
    %43 = tpu.matmul %39, %42, %cst_18 {dimension_numbers = #tpu.dot_dimension_numbers<[1], [0], [0], [1], [0, 0, 1, 1], [], []>} : vector<8x8xf32>, vector<8x8xf32>, vector<8x8xf32> -> vector<8x8xf32>
    %cst_19 = arith.constant 0.353553385 : f32
    %44 = vector.broadcast %cst_19 : f32 to vector<8x8xf32>
    %45 = arith.mulf %43, %44 : vector<8x8xf32>
    %46 = vector.broadcast %38 : vector<1x8xf32> to vector<8x8xf32>
    %47 = arith.addf %45, %46 : vector<8x8xf32>
    %cst_20 = arith.constant dense<0xFF800000> : vector<8xf32>
    %48 = vector.multi_reduction <maximumf>, %47, %cst_20 [1] : vector<8x8xf32> to vector<8xf32>
    %49 = vector.shape_cast %48 : vector<8xf32> to vector<8x1xf32>
    %50 = vector.broadcast %49 : vector<8x1xf32> to vector<8x8xf32>
    %51 = arith.subf %47, %50 : vector<8x8xf32>
    %52 = math.exp %51 : vector<8x8xf32>
    %cst_21 = arith.constant dense<0.000000e+00> : vector<8xf32>
    %53 = vector.multi_reduction <add>, %52, %cst_21 [1] : vector<8x8xf32> to vector<8xf32>
    %54 = vector.shape_cast %53 : vector<8xf32> to vector<8x1xf32>
    %55 = tpu.reciprocal %54 {approx = true} : vector<8x1xf32> -> vector<8x1xf32>
    %56 = vector.broadcast %55 : vector<8x1xf32> to vector<8x8xf32>
    %57 = arith.mulf %52, %56 : vector<8x8xf32>
    %cst_22 = arith.constant dense<0.000000e+00> : vector<8x8xf32>
    %58 = tpu.matmul %57, %41, %cst_22 {dimension_numbers = #tpu.dot_dimension_numbers<[1], [0], [0], [1], [0, 0, 1, 1], [], []>} : vector<8x8xf32>, vector<8x8xf32>, vector<8x8xf32> -> vector<8x8xf32>
    %c0_23 = arith.constant 0 : index
    %c0_24 = arith.constant 0 : index
    %59 = vector.load %arg17[%c0_23, %c0_24] : memref<16x32xf32, #tpu.memory_space<vmem>>, vector<8x8xf32>
    tpu.vector_store %arg17[%c0_23, %c0_24], %58 {strides = array<i32>} : memref<16x32xf32, #tpu.memory_space<vmem>>, vector<8x8xf32>,
    %60 = vector.extract_strided_slice %35 {offsets = [0, 8], sizes = [8, 8], strides = [1, 1]} : vector<16x32xf32> to vector<8x8xf32>
    %61 = vector.extract_strided_slice %36 {offsets = [0, 8], sizes = [8, 8], strides = [1, 1]} : vector<16x32xf32> to vector<8x8xf32>
    %62 = vector.extract_strided_slice %37 {offsets = [0, 8], sizes = [8, 8], strides = [1, 1]} : vector<16x32xf32> to vector<8x8xf32>
    %63 = tpu.transpose %61, [1, 0] : vector<8x8xf32> -> vector<8x8xf32>
    %cst_25 = arith.constant dense<0.000000e+00> : vector<8x8xf32>
    %64 = tpu.matmul %60, %63, %cst_25 {dimension_numbers = #tpu.dot_dimension_numbers<[1], [0], [0], [1], [0, 0, 1, 1], [], []>} : vector<8x8xf32>, vector<8x8xf32>, vector<8x8xf32> -> vector<8x8xf32>
    %cst_26 = arith.constant 0.353553385 : f32
    %65 = vector.broadcast %cst_26 : f32 to vector<8x8xf32>
    %66 = arith.mulf %64, %65 : vector<8x8xf32>
    %67 = vector.broadcast %38 : vector<1x8xf32> to vector<8x8xf32>
    %68 = arith.addf %66, %67 : vector<8x8xf32>
    %cst_27 = arith.constant dense<0xFF800000> : vector<8xf32>
    %69 = vector.multi_reduction <maximumf>, %68, %cst_27 [1] : vector<8x8xf32> to vector<8xf32>
    %70 = vector.shape_cast %69 : vector<8xf32> to vector<8x1xf32>
    %71 = vector.broadcast %70 : vector<8x1xf32> to vector<8x8xf32>
    %72 = arith.subf %68, %71 : vector<8x8xf32>
    %73 = math.exp %72 : vector<8x8xf32>
    %cst_28 = arith.constant dense<0.000000e+00> : vector<8xf32>
    %74 = vector.multi_reduction <add>, %73, %cst_28 [1] : vector<8x8xf32> to vector<8xf32>
    %75 = vector.shape_cast %74 : vector<8xf32> to vector<8x1xf32>
    %76 = tpu.reciprocal %75 {approx = true} : vector<8x1xf32> -> vector<8x1xf32>
    %77 = vector.broadcast %76 : vector<8x1xf32> to vector<8x8xf32>
    %78 = arith.mulf %73, %77 : vector<8x8xf32>
    %cst_29 = arith.constant dense<0.000000e+00> : vector<8x8xf32>
    %79 = tpu.matmul %78, %62, %cst_29 {dimension_numbers = #tpu.dot_dimension_numbers<[1], [0], [0], [1], [0, 0, 1, 1], [], []>} : vector<8x8xf32>, vector<8x8xf32>, vector<8x8xf32> -> vector<8x8xf32>
    %c0_30 = arith.constant 0 : index
    %c8 = arith.constant 8 : index
    %80 = vector.load %arg17[%c0_30, %c8] : memref<16x32xf32, #tpu.memory_space<vmem>>, vector<8x8xf32>
    tpu.vector_store %arg17[%c0_30, %c8], %79 {strides = array<i32>} : memref<16x32xf32, #tpu.memory_space<vmem>>, vector<8x8xf32>,
    %81 = vector.extract_strided_slice %35 {offsets = [0, 16], sizes = [8, 8], strides = [1, 1]} : vector<16x32xf32> to vector<8x8xf32>
    %82 = vector.extract_strided_slice %36 {offsets = [0, 16], sizes = [8, 8], strides = [1, 1]} : vector<16x32xf32> to vector<8x8xf32>
    %83 = vector.extract_strided_slice %37 {offsets = [0, 16], sizes = [8, 8], strides = [1, 1]} : vector<16x32xf32> to vector<8x8xf32>
    %84 = tpu.transpose %82, [1, 0] : vector<8x8xf32> -> vector<8x8xf32>
    %cst_31 = arith.constant dense<0.000000e+00> : vector<8x8xf32>
    %85 = tpu.matmul %81, %84, %cst_31 {dimension_numbers = #tpu.dot_dimension_numbers<[1], [0], [0], [1], [0, 0, 1, 1], [], []>} : vector<8x8xf32>, vector<8x8xf32>, vector<8x8xf32> -> vector<8x8xf32>
    %cst_32 = arith.constant 0.353553385 : f32
    %86 = vector.broadcast %cst_32 : f32 to vector<8x8xf32>
    %87 = arith.mulf %85, %86 : vector<8x8xf32>
    %88 = vector.broadcast %38 : vector<1x8xf32> to vector<8x8xf32>
    %89 = arith.addf %87, %88 : vector<8x8xf32>
    %cst_33 = arith.constant dense<0xFF800000> : vector<8xf32>
    %90 = vector.multi_reduction <maximumf>, %89, %cst_33 [1] : vector<8x8xf32> to vector<8xf32>
    %91 = vector.shape_cast %90 : vector<8xf32> to vector<8x1xf32>
    %92 = vector.broadcast %91 : vector<8x1xf32> to vector<8x8xf32>
    %93 = arith.subf %89, %92 : vector<8x8xf32>
    %94 = math.exp %93 : vector<8x8xf32>
    %cst_34 = arith.constant dense<0.000000e+00> : vector<8xf32>
    %95 = vector.multi_reduction <add>, %94, %cst_34 [1] : vector<8x8xf32> to vector<8xf32>
    %96 = vector.shape_cast %95 : vector<8xf32> to vector<8x1xf32>
    %97 = tpu.reciprocal %96 {approx = true} : vector<8x1xf32> -> vector<8x1xf32>
    %98 = vector.broadcast %97 : vector<8x1xf32> to vector<8x8xf32>
    %99 = arith.mulf %94, %98 : vector<8x8xf32>
    %cst_35 = arith.constant dense<0.000000e+00> : vector<8x8xf32>
    %100 = tpu.matmul %99, %83, %cst_35 {dimension_numbers = #tpu.dot_dimension_numbers<[1], [0], [0], [1], [0, 0, 1, 1], [], []>} : vector<8x8xf32>, vector<8x8xf32>, vector<8x8xf32> -> vector<8x8xf32>
    %c0_36 = arith.constant 0 : index
    %c16 = arith.constant 16 : index
    %101 = vector.load %arg17[%c0_36, %c16] : memref<16x32xf32, #tpu.memory_space<vmem>>, vector<8x8xf32>
    tpu.vector_store %arg17[%c0_36, %c16], %100 {strides = array<i32>} : memref<16x32xf32, #tpu.memory_space<vmem>>, vector<8x8xf32>,
    %102 = vector.extract_strided_slice %35 {offsets = [0, 24], sizes = [8, 8], strides = [1, 1]} : vector<16x32xf32> to vector<8x8xf32>
    %103 = vector.extract_strided_slice %36 {offsets = [0, 24], sizes = [8, 8], strides = [1, 1]} : vector<16x32xf32> to vector<8x8xf32>
    %104 = vector.extract_strided_slice %37 {offsets = [0, 24], sizes = [8, 8], strides = [1, 1]} : vector<16x32xf32> to vector<8x8xf32>
    %105 = tpu.transpose %103, [1, 0] : vector<8x8xf32> -> vector<8x8xf32>
    %cst_37 = arith.constant dense<0.000000e+00> : vector<8x8xf32>
    %106 = tpu.matmul %102, %105, %cst_37 {dimension_numbers = #tpu.dot_dimension_numbers<[1], [0], [0], [1], [0, 0, 1, 1], [], []>} : vector<8x8xf32>, vector<8x8xf32>, vector<8x8xf32> -> vector<8x8xf32>
    %cst_38 = arith.constant 0.353553385 : f32
    %107 = vector.broadcast %cst_38 : f32 to vector<8x8xf32>
    %108 = arith.mulf %106, %107 : vector<8x8xf32>
    %109 = vector.broadcast %38 : vector<1x8xf32> to vector<8x8xf32>
    %110 = arith.addf %108, %109 : vector<8x8xf32>
    %cst_39 = arith.constant dense<0xFF800000> : vector<8xf32>
    %111 = vector.multi_reduction <maximumf>, %110, %cst_39 [1] : vector<8x8xf32> to vector<8xf32>
    %112 = vector.shape_cast %111 : vector<8xf32> to vector<8x1xf32>
    %113 = vector.broadcast %112 : vector<8x1xf32> to vector<8x8xf32>
    %114 = arith.subf %110, %113 : vector<8x8xf32>
    %115 = math.exp %114 : vector<8x8xf32>
    %cst_40 = arith.constant dense<0.000000e+00> : vector<8xf32>
    %116 = vector.multi_reduction <add>, %115, %cst_40 [1] : vector<8x8xf32> to vector<8xf32>
    %117 = vector.shape_cast %116 : vector<8xf32> to vector<8x1xf32>
    %118 = tpu.reciprocal %117 {approx = true} : vector<8x1xf32> -> vector<8x1xf32>
    %119 = vector.broadcast %118 : vector<8x1xf32> to vector<8x8xf32>
    %120 = arith.mulf %115, %119 : vector<8x8xf32>
    %cst_41 = arith.constant dense<0.000000e+00> : vector<8x8xf32>
    %121 = tpu.matmul %120, %104, %cst_41 {dimension_numbers = #tpu.dot_dimension_numbers<[1], [0], [0], [1], [0, 0, 1, 1], [], []>} : vector<8x8xf32>, vector<8x8xf32>, vector<8x8xf32> -> vector<8x8xf32>
    %c0_42 = arith.constant 0 : index
    %c24 = arith.constant 24 : index
    %122 = vector.load %arg17[%c0_42, %c24] : memref<16x32xf32, #tpu.memory_space<vmem>>, vector<8x8xf32>
    tpu.vector_store %arg17[%c0_42, %c24], %121 {strides = array<i32>} : memref<16x32xf32, #tpu.memory_space<vmem>>, vector<8x8xf32>,
    %123 = vector.extract_strided_slice %0 {offsets = [1, 0], sizes = [1, 8], strides = [1, 1]} : vector<2x8xf32> to vector<1x8xf32>
    %124 = vector.extract_strided_slice %35 {offsets = [8, 0], sizes = [8, 8], strides = [1, 1]} : vector<16x32xf32> to vector<8x8xf32>
    %125 = vector.extract_strided_slice %36 {offsets = [8, 0], sizes = [8, 8], strides = [1, 1]} : vector<16x32xf32> to vector<8x8xf32>
    %126 = vector.extract_strided_slice %37 {offsets = [8, 0], sizes = [8, 8], strides = [1, 1]} : vector<16x32xf32> to vector<8x8xf32>
    %127 = tpu.transpose %125, [1, 0] : vector<8x8xf32> -> vector<8x8xf32>
    %cst_43 = arith.constant dense<0.000000e+00> : vector<8x8xf32>
    %128 = tpu.matmul %124, %127, %cst_43 {dimension_numbers = #tpu.dot_dimension_numbers<[1], [0], [0], [1], [0, 0, 1, 1], [], []>} : vector<8x8xf32>, vector<8x8xf32>, vector<8x8xf32> -> vector<8x8xf32>
    %cst_44 = arith.constant 0.353553385 : f32
    %129 = vector.broadcast %cst_44 : f32 to vector<8x8xf32>
    %130 = arith.mulf %128, %129 : vector<8x8xf32>
    %131 = vector.broadcast %123 : vector<1x8xf32> to vector<8x8xf32>
    %132 = arith.addf %130, %131 : vector<8x8xf32>
    %cst_45 = arith.constant dense<0xFF800000> : vector<8xf32>
    %133 = vector.multi_reduction <maximumf>, %132, %cst_45 [1] : vector<8x8xf32> to vector<8xf32>
    %134 = vector.shape_cast %133 : vector<8xf32> to vector<8x1xf32>
    %135 = vector.broadcast %134 : vector<8x1xf32> to vector<8x8xf32>
    %136 = arith.subf %132, %135 : vector<8x8xf32>
    %137 = math.exp %136 : vector<8x8xf32>
    %cst_46 = arith.constant dense<0.000000e+00> : vector<8xf32>
    %138 = vector.multi_reduction <add>, %137, %cst_46 [1] : vector<8x8xf32> to vector<8xf32>
    %139 = vector.shape_cast %138 : vector<8xf32> to vector<8x1xf32>
    %140 = tpu.reciprocal %139 {approx = true} : vector<8x1xf32> -> vector<8x1xf32>
    %141 = vector.broadcast %140 : vector<8x1xf32> to vector<8x8xf32>
    %142 = arith.mulf %137, %141 : vector<8x8xf32>
    %cst_47 = arith.constant dense<0.000000e+00> : vector<8x8xf32>
    %143 = tpu.matmul %142, %126, %cst_47 {dimension_numbers = #tpu.dot_dimension_numbers<[1], [0], [0], [1], [0, 0, 1, 1], [], []>} : vector<8x8xf32>, vector<8x8xf32>, vector<8x8xf32> -> vector<8x8xf32>
    %c8_48 = arith.constant 8 : index
    %c0_49 = arith.constant 0 : index
    %144 = vector.load %arg17[%c8_48, %c0_49] : memref<16x32xf32, #tpu.memory_space<vmem>>, vector<8x8xf32>
    tpu.vector_store %arg17[%c8_48, %c0_49], %143 {strides = array<i32>} : memref<16x32xf32, #tpu.memory_space<vmem>>, vector<8x8xf32>,
    %145 = vector.extract_strided_slice %35 {offsets = [8, 8], sizes = [8, 8], strides = [1, 1]} : vector<16x32xf32> to vector<8x8xf32>
    %146 = vector.extract_strided_slice %36 {offsets = [8, 8], sizes = [8, 8], strides = [1, 1]} : vector<16x32xf32> to vector<8x8xf32>
    %147 = vector.extract_strided_slice %37 {offsets = [8, 8], sizes = [8, 8], strides = [1, 1]} : vector<16x32xf32> to vector<8x8xf32>
    %148 = tpu.transpose %146, [1, 0] : vector<8x8xf32> -> vector<8x8xf32>
    %cst_50 = arith.constant dense<0.000000e+00> : vector<8x8xf32>
    %149 = tpu.matmul %145, %148, %cst_50 {dimension_numbers = #tpu.dot_dimension_numbers<[1], [0], [0], [1], [0, 0, 1, 1], [], []>} : vector<8x8xf32>, vector<8x8xf32>, vector<8x8xf32> -> vector<8x8xf32>
    %cst_51 = arith.constant 0.353553385 : f32
    %150 = vector.broadcast %cst_51 : f32 to vector<8x8xf32>
    %151 = arith.mulf %149, %150 : vector<8x8xf32>
    %152 = vector.broadcast %123 : vector<1x8xf32> to vector<8x8xf32>
    %153 = arith.addf %151, %152 : vector<8x8xf32>
    %cst_52 = arith.constant dense<0xFF800000> : vector<8xf32>
    %154 = vector.multi_reduction <maximumf>, %153, %cst_52 [1] : vector<8x8xf32> to vector<8xf32>
    %155 = vector.shape_cast %154 : vector<8xf32> to vector<8x1xf32>
    %156 = vector.broadcast %155 : vector<8x1xf32> to vector<8x8xf32>
    %157 = arith.subf %153, %156 : vector<8x8xf32>
    %158 = math.exp %157 : vector<8x8xf32>
    %cst_53 = arith.constant dense<0.000000e+00> : vector<8xf32>
    %159 = vector.multi_reduction <add>, %158, %cst_53 [1] : vector<8x8xf32> to vector<8xf32>
    %160 = vector.shape_cast %159 : vector<8xf32> to vector<8x1xf32>
    %161 = tpu.reciprocal %160 {approx = true} : vector<8x1xf32> -> vector<8x1xf32>
    %162 = vector.broadcast %161 : vector<8x1xf32> to vector<8x8xf32>
    %163 = arith.mulf %158, %162 : vector<8x8xf32>
    %cst_54 = arith.constant dense<0.000000e+00> : vector<8x8xf32>
    %164 = tpu.matmul %163, %147, %cst_54 {dimension_numbers = #tpu.dot_dimension_numbers<[1], [0], [0], [1], [0, 0, 1, 1], [], []>} : vector<8x8xf32>, vector<8x8xf32>, vector<8x8xf32> -> vector<8x8xf32>
    %c8_55 = arith.constant 8 : index
    %c8_56 = arith.constant 8 : index
    %165 = vector.load %arg17[%c8_55, %c8_56] : memref<16x32xf32, #tpu.memory_space<vmem>>, vector<8x8xf32>
    tpu.vector_store %arg17[%c8_55, %c8_56], %164 {strides = array<i32>} : memref<16x32xf32, #tpu.memory_space<vmem>>, vector<8x8xf32>,
    %166 = vector.extract_strided_slice %35 {offsets = [8, 16], sizes = [8, 8], strides = [1, 1]} : vector<16x32xf32> to vector<8x8xf32>
    %167 = vector.extract_strided_slice %36 {offsets = [8, 16], sizes = [8, 8], strides = [1, 1]} : vector<16x32xf32> to vector<8x8xf32>
    %168 = vector.extract_strided_slice %37 {offsets = [8, 16], sizes = [8, 8], strides = [1, 1]} : vector<16x32xf32> to vector<8x8xf32>
    %169 = tpu.transpose %167, [1, 0] : vector<8x8xf32> -> vector<8x8xf32>
    %cst_57 = arith.constant dense<0.000000e+00> : vector<8x8xf32>
    %170 = tpu.matmul %166, %169, %cst_57 {dimension_numbers = #tpu.dot_dimension_numbers<[1], [0], [0], [1], [0, 0, 1, 1], [], []>} : vector<8x8xf32>, vector<8x8xf32>, vector<8x8xf32> -> vector<8x8xf32>
    %cst_58 = arith.constant 0.353553385 : f32
    %171 = vector.broadcast %cst_58 : f32 to vector<8x8xf32>
    %172 = arith.mulf %170, %171 : vector<8x8xf32>
    %173 = vector.broadcast %123 : vector<1x8xf32> to vector<8x8xf32>
    %174 = arith.addf %172, %173 : vector<8x8xf32>
    %cst_59 = arith.constant dense<0xFF800000> : vector<8xf32>
    %175 = vector.multi_reduction <maximumf>, %174, %cst_59 [1] : vector<8x8xf32> to vector<8xf32>
    %176 = vector.shape_cast %175 : vector<8xf32> to vector<8x1xf32>
    %177 = vector.broadcast %176 : vector<8x1xf32> to vector<8x8xf32>
    %178 = arith.subf %174, %177 : vector<8x8xf32>
    %179 = math.exp %178 : vector<8x8xf32>
    %cst_60 = arith.constant dense<0.000000e+00> : vector<8xf32>
    %180 = vector.multi_reduction <add>, %179, %cst_60 [1] : vector<8x8xf32> to vector<8xf32>
    %181 = vector.shape_cast %180 : vector<8xf32> to vector<8x1xf32>
    %182 = tpu.reciprocal %181 {approx = true} : vector<8x1xf32> -> vector<8x1xf32>
    %183 = vector.broadcast %182 : vector<8x1xf32> to vector<8x8xf32>
    %184 = arith.mulf %179, %183 : vector<8x8xf32>
    %cst_61 = arith.constant dense<0.000000e+00> : vector<8x8xf32>
    %185 = tpu.matmul %184, %168, %cst_61 {dimension_numbers = #tpu.dot_dimension_numbers<[1], [0], [0], [1], [0, 0, 1, 1], [], []>} : vector<8x8xf32>, vector<8x8xf32>, vector<8x8xf32> -> vector<8x8xf32>
    %c8_62 = arith.constant 8 : index
    %c16_63 = arith.constant 16 : index
    %186 = vector.load %arg17[%c8_62, %c16_63] : memref<16x32xf32, #tpu.memory_space<vmem>>, vector<8x8xf32>
    tpu.vector_store %arg17[%c8_62, %c16_63], %185 {strides = array<i32>} : memref<16x32xf32, #tpu.memory_space<vmem>>, vector<8x8xf32>,
    %187 = vector.extract_strided_slice %35 {offsets = [8, 24], sizes = [8, 8], strides = [1, 1]} : vector<16x32xf32> to vector<8x8xf32>
    %188 = vector.extract_strided_slice %36 {offsets = [8, 24], sizes = [8, 8], strides = [1, 1]} : vector<16x32xf32> to vector<8x8xf32>
    %189 = vector.extract_strided_slice %37 {offsets = [8, 24], sizes = [8, 8], strides = [1, 1]} : vector<16x32xf32> to vector<8x8xf32>
    %190 = tpu.transpose %188, [1, 0] : vector<8x8xf32> -> vector<8x8xf32>
    %cst_64 = arith.constant dense<0.000000e+00> : vector<8x8xf32>
    %191 = tpu.matmul %187, %190, %cst_64 {dimension_numbers = #tpu.dot_dimension_numbers<[1], [0], [0], [1], [0, 0, 1, 1], [], []>} : vector<8x8xf32>, vector<8x8xf32>, vector<8x8xf32> -> vector<8x8xf32>
    %cst_65 = arith.constant 0.353553385 : f32
    %192 = vector.broadcast %cst_65 : f32 to vector<8x8xf32>
    %193 = arith.mulf %191, %192 : vector<8x8xf32>
    %194 = vector.broadcast %123 : vector<1x8xf32> to vector<8x8xf32>
    %195 = arith.addf %193, %194 : vector<8x8xf32>
    %cst_66 = arith.constant dense<0xFF800000> : vector<8xf32>
    %196 = vector.multi_reduction <maximumf>, %195, %cst_66 [1] : vector<8x8xf32> to vector<8xf32>
    %197 = vector.shape_cast %196 : vector<8xf32> to vector<8x1xf32>
    %198 = vector.broadcast %197 : vector<8x1xf32> to vector<8x8xf32>
    %199 = arith.subf %195, %198 : vector<8x8xf32>
    %200 = math.exp %199 : vector<8x8xf32>
    %cst_67 = arith.constant dense<0.000000e+00> : vector<8xf32>
    %201 = vector.multi_reduction <add>, %200, %cst_67 [1] : vector<8x8xf32> to vector<8xf32>
    %202 = vector.shape_cast %201 : vector<8xf32> to vector<8x1xf32>
    %203 = tpu.reciprocal %202 {approx = true} : vector<8x1xf32> -> vector<8x1xf32>
    %204 = vector.broadcast %203 : vector<8x1xf32> to vector<8x8xf32>
    %205 = arith.mulf %200, %204 : vector<8x8xf32>
    %cst_68 = arith.constant dense<0.000000e+00> : vector<8x8xf32>
    %206 = tpu.matmul %205, %189, %cst_68 {dimension_numbers = #tpu.dot_dimension_numbers<[1], [0], [0], [1], [0, 0, 1, 1], [], []>} : vector<8x8xf32>, vector<8x8xf32>, vector<8x8xf32> -> vector<8x8xf32>
    %c8_69 = arith.constant 8 : index
    %c24_70 = arith.constant 24 : index
    %207 = vector.load %arg17[%c8_69, %c24_70] : memref<16x32xf32, #tpu.memory_space<vmem>>, vector<8x8xf32>
    tpu.vector_store %arg17[%c8_69, %c24_70], %206 {strides = array<i32>} : memref<16x32xf32, #tpu.memory_space<vmem>>, vector<8x8xf32>,
    %c0_71 = arith.constant 0 : index
    %c0_72 = arith.constant 0 : index
    %208 = vector.load %arg17[%c0_71, %c0_72] : memref<16x32xf32, #tpu.memory_space<vmem>>, vector<16x32xf32>
    %c0_73 = arith.constant 0 : index
    %c0_74 = arith.constant 0 : index
    %c0_75 = arith.constant 0 : index
    %209 = vector.load %arg6[%c0_73, %c0_74, %c0_75] : memref<2x32x32xf32, #tpu.memory_space<vmem>>, vector<1x32x32xf32>
    %210 = vector.shape_cast %209 : vector<1x32x32xf32> to vector<32x32xf32>
    %cst_76 = arith.constant dense<0.000000e+00> : vector<16x32xf32>
    %211 = tpu.matmul %208, %210, %cst_76 {dimension_numbers = #tpu.dot_dimension_numbers<[1], [0], [0], [1], [0, 0, 1, 1], [], []>} : vector<16x32xf32>, vector<32x32xf32>, vector<16x32xf32> -> vector<16x32xf32>
    %c0_77 = arith.constant 0 : index
    %c0_78 = arith.constant 0 : index
    %c0_79 = arith.constant 0 : index
    %212 = vector.load %arg7[%c0_77, %c0_78, %c0_79] : memref<2x1x32xf32, #tpu.memory_space<vmem>>, vector<1x1x32xf32>
    %213 = vector.shape_cast %212 : vector<1x1x32xf32> to vector<1x32xf32>
    %214 = vector.broadcast %213 : vector<1x32xf32> to vector<16x32xf32>
    %215 = arith.addf %211, %214 : vector<16x32xf32>
    %216 = arith.addf %27, %215 : vector<16x32xf32>
    %c0_80 = arith.constant 0 : index
    %c0_81 = arith.constant 0 : index
    %c0_82 = arith.constant 0 : index
    %217 = vector.load %arg8[%c0_80, %c0_81, %c0_82] : memref<2x1x32xf32, #tpu.memory_space<vmem>>, vector<1x1x32xf32>
    %218 = vector.shape_cast %217 : vector<1x1x32xf32> to vector<1x32xf32>
    %c0_83 = arith.constant 0 : index
    %c0_84 = arith.constant 0 : index
    %c0_85 = arith.constant 0 : index
    %219 = vector.load %arg9[%c0_83, %c0_84, %c0_85] : memref<2x1x32xf32, #tpu.memory_space<vmem>>, vector<1x1x32xf32>
    %220 = vector.shape_cast %219 : vector<1x1x32xf32> to vector<1x32xf32>
    %cst_86 = arith.constant dense<0.000000e+00> : vector<16xf32>
    %221 = vector.multi_reduction <add>, %216, %cst_86 [1] : vector<16x32xf32> to vector<16xf32>
    %222 = vector.shape_cast %221 : vector<16xf32> to vector<16x1xf32>
    %cst_87 = arith.constant 3.200000e+01 : f32
    %223 = vector.broadcast %cst_87 : f32 to vector<16x1xf32>
    %224 = arith.divf %222, %223 : vector<16x1xf32>
    %225 = vector.broadcast %224 : vector<16x1xf32> to vector<16x32xf32>
    %226 = arith.subf %216, %225 : vector<16x32xf32>
    %227 = vector.broadcast %224 : vector<16x1xf32> to vector<16x32xf32>
    %228 = arith.subf %216, %227 : vector<16x32xf32>
    %229 = arith.mulf %226, %228 : vector<16x32xf32>
    %cst_88 = arith.constant dense<0.000000e+00> : vector<16xf32>
    %230 = vector.multi_reduction <add>, %229, %cst_88 [1] : vector<16x32xf32> to vector<16xf32>
    %231 = vector.shape_cast %230 : vector<16xf32> to vector<16x1xf32>
    %cst_89 = arith.constant 3.200000e+01 : f32
    %232 = vector.broadcast %cst_89 : f32 to vector<16x1xf32>
    %233 = arith.divf %231, %232 : vector<16x1xf32>
    %234 = vector.broadcast %224 : vector<16x1xf32> to vector<16x32xf32>
    %235 = arith.subf %216, %234 : vector<16x32xf32>
    %cst_90 = arith.constant 9.99999996E-13 : f32
    %236 = vector.broadcast %cst_90 : f32 to vector<16x1xf32>
    %237 = arith.addf %233, %236 : vector<16x1xf32>
    %238 = math.rsqrt %237 : vector<16x1xf32>
    %239 = vector.broadcast %238 : vector<16x1xf32> to vector<16x32xf32>
    %240 = arith.mulf %235, %239 : vector<16x32xf32>
    %241 = vector.broadcast %218 : vector<1x32xf32> to vector<16x32xf32>
    %242 = arith.mulf %240, %241 : vector<16x32xf32>
    %243 = vector.broadcast %220 : vector<1x32xf32> to vector<16x32xf32>
    %244 = arith.addf %242, %243 : vector<16x32xf32>
    %c0_91 = arith.constant 0 : index
    %c0_92 = arith.constant 0 : index
    %c0_93 = arith.constant 0 : index
    %245 = vector.load %arg10[%c0_91, %c0_92, %c0_93] : memref<2x32x64xf32, #tpu.memory_space<vmem>>, vector<1x32x64xf32>
    %246 = vector.shape_cast %245 : vector<1x32x64xf32> to vector<32x64xf32>
    %cst_94 = arith.constant dense<0.000000e+00> : vector<16x64xf32>
    %247 = tpu.matmul %244, %246, %cst_94 {dimension_numbers = #tpu.dot_dimension_numbers<[1], [0], [0], [1], [0, 0, 1, 1], [], []>} : vector<16x32xf32>, vector<32x64xf32>, vector<16x64xf32> -> vector<16x64xf32>
    %c0_95 = arith.constant 0 : index
    %c0_96 = arith.constant 0 : index
    %c0_97 = arith.constant 0 : index
    %248 = vector.load %arg11[%c0_95, %c0_96, %c0_97] : memref<2x1x64xf32, #tpu.memory_space<vmem>>, vector<1x1x64xf32>
    %249 = vector.shape_cast %248 : vector<1x1x64xf32> to vector<1x64xf32>
    %250 = vector.broadcast %249 : vector<1x64xf32> to vector<16x64xf32>
    %251 = arith.addf %247, %250 : vector<16x64xf32>
    %cst_98 = arith.constant 5.000000e-01 : f32
    %252 = vector.broadcast %cst_98 : f32 to vector<16x64xf32>
    %253 = arith.mulf %252, %251 : vector<16x64xf32>
    %cst_99 = arith.constant 4.471500e-02 : f32
    %254 = vector.broadcast %cst_99 : f32 to vector<16x64xf32>
    %255 = arith.mulf %254, %251 : vector<16x64xf32>
    %256 = arith.mulf %255, %251 : vector<16x64xf32>
    %257 = arith.mulf %256, %251 : vector<16x64xf32>
    %258 = arith.addf %251, %257 : vector<16x64xf32>
    %cst_100 = arith.constant 0.797884583 : f32
    %259 = vector.broadcast %cst_100 : f32 to vector<16x64xf32>
    %260 = arith.mulf %259, %258 : vector<16x64xf32>
    %261 = math.tanh %260 : vector<16x64xf32>
    %cst_101 = arith.constant 1.000000e+00 : f32
    %262 = vector.broadcast %cst_101 : f32 to vector<16x64xf32>
    %263 = arith.addf %262, %261 : vector<16x64xf32>
    %264 = arith.mulf %253, %263 : vector<16x64xf32>
    %c0_102 = arith.constant 0 : index
    %c0_103 = arith.constant 0 : index
    %c0_104 = arith.constant 0 : index
    %265 = vector.load %arg12[%c0_102, %c0_103, %c0_104] : memref<2x64x32xf32, #tpu.memory_space<vmem>>, vector<1x64x32xf32>
    %266 = vector.shape_cast %265 : vector<1x64x32xf32> to vector<64x32xf32>
    %cst_105 = arith.constant dense<0.000000e+00> : vector<16x32xf32>
    %267 = tpu.matmul %264, %266, %cst_105 {dimension_numbers = #tpu.dot_dimension_numbers<[1], [0], [0], [1], [0, 0, 1, 1], [], []>} : vector<16x64xf32>, vector<64x32xf32>, vector<16x32xf32> -> vector<16x32xf32>
    %c0_106 = arith.constant 0 : index
    %c0_107 = arith.constant 0 : index
    %c0_108 = arith.constant 0 : index
    %268 = vector.load %arg13[%c0_106, %c0_107, %c0_108] : memref<2x1x32xf32, #tpu.memory_space<vmem>>, vector<1x1x32xf32>
    %269 = vector.shape_cast %268 : vector<1x1x32xf32> to vector<1x32xf32>
    %270 = vector.broadcast %269 : vector<1x32xf32> to vector<16x32xf32>
    %271 = arith.addf %267, %270 : vector<16x32xf32>
    %272 = arith.addf %244, %271 : vector<16x32xf32>
    %c0_109 = arith.constant 0 : index
    %c0_110 = arith.constant 0 : index
    %c0_111 = arith.constant 0 : index
    %273 = vector.load %arg14[%c0_109, %c0_110, %c0_111] : memref<2x1x32xf32, #tpu.memory_space<vmem>>, vector<1x1x32xf32>
    %274 = vector.shape_cast %273 : vector<1x1x32xf32> to vector<1x32xf32>
    %c0_112 = arith.constant 0 : index
    %c0_113 = arith.constant 0 : index
    %c0_114 = arith.constant 0 : index
    %275 = vector.load %arg15[%c0_112, %c0_113, %c0_114] : memref<2x1x32xf32, #tpu.memory_space<vmem>>, vector<1x1x32xf32>
    %276 = vector.shape_cast %275 : vector<1x1x32xf32> to vector<1x32xf32>
    %cst_115 = arith.constant dense<0.000000e+00> : vector<16xf32>
    %277 = vector.multi_reduction <add>, %272, %cst_115 [1] : vector<16x32xf32> to vector<16xf32>
    %278 = vector.shape_cast %277 : vector<16xf32> to vector<16x1xf32>
    %cst_116 = arith.constant 3.200000e+01 : f32
    %279 = vector.broadcast %cst_116 : f32 to vector<16x1xf32>
    %280 = arith.divf %278, %279 : vector<16x1xf32>
    %281 = vector.broadcast %280 : vector<16x1xf32> to vector<16x32xf32>
    %282 = arith.subf %272, %281 : vector<16x32xf32>
    %283 = vector.broadcast %280 : vector<16x1xf32> to vector<16x32xf32>
    %284 = arith.subf %272, %283 : vector<16x32xf32>
    %285 = arith.mulf %282, %284 : vector<16x32xf32>
    %cst_117 = arith.constant dense<0.000000e+00> : vector<16xf32>
    %286 = vector.multi_reduction <add>, %285, %cst_117 [1] : vector<16x32xf32> to vector<16xf32>
    %287 = vector.shape_cast %286 : vector<16xf32> to vector<16x1xf32>
    %cst_118 = arith.constant 3.200000e+01 : f32
    %288 = vector.broadcast %cst_118 : f32 to vector<16x1xf32>
    %289 = arith.divf %287, %288 : vector<16x1xf32>
    %290 = vector.broadcast %280 : vector<16x1xf32> to vector<16x32xf32>
    %291 = arith.subf %272, %290 : vector<16x32xf32>
    %cst_119 = arith.constant 9.99999996E-13 : f32
    %292 = vector.broadcast %cst_119 : f32 to vector<16x1xf32>
    %293 = arith.addf %289, %292 : vector<16x1xf32>
    %294 = math.rsqrt %293 : vector<16x1xf32>
    %295 = vector.broadcast %294 : vector<16x1xf32> to vector<16x32xf32>
    %296 = arith.mulf %291, %295 : vector<16x32xf32>
    %297 = vector.broadcast %274 : vector<1x32xf32> to vector<16x32xf32>
    %298 = arith.mulf %296, %297 : vector<16x32xf32>
    %299 = vector.broadcast %276 : vector<1x32xf32> to vector<16x32xf32>
    %300 = arith.addf %298, %299 : vector<16x32xf32>
    %c1 = arith.constant 1 : index
    %c0_120 = arith.constant 0 : index
    %c0_121 = arith.constant 0 : index
    %301 = vector.load %arg4[%c1, %c0_120, %c0_121] : memref<2x32x96xf32, #tpu.memory_space<vmem>>, vector<1x32x96xf32>
    %302 = vector.shape_cast %301 : vector<1x32x96xf32> to vector<32x96xf32>
    %cst_122 = arith.constant dense<0.000000e+00> : vector<16x96xf32>
    %303 = tpu.matmul %300, %302, %cst_122 {dimension_numbers = #tpu.dot_dimension_numbers<[1], [0], [0], [1], [0, 0, 1, 1], [], []>} : vector<16x32xf32>, vector<32x96xf32>, vector<16x96xf32> -> vector<16x96xf32>
    %c1_123 = arith.constant 1 : index
    %c0_124 = arith.constant 0 : index
    %c0_125 = arith.constant 0 : index
    %304 = vector.load %arg5[%c1_123, %c0_124, %c0_125] : memref<2x1x96xf32, #tpu.memory_space<vmem>>, vector<1x1x96xf32>
    %305 = vector.shape_cast %304 : vector<1x1x96xf32> to vector<1x96xf32>
    %306 = vector.broadcast %305 : vector<1x96xf32> to vector<16x96xf32>
    %307 = arith.addf %303, %306 : vector<16x96xf32>
    %308 = vector.extract_strided_slice %307 {offsets = [0, 0], sizes = [16, 32], strides = [1, 1]} : vector<16x96xf32> to vector<16x32xf32>
    %309 = vector.extract_strided_slice %307 {offsets = [0, 32], sizes = [16, 32], strides = [1, 1]} : vector<16x96xf32> to vector<16x32xf32>
    %310 = vector.extract_strided_slice %307 {offsets = [0, 64], sizes = [16, 32], strides = [1, 1]} : vector<16x96xf32> to vector<16x32xf32>
    %311 = vector.extract_strided_slice %0 {offsets = [0, 0], sizes = [1, 8], strides = [1, 1]} : vector<2x8xf32> to vector<1x8xf32>
    %312 = vector.extract_strided_slice %308 {offsets = [0, 0], sizes = [8, 8], strides = [1, 1]} : vector<16x32xf32> to vector<8x8xf32>
    %313 = vector.extract_strided_slice %309 {offsets = [0, 0], sizes = [8, 8], strides = [1, 1]} : vector<16x32xf32> to vector<8x8xf32>
    %314 = vector.extract_strided_slice %310 {offsets = [0, 0], sizes = [8, 8], strides = [1, 1]} : vector<16x32xf32> to vector<8x8xf32>
    %315 = tpu.transpose %313, [1, 0] : vector<8x8xf32> -> vector<8x8xf32>
    %cst_126 = arith.constant dense<0.000000e+00> : vector<8x8xf32>
    %316 = tpu.matmul %312, %315, %cst_126 {dimension_numbers = #tpu.dot_dimension_numbers<[1], [0], [0], [1], [0, 0, 1, 1], [], []>} : vector<8x8xf32>, vector<8x8xf32>, vector<8x8xf32> -> vector<8x8xf32>
    %cst_127 = arith.constant 0.353553385 : f32
    %317 = vector.broadcast %cst_127 : f32 to vector<8x8xf32>
    %318 = arith.mulf %316, %317 : vector<8x8xf32>
    %319 = vector.broadcast %311 : vector<1x8xf32> to vector<8x8xf32>
    %320 = arith.addf %318, %319 : vector<8x8xf32>
    %cst_128 = arith.constant dense<0xFF800000> : vector<8xf32>
    %321 = vector.multi_reduction <maximumf>, %320, %cst_128 [1] : vector<8x8xf32> to vector<8xf32>
    %322 = vector.shape_cast %321 : vector<8xf32> to vector<8x1xf32>
    %323 = vector.broadcast %322 : vector<8x1xf32> to vector<8x8xf32>
    %324 = arith.subf %320, %323 : vector<8x8xf32>
    %325 = math.exp %324 : vector<8x8xf32>
    %cst_129 = arith.constant dense<0.000000e+00> : vector<8xf32>
    %326 = vector.multi_reduction <add>, %325, %cst_129 [1] : vector<8x8xf32> to vector<8xf32>
    %327 = vector.shape_cast %326 : vector<8xf32> to vector<8x1xf32>
    %328 = tpu.reciprocal %327 {approx = true} : vector<8x1xf32> -> vector<8x1xf32>
    %329 = vector.broadcast %328 : vector<8x1xf32> to vector<8x8xf32>
    %330 = arith.mulf %325, %329 : vector<8x8xf32>
    %cst_130 = arith.constant dense<0.000000e+00> : vector<8x8xf32>
    %331 = tpu.matmul %330, %314, %cst_130 {dimension_numbers = #tpu.dot_dimension_numbers<[1], [0], [0], [1], [0, 0, 1, 1], [], []>} : vector<8x8xf32>, vector<8x8xf32>, vector<8x8xf32> -> vector<8x8xf32>
    %c0_131 = arith.constant 0 : index
    %c0_132 = arith.constant 0 : index
    %332 = vector.load %arg17[%c0_131, %c0_132] : memref<16x32xf32, #tpu.memory_space<vmem>>, vector<8x8xf32>
    tpu.vector_store %arg17[%c0_131, %c0_132], %331 {strides = array<i32>} : memref<16x32xf32, #tpu.memory_space<vmem>>, vector<8x8xf32>,
    %333 = vector.extract_strided_slice %308 {offsets = [0, 8], sizes = [8, 8], strides = [1, 1]} : vector<16x32xf32> to vector<8x8xf32>
    %334 = vector.extract_strided_slice %309 {offsets = [0, 8], sizes = [8, 8], strides = [1, 1]} : vector<16x32xf32> to vector<8x8xf32>
    %335 = vector.extract_strided_slice %310 {offsets = [0, 8], sizes = [8, 8], strides = [1, 1]} : vector<16x32xf32> to vector<8x8xf32>
    %336 = tpu.transpose %334, [1, 0] : vector<8x8xf32> -> vector<8x8xf32>
    %cst_133 = arith.constant dense<0.000000e+00> : vector<8x8xf32>
    %337 = tpu.matmul %333, %336, %cst_133 {dimension_numbers = #tpu.dot_dimension_numbers<[1], [0], [0], [1], [0, 0, 1, 1], [], []>} : vector<8x8xf32>, vector<8x8xf32>, vector<8x8xf32> -> vector<8x8xf32>
    %cst_134 = arith.constant 0.353553385 : f32
    %338 = vector.broadcast %cst_134 : f32 to vector<8x8xf32>
    %339 = arith.mulf %337, %338 : vector<8x8xf32>
    %340 = vector.broadcast %311 : vector<1x8xf32> to vector<8x8xf32>
    %341 = arith.addf %339, %340 : vector<8x8xf32>
    %cst_135 = arith.constant dense<0xFF800000> : vector<8xf32>
    %342 = vector.multi_reduction <maximumf>, %341, %cst_135 [1] : vector<8x8xf32> to vector<8xf32>
    %343 = vector.shape_cast %342 : vector<8xf32> to vector<8x1xf32>
    %344 = vector.broadcast %343 : vector<8x1xf32> to vector<8x8xf32>
    %345 = arith.subf %341, %344 : vector<8x8xf32>
    %346 = math.exp %345 : vector<8x8xf32>
    %cst_136 = arith.constant dense<0.000000e+00> : vector<8xf32>
    %347 = vector.multi_reduction <add>, %346, %cst_136 [1] : vector<8x8xf32> to vector<8xf32>
    %348 = vector.shape_cast %347 : vector<8xf32> to vector<8x1xf32>
    %349 = tpu.reciprocal %348 {approx = true} : vector<8x1xf32> -> vector<8x1xf32>
    %350 = vector.broadcast %349 : vector<8x1xf32> to vector<8x8xf32>
    %351 = arith.mulf %346, %350 : vector<8x8xf32>
    %cst_137 = arith.constant dense<0.000000e+00> : vector<8x8xf32>
    %352 = tpu.matmul %351, %335, %cst_137 {dimension_numbers = #tpu.dot_dimension_numbers<[1], [0], [0], [1], [0, 0, 1, 1], [], []>} : vector<8x8xf32>, vector<8x8xf32>, vector<8x8xf32> -> vector<8x8xf32>
    %c0_138 = arith.constant 0 : index
    %c8_139 = arith.constant 8 : index
    %353 = vector.load %arg17[%c0_138, %c8_139] : memref<16x32xf32, #tpu.memory_space<vmem>>, vector<8x8xf32>
    tpu.vector_store %arg17[%c0_138, %c8_139], %352 {strides = array<i32>} : memref<16x32xf32, #tpu.memory_space<vmem>>, vector<8x8xf32>,
    %354 = vector.extract_strided_slice %308 {offsets = [0, 16], sizes = [8, 8], strides = [1, 1]} : vector<16x32xf32> to vector<8x8xf32>
    %355 = vector.extract_strided_slice %309 {offsets = [0, 16], sizes = [8, 8], strides = [1, 1]} : vector<16x32xf32> to vector<8x8xf32>
    %356 = vector.extract_strided_slice %310 {offsets = [0, 16], sizes = [8, 8], strides = [1, 1]} : vector<16x32xf32> to vector<8x8xf32>
    %357 = tpu.transpose %355, [1, 0] : vector<8x8xf32> -> vector<8x8xf32>
    %cst_140 = arith.constant dense<0.000000e+00> : vector<8x8xf32>
    %358 = tpu.matmul %354, %357, %cst_140 {dimension_numbers = #tpu.dot_dimension_numbers<[1], [0], [0], [1], [0, 0, 1, 1], [], []>} : vector<8x8xf32>, vector<8x8xf32>, vector<8x8xf32> -> vector<8x8xf32>
    %cst_141 = arith.constant 0.353553385 : f32
    %359 = vector.broadcast %cst_141 : f32 to vector<8x8xf32>
    %360 = arith.mulf %358, %359 : vector<8x8xf32>
    %361 = vector.broadcast %311 : vector<1x8xf32> to vector<8x8xf32>
    %362 = arith.addf %360, %361 : vector<8x8xf32>
    %cst_142 = arith.constant dense<0xFF800000> : vector<8xf32>
    %363 = vector.multi_reduction <maximumf>, %362, %cst_142 [1] : vector<8x8xf32> to vector<8xf32>
    %364 = vector.shape_cast %363 : vector<8xf32> to vector<8x1xf32>
    %365 = vector.broadcast %364 : vector<8x1xf32> to vector<8x8xf32>
    %366 = arith.subf %362, %365 : vector<8x8xf32>
    %367 = math.exp %366 : vector<8x8xf32>
    %cst_143 = arith.constant dense<0.000000e+00> : vector<8xf32>
    %368 = vector.multi_reduction <add>, %367, %cst_143 [1] : vector<8x8xf32> to vector<8xf32>
    %369 = vector.shape_cast %368 : vector<8xf32> to vector<8x1xf32>
    %370 = tpu.reciprocal %369 {approx = true} : vector<8x1xf32> -> vector<8x1xf32>
    %371 = vector.broadcast %370 : vector<8x1xf32> to vector<8x8xf32>
    %372 = arith.mulf %367, %371 : vector<8x8xf32>
    %cst_144 = arith.constant dense<0.000000e+00> : vector<8x8xf32>
    %373 = tpu.matmul %372, %356, %cst_144 {dimension_numbers = #tpu.dot_dimension_numbers<[1], [0], [0], [1], [0, 0, 1, 1], [], []>} : vector<8x8xf32>, vector<8x8xf32>, vector<8x8xf32> -> vector<8x8xf32>
    %c0_145 = arith.constant 0 : index
    %c16_146 = arith.constant 16 : index
    %374 = vector.load %arg17[%c0_145, %c16_146] : memref<16x32xf32, #tpu.memory_space<vmem>>, vector<8x8xf32>
    tpu.vector_store %arg17[%c0_145, %c16_146], %373 {strides = array<i32>} : memref<16x32xf32, #tpu.memory_space<vmem>>, vector<8x8xf32>,
    %375 = vector.extract_strided_slice %308 {offsets = [0, 24], sizes = [8, 8], strides = [1, 1]} : vector<16x32xf32> to vector<8x8xf32>
    %376 = vector.extract_strided_slice %309 {offsets = [0, 24], sizes = [8, 8], strides = [1, 1]} : vector<16x32xf32> to vector<8x8xf32>
    %377 = vector.extract_strided_slice %310 {offsets = [0, 24], sizes = [8, 8], strides = [1, 1]} : vector<16x32xf32> to vector<8x8xf32>
    %378 = tpu.transpose %376, [1, 0] : vector<8x8xf32> -> vector<8x8xf32>
    %cst_147 = arith.constant dense<0.000000e+00> : vector<8x8xf32>
    %379 = tpu.matmul %375, %378, %cst_147 {dimension_numbers = #tpu.dot_dimension_numbers<[1], [0], [0], [1], [0, 0, 1, 1], [], []>} : vector<8x8xf32>, vector<8x8xf32>, vector<8x8xf32> -> vector<8x8xf32>
    %cst_148 = arith.constant 0.353553385 : f32
    %380 = vector.broadcast %cst_148 : f32 to vector<8x8xf32>
    %381 = arith.mulf %379, %380 : vector<8x8xf32>
    %382 = vector.broadcast %311 : vector<1x8xf32> to vector<8x8xf32>
    %383 = arith.addf %381, %382 : vector<8x8xf32>
    %cst_149 = arith.constant dense<0xFF800000> : vector<8xf32>
    %384 = vector.multi_reduction <maximumf>, %383, %cst_149 [1] : vector<8x8xf32> to vector<8xf32>
    %385 = vector.shape_cast %384 : vector<8xf32> to vector<8x1xf32>
    %386 = vector.broadcast %385 : vector<8x1xf32> to vector<8x8xf32>
    %387 = arith.subf %383, %386 : vector<8x8xf32>
    %388 = math.exp %387 : vector<8x8xf32>
    %cst_150 = arith.constant dense<0.000000e+00> : vector<8xf32>
    %389 = vector.multi_reduction <add>, %388, %cst_150 [1] : vector<8x8xf32> to vector<8xf32>
    %390 = vector.shape_cast %389 : vector<8xf32> to vector<8x1xf32>
    %391 = tpu.reciprocal %390 {approx = true} : vector<8x1xf32> -> vector<8x1xf32>
    %392 = vector.broadcast %391 : vector<8x1xf32> to vector<8x8xf32>
    %393 = arith.mulf %388, %392 : vector<8x8xf32>
    %cst_151 = arith.constant dense<0.000000e+00> : vector<8x8xf32>
    %394 = tpu.matmul %393, %377, %cst_151 {dimension_numbers = #tpu.dot_dimension_numbers<[1], [0], [0], [1], [0, 0, 1, 1], [], []>} : vector<8x8xf32>, vector<8x8xf32>, vector<8x8xf32> -> vector<8x8xf32>
    %c0_152 = arith.constant 0 : index
    %c24_153 = arith.constant 24 : index
    %395 = vector.load %arg17[%c0_152, %c24_153] : memref<16x32xf32, #tpu.memory_space<vmem>>, vector<8x8xf32>
    tpu.vector_store %arg17[%c0_152, %c24_153], %394 {strides = array<i32>} : memref<16x32xf32, #tpu.memory_space<vmem>>, vector<8x8xf32>,
    %396 = vector.extract_strided_slice %0 {offsets = [1, 0], sizes = [1, 8], strides = [1, 1]} : vector<2x8xf32> to vector<1x8xf32>
    %397 = vector.extract_strided_slice %308 {offsets = [8, 0], sizes = [8, 8], strides = [1, 1]} : vector<16x32xf32> to vector<8x8xf32>
    %398 = vector.extract_strided_slice %309 {offsets = [8, 0], sizes = [8, 8], strides = [1, 1]} : vector<16x32xf32> to vector<8x8xf32>
    %399 = vector.extract_strided_slice %310 {offsets = [8, 0], sizes = [8, 8], strides = [1, 1]} : vector<16x32xf32> to vector<8x8xf32>
    %400 = tpu.transpose %398, [1, 0] : vector<8x8xf32> -> vector<8x8xf32>
    %cst_154 = arith.constant dense<0.000000e+00> : vector<8x8xf32>
    %401 = tpu.matmul %397, %400, %cst_154 {dimension_numbers = #tpu.dot_dimension_numbers<[1], [0], [0], [1], [0, 0, 1, 1], [], []>} : vector<8x8xf32>, vector<8x8xf32>, vector<8x8xf32> -> vector<8x8xf32>
    %cst_155 = arith.constant 0.353553385 : f32
    %402 = vector.broadcast %cst_155 : f32 to vector<8x8xf32>
    %403 = arith.mulf %401, %402 : vector<8x8xf32>
    %404 = vector.broadcast %396 : vector<1x8xf32> to vector<8x8xf32>
    %405 = arith.addf %403, %404 : vector<8x8xf32>
    %cst_156 = arith.constant dense<0xFF800000> : vector<8xf32>
    %406 = vector.multi_reduction <maximumf>, %405, %cst_156 [1] : vector<8x8xf32> to vector<8xf32>
    %407 = vector.shape_cast %406 : vector<8xf32> to vector<8x1xf32>
    %408 = vector.broadcast %407 : vector<8x1xf32> to vector<8x8xf32>
    %409 = arith.subf %405, %408 : vector<8x8xf32>
    %410 = math.exp %409 : vector<8x8xf32>
    %cst_157 = arith.constant dense<0.000000e+00> : vector<8xf32>
    %411 = vector.multi_reduction <add>, %410, %cst_157 [1] : vector<8x8xf32> to vector<8xf32>
    %412 = vector.shape_cast %411 : vector<8xf32> to vector<8x1xf32>
    %413 = tpu.reciprocal %412 {approx = true} : vector<8x1xf32> -> vector<8x1xf32>
    %414 = vector.broadcast %413 : vector<8x1xf32> to vector<8x8xf32>
    %415 = arith.mulf %410, %414 : vector<8x8xf32>
    %cst_158 = arith.constant dense<0.000000e+00> : vector<8x8xf32>
    %416 = tpu.matmul %415, %399, %cst_158 {dimension_numbers = #tpu.dot_dimension_numbers<[1], [0], [0], [1], [0, 0, 1, 1], [], []>} : vector<8x8xf32>, vector<8x8xf32>, vector<8x8xf32> -> vector<8x8xf32>
    %c8_159 = arith.constant 8 : index
    %c0_160 = arith.constant 0 : index
    %417 = vector.load %arg17[%c8_159, %c0_160] : memref<16x32xf32, #tpu.memory_space<vmem>>, vector<8x8xf32>
    tpu.vector_store %arg17[%c8_159, %c0_160], %416 {strides = array<i32>} : memref<16x32xf32, #tpu.memory_space<vmem>>, vector<8x8xf32>,
    %418 = vector.extract_strided_slice %308 {offsets = [8, 8], sizes = [8, 8], strides = [1, 1]} : vector<16x32xf32> to vector<8x8xf32>
    %419 = vector.extract_strided_slice %309 {offsets = [8, 8], sizes = [8, 8], strides = [1, 1]} : vector<16x32xf32> to vector<8x8xf32>
    %420 = vector.extract_strided_slice %310 {offsets = [8, 8], sizes = [8, 8], strides = [1, 1]} : vector<16x32xf32> to vector<8x8xf32>
    %421 = tpu.transpose %419, [1, 0] : vector<8x8xf32> -> vector<8x8xf32>
    %cst_161 = arith.constant dense<0.000000e+00> : vector<8x8xf32>
    %422 = tpu.matmul %418, %421, %cst_161 {dimension_numbers = #tpu.dot_dimension_numbers<[1], [0], [0], [1], [0, 0, 1, 1], [], []>} : vector<8x8xf32>, vector<8x8xf32>, vector<8x8xf32> -> vector<8x8xf32>
    %cst_162 = arith.constant 0.353553385 : f32
    %423 = vector.broadcast %cst_162 : f32 to vector<8x8xf32>
    %424 = arith.mulf %422, %423 : vector<8x8xf32>
    %425 = vector.broadcast %396 : vector<1x8xf32> to vector<8x8xf32>
    %426 = arith.addf %424, %425 : vector<8x8xf32>
    %cst_163 = arith.constant dense<0xFF800000> : vector<8xf32>
    %427 = vector.multi_reduction <maximumf>, %426, %cst_163 [1] : vector<8x8xf32> to vector<8xf32>
    %428 = vector.shape_cast %427 : vector<8xf32> to vector<8x1xf32>
    %429 = vector.broadcast %428 : vector<8x1xf32> to vector<8x8xf32>
    %430 = arith.subf %426, %429 : vector<8x8xf32>
    %431 = math.exp %430 : vector<8x8xf32>
    %cst_164 = arith.constant dense<0.000000e+00> : vector<8xf32>
    %432 = vector.multi_reduction <add>, %431, %cst_164 [1] : vector<8x8xf32> to vector<8xf32>
    %433 = vector.shape_cast %432 : vector<8xf32> to vector<8x1xf32>
    %434 = tpu.reciprocal %433 {approx = true} : vector<8x1xf32> -> vector<8x1xf32>
    %435 = vector.broadcast %434 : vector<8x1xf32> to vector<8x8xf32>
    %436 = arith.mulf %431, %435 : vector<8x8xf32>
    %cst_165 = arith.constant dense<0.000000e+00> : vector<8x8xf32>
    %437 = tpu.matmul %436, %420, %cst_165 {dimension_numbers = #tpu.dot_dimension_numbers<[1], [0], [0], [1], [0, 0, 1, 1], [], []>} : vector<8x8xf32>, vector<8x8xf32>, vector<8x8xf32> -> vector<8x8xf32>
    %c8_166 = arith.constant 8 : index
    %c8_167 = arith.constant 8 : index
    %438 = vector.load %arg17[%c8_166, %c8_167] : memref<16x32xf32, #tpu.memory_space<vmem>>, vector<8x8xf32>
    tpu.vector_store %arg17[%c8_166, %c8_167], %437 {strides = array<i32>} : memref<16x32xf32, #tpu.memory_space<vmem>>, vector<8x8xf32>,
    %439 = vector.extract_strided_slice %308 {offsets = [8, 16], sizes = [8, 8], strides = [1, 1]} : vector<16x32xf32> to vector<8x8xf32>
    %440 = vector.extract_strided_slice %309 {offsets = [8, 16], sizes = [8, 8], strides = [1, 1]} : vector<16x32xf32> to vector<8x8xf32>
    %441 = vector.extract_strided_slice %310 {offsets = [8, 16], sizes = [8, 8], strides = [1, 1]} : vector<16x32xf32> to vector<8x8xf32>
    %442 = tpu.transpose %440, [1, 0] : vector<8x8xf32> -> vector<8x8xf32>
    %cst_168 = arith.constant dense<0.000000e+00> : vector<8x8xf32>
    %443 = tpu.matmul %439, %442, %cst_168 {dimension_numbers = #tpu.dot_dimension_numbers<[1], [0], [0], [1], [0, 0, 1, 1], [], []>} : vector<8x8xf32>, vector<8x8xf32>, vector<8x8xf32> -> vector<8x8xf32>
    %cst_169 = arith.constant 0.353553385 : f32
    %444 = vector.broadcast %cst_169 : f32 to vector<8x8xf32>
    %445 = arith.mulf %443, %444 : vector<8x8xf32>
    %446 = vector.broadcast %396 : vector<1x8xf32> to vector<8x8xf32>
    %447 = arith.addf %445, %446 : vector<8x8xf32>
    %cst_170 = arith.constant dense<0xFF800000> : vector<8xf32>
    %448 = vector.multi_reduction <maximumf>, %447, %cst_170 [1] : vector<8x8xf32> to vector<8xf32>
    %449 = vector.shape_cast %448 : vector<8xf32> to vector<8x1xf32>
    %450 = vector.broadcast %449 : vector<8x1xf32> to vector<8x8xf32>
    %451 = arith.subf %447, %450 : vector<8x8xf32>
    %452 = math.exp %451 : vector<8x8xf32>
    %cst_171 = arith.constant dense<0.000000e+00> : vector<8xf32>
    %453 = vector.multi_reduction <add>, %452, %cst_171 [1] : vector<8x8xf32> to vector<8xf32>
    %454 = vector.shape_cast %453 : vector<8xf32> to vector<8x1xf32>
    %455 = tpu.reciprocal %454 {approx = true} : vector<8x1xf32> -> vector<8x1xf32>
    %456 = vector.broadcast %455 : vector<8x1xf32> to vector<8x8xf32>
    %457 = arith.mulf %452, %456 : vector<8x8xf32>
    %cst_172 = arith.constant dense<0.000000e+00> : vector<8x8xf32>
    %458 = tpu.matmul %457, %441, %cst_172 {dimension_numbers = #tpu.dot_dimension_numbers<[1], [0], [0], [1], [0, 0, 1, 1], [], []>} : vector<8x8xf32>, vector<8x8xf32>, vector<8x8xf32> -> vector<8x8xf32>
    %c8_173 = arith.constant 8 : index
    %c16_174 = arith.constant 16 : index
    %459 = vector.load %arg17[%c8_173, %c16_174] : memref<16x32xf32, #tpu.memory_space<vmem>>, vector<8x8xf32>
    tpu.vector_store %arg17[%c8_173, %c16_174], %458 {strides = array<i32>} : memref<16x32xf32, #tpu.memory_space<vmem>>, vector<8x8xf32>,
    %460 = vector.extract_strided_slice %308 {offsets = [8, 24], sizes = [8, 8], strides = [1, 1]} : vector<16x32xf32> to vector<8x8xf32>
    %461 = vector.extract_strided_slice %309 {offsets = [8, 24], sizes = [8, 8], strides = [1, 1]} : vector<16x32xf32> to vector<8x8xf32>
    %462 = vector.extract_strided_slice %310 {offsets = [8, 24], sizes = [8, 8], strides = [1, 1]} : vector<16x32xf32> to vector<8x8xf32>
    %463 = tpu.transpose %461, [1, 0] : vector<8x8xf32> -> vector<8x8xf32>
    %cst_175 = arith.constant dense<0.000000e+00> : vector<8x8xf32>
    %464 = tpu.matmul %460, %463, %cst_175 {dimension_numbers = #tpu.dot_dimension_numbers<[1], [0], [0], [1], [0, 0, 1, 1], [], []>} : vector<8x8xf32>, vector<8x8xf32>, vector<8x8xf32> -> vector<8x8xf32>
    %cst_176 = arith.constant 0.353553385 : f32
    %465 = vector.broadcast %cst_176 : f32 to vector<8x8xf32>
    %466 = arith.mulf %464, %465 : vector<8x8xf32>
    %467 = vector.broadcast %396 : vector<1x8xf32> to vector<8x8xf32>
    %468 = arith.addf %466, %467 : vector<8x8xf32>
    %cst_177 = arith.constant dense<0xFF800000> : vector<8xf32>
    %469 = vector.multi_reduction <maximumf>, %468, %cst_177 [1] : vector<8x8xf32> to vector<8xf32>
    %470 = vector.shape_cast %469 : vector<8xf32> to vector<8x1xf32>
    %471 = vector.broadcast %470 : vector<8x1xf32> to vector<8x8xf32>
    %472 = arith.subf %468, %471 : vector<8x8xf32>
    %473 = math.exp %472 : vector<8x8xf32>
    %cst_178 = arith.constant dense<0.000000e+00> : vector<8xf32>
    %474 = vector.multi_reduction <add>, %473, %cst_178 [1] : vector<8x8xf32> to vector<8xf32>
    %475 = vector.shape_cast %474 : vector<8xf32> to vector<8x1xf32>
    %476 = tpu.reciprocal %475 {approx = true} : vector<8x1xf32> -> vector<8x1xf32>
    %477 = vector.broadcast %476 : vector<8x1xf32> to vector<8x8xf32>
    %478 = arith.mulf %473, %477 : vector<8x8xf32>
    %cst_179 = arith.constant dense<0.000000e+00> : vector<8x8xf32>
    %479 = tpu.matmul %478, %462, %cst_179 {dimension_numbers = #tpu.dot_dimension_numbers<[1], [0], [0], [1], [0, 0, 1, 1], [], []>} : vector<8x8xf32>, vector<8x8xf32>, vector<8x8xf32> -> vector<8x8xf32>
    %c8_180 = arith.constant 8 : index
    %c24_181 = arith.constant 24 : index
    %480 = vector.load %arg17[%c8_180, %c24_181] : memref<16x32xf32, #tpu.memory_space<vmem>>, vector<8x8xf32>
    tpu.vector_store %arg17[%c8_180, %c24_181], %479 {strides = array<i32>} : memref<16x32xf32, #tpu.memory_space<vmem>>, vector<8x8xf32>,
    %c0_182 = arith.constant 0 : index
    %c0_183 = arith.constant 0 : index
    %481 = vector.load %arg17[%c0_182, %c0_183] : memref<16x32xf32, #tpu.memory_space<vmem>>, vector<16x32xf32>
    %c1_184 = arith.constant 1 : index
    %c0_185 = arith.constant 0 : index
    %c0_186 = arith.constant 0 : index
    %482 = vector.load %arg6[%c1_184, %c0_185, %c0_186] : memref<2x32x32xf32, #tpu.memory_space<vmem>>, vector<1x32x32xf32>
    %483 = vector.shape_cast %482 : vector<1x32x32xf32> to vector<32x32xf32>
    %cst_187 = arith.constant dense<0.000000e+00> : vector<16x32xf32>
    %484 = tpu.matmul %481, %483, %cst_187 {dimension_numbers = #tpu.dot_dimension_numbers<[1], [0], [0], [1], [0, 0, 1, 1], [], []>} : vector<16x32xf32>, vector<32x32xf32>, vector<16x32xf32> -> vector<16x32xf32>
    %c1_188 = arith.constant 1 : index
    %c0_189 = arith.constant 0 : index
    %c0_190 = arith.constant 0 : index
    %485 = vector.load %arg7[%c1_188, %c0_189, %c0_190] : memref<2x1x32xf32, #tpu.memory_space<vmem>>, vector<1x1x32xf32>
    %486 = vector.shape_cast %485 : vector<1x1x32xf32> to vector<1x32xf32>
    %487 = vector.broadcast %486 : vector<1x32xf32> to vector<16x32xf32>
    %488 = arith.addf %484, %487 : vector<16x32xf32>
    %489 = arith.addf %300, %488 : vector<16x32xf32>
    %c1_191 = arith.constant 1 : index
    %c0_192 = arith.constant 0 : index
    %c0_193 = arith.constant 0 : index
    %490 = vector.load %arg8[%c1_191, %c0_192, %c0_193] : memref<2x1x32xf32, #tpu.memory_space<vmem>>, vector<1x1x32xf32>
    %491 = vector.shape_cast %490 : vector<1x1x32xf32> to vector<1x32xf32>
    %c1_194 = arith.constant 1 : index
    %c0_195 = arith.constant 0 : index
    %c0_196 = arith.constant 0 : index
    %492 = vector.load %arg9[%c1_194, %c0_195, %c0_196] : memref<2x1x32xf32, #tpu.memory_space<vmem>>, vector<1x1x32xf32>
    %493 = vector.shape_cast %492 : vector<1x1x32xf32> to vector<1x32xf32>
    %cst_197 = arith.constant dense<0.000000e+00> : vector<16xf32>
    %494 = vector.multi_reduction <add>, %489, %cst_197 [1] : vector<16x32xf32> to vector<16xf32>
    %495 = vector.shape_cast %494 : vector<16xf32> to vector<16x1xf32>
    %cst_198 = arith.constant 3.200000e+01 : f32
    %496 = vector.broadcast %cst_198 : f32 to vector<16x1xf32>
    %497 = arith.divf %495, %496 : vector<16x1xf32>
    %498 = vector.broadcast %497 : vector<16x1xf32> to vector<16x32xf32>
    %499 = arith.subf %489, %498 : vector<16x32xf32>
    %500 = vector.broadcast %497 : vector<16x1xf32> to vector<16x32xf32>
    %501 = arith.subf %489, %500 : vector<16x32xf32>
    %502 = arith.mulf %499, %501 : vector<16x32xf32>
    %cst_199 = arith.constant dense<0.000000e+00> : vector<16xf32>
    %503 = vector.multi_reduction <add>, %502, %cst_199 [1] : vector<16x32xf32> to vector<16xf32>
    %504 = vector.shape_cast %503 : vector<16xf32> to vector<16x1xf32>
    %cst_200 = arith.constant 3.200000e+01 : f32
    %505 = vector.broadcast %cst_200 : f32 to vector<16x1xf32>
    %506 = arith.divf %504, %505 : vector<16x1xf32>
    %507 = vector.broadcast %497 : vector<16x1xf32> to vector<16x32xf32>
    %508 = arith.subf %489, %507 : vector<16x32xf32>
    %cst_201 = arith.constant 9.99999996E-13 : f32
    %509 = vector.broadcast %cst_201 : f32 to vector<16x1xf32>
    %510 = arith.addf %506, %509 : vector<16x1xf32>
    %511 = math.rsqrt %510 : vector<16x1xf32>
    %512 = vector.broadcast %511 : vector<16x1xf32> to vector<16x32xf32>
    %513 = arith.mulf %508, %512 : vector<16x32xf32>
    %514 = vector.broadcast %491 : vector<1x32xf32> to vector<16x32xf32>
    %515 = arith.mulf %513, %514 : vector<16x32xf32>
    %516 = vector.broadcast %493 : vector<1x32xf32> to vector<16x32xf32>
    %517 = arith.addf %515, %516 : vector<16x32xf32>
    %c1_202 = arith.constant 1 : index
    %c0_203 = arith.constant 0 : index
    %c0_204 = arith.constant 0 : index
    %518 = vector.load %arg10[%c1_202, %c0_203, %c0_204] : memref<2x32x64xf32, #tpu.memory_space<vmem>>, vector<1x32x64xf32>
    %519 = vector.shape_cast %518 : vector<1x32x64xf32> to vector<32x64xf32>
    %cst_205 = arith.constant dense<0.000000e+00> : vector<16x64xf32>
    %520 = tpu.matmul %517, %519, %cst_205 {dimension_numbers = #tpu.dot_dimension_numbers<[1], [0], [0], [1], [0, 0, 1, 1], [], []>} : vector<16x32xf32>, vector<32x64xf32>, vector<16x64xf32> -> vector<16x64xf32>
    %c1_206 = arith.constant 1 : index
    %c0_207 = arith.constant 0 : index
    %c0_208 = arith.constant 0 : index
    %521 = vector.load %arg11[%c1_206, %c0_207, %c0_208] : memref<2x1x64xf32, #tpu.memory_space<vmem>>, vector<1x1x64xf32>
    %522 = vector.shape_cast %521 : vector<1x1x64xf32> to vector<1x64xf32>
    %523 = vector.broadcast %522 : vector<1x64xf32> to vector<16x64xf32>
    %524 = arith.addf %520, %523 : vector<16x64xf32>
    %cst_209 = arith.constant 5.000000e-01 : f32
    %525 = vector.broadcast %cst_209 : f32 to vector<16x64xf32>
    %526 = arith.mulf %525, %524 : vector<16x64xf32>
    %cst_210 = arith.constant 4.471500e-02 : f32
    %527 = vector.broadcast %cst_210 : f32 to vector<16x64xf32>
    %528 = arith.mulf %527, %524 : vector<16x64xf32>
    %529 = arith.mulf %528, %524 : vector<16x64xf32>
    %530 = arith.mulf %529, %524 : vector<16x64xf32>
    %531 = arith.addf %524, %530 : vector<16x64xf32>
    %cst_211 = arith.constant 0.797884583 : f32
    %532 = vector.broadcast %cst_211 : f32 to vector<16x64xf32>
    %533 = arith.mulf %532, %531 : vector<16x64xf32>
    %534 = math.tanh %533 : vector<16x64xf32>
    %cst_212 = arith.constant 1.000000e+00 : f32
    %535 = vector.broadcast %cst_212 : f32 to vector<16x64xf32>
    %536 = arith.addf %535, %534 : vector<16x64xf32>
    %537 = arith.mulf %526, %536 : vector<16x64xf32>
    %c1_213 = arith.constant 1 : index
    %c0_214 = arith.constant 0 : index
    %c0_215 = arith.constant 0 : index
    %538 = vector.load %arg12[%c1_213, %c0_214, %c0_215] : memref<2x64x32xf32, #tpu.memory_space<vmem>>, vector<1x64x32xf32>
    %539 = vector.shape_cast %538 : vector<1x64x32xf32> to vector<64x32xf32>
    %cst_216 = arith.constant dense<0.000000e+00> : vector<16x32xf32>
    %540 = tpu.matmul %537, %539, %cst_216 {dimension_numbers = #tpu.dot_dimension_numbers<[1], [0], [0], [1], [0, 0, 1, 1], [], []>} : vector<16x64xf32>, vector<64x32xf32>, vector<16x32xf32> -> vector<16x32xf32>
    %c1_217 = arith.constant 1 : index
    %c0_218 = arith.constant 0 : index
    %c0_219 = arith.constant 0 : index
    %541 = vector.load %arg13[%c1_217, %c0_218, %c0_219] : memref<2x1x32xf32, #tpu.memory_space<vmem>>, vector<1x1x32xf32>
    %542 = vector.shape_cast %541 : vector<1x1x32xf32> to vector<1x32xf32>
    %543 = vector.broadcast %542 : vector<1x32xf32> to vector<16x32xf32>
    %544 = arith.addf %540, %543 : vector<16x32xf32>
    %545 = arith.addf %517, %544 : vector<16x32xf32>
    %c1_220 = arith.constant 1 : index
    %c0_221 = arith.constant 0 : index
    %c0_222 = arith.constant 0 : index
    %546 = vector.load %arg14[%c1_220, %c0_221, %c0_222] : memref<2x1x32xf32, #tpu.memory_space<vmem>>, vector<1x1x32xf32>
    %547 = vector.shape_cast %546 : vector<1x1x32xf32> to vector<1x32xf32>
    %c1_223 = arith.constant 1 : index
    %c0_224 = arith.constant 0 : index
    %c0_225 = arith.constant 0 : index
    %548 = vector.load %arg15[%c1_223, %c0_224, %c0_225] : memref<2x1x32xf32, #tpu.memory_space<vmem>>, vector<1x1x32xf32>
    %549 = vector.shape_cast %548 : vector<1x1x32xf32> to vector<1x32xf32>
    %cst_226 = arith.constant dense<0.000000e+00> : vector<16xf32>
    %550 = vector.multi_reduction <add>, %545, %cst_226 [1] : vector<16x32xf32> to vector<16xf32>
    %551 = vector.shape_cast %550 : vector<16xf32> to vector<16x1xf32>
    %cst_227 = arith.constant 3.200000e+01 : f32
    %552 = vector.broadcast %cst_227 : f32 to vector<16x1xf32>
    %553 = arith.divf %551, %552 : vector<16x1xf32>
    %554 = vector.broadcast %553 : vector<16x1xf32> to vector<16x32xf32>
    %555 = arith.subf %545, %554 : vector<16x32xf32>
    %556 = vector.broadcast %553 : vector<16x1xf32> to vector<16x32xf32>
    %557 = arith.subf %545, %556 : vector<16x32xf32>
    %558 = arith.mulf %555, %557 : vector<16x32xf32>
    %cst_228 = arith.constant dense<0.000000e+00> : vector<16xf32>
    %559 = vector.multi_reduction <add>, %558, %cst_228 [1] : vector<16x32xf32> to vector<16xf32>
    %560 = vector.shape_cast %559 : vector<16xf32> to vector<16x1xf32>
    %cst_229 = arith.constant 3.200000e+01 : f32
    %561 = vector.broadcast %cst_229 : f32 to vector<16x1xf32>
    %562 = arith.divf %560, %561 : vector<16x1xf32>
    %563 = vector.broadcast %553 : vector<16x1xf32> to vector<16x32xf32>
    %564 = arith.subf %545, %563 : vector<16x32xf32>
    %cst_230 = arith.constant 9.99999996E-13 : f32
    %565 = vector.broadcast %cst_230 : f32 to vector<16x1xf32>
    %566 = arith.addf %562, %565 : vector<16x1xf32>
    %567 = math.rsqrt %566 : vector<16x1xf32>
    %568 = vector.broadcast %567 : vector<16x1xf32> to vector<16x32xf32>
    %569 = arith.mulf %564, %568 : vector<16x32xf32>
    %570 = vector.broadcast %547 : vector<1x32xf32> to vector<16x32xf32>
    %571 = arith.mulf %569, %570 : vector<16x32xf32>
    %572 = vector.broadcast %549 : vector<1x32xf32> to vector<16x32xf32>
    %573 = arith.addf %571, %572 : vector<16x32xf32>
    %c0_231 = arith.constant 0 : index
    %c0_232 = arith.constant 0 : index
    %574 = vector.load %arg16[%c0_231, %c0_232] : memref<16x32xf32, #tpu.memory_space<vmem>>, vector<16x32xf32>
    tpu.vector_store %arg16[%c0_231, %c0_232], %573 {strides = array<i32>} : memref<16x32xf32, #tpu.memory_space<vmem>>, vector<16x32xf32>,
    return
  }
}

module attributes {stable_mosaic.version = 11 : i64} {
  func.func @_bilstm_layer_kernel(%arg0: i32, %arg1: memref<8x2x32xf32, #tpu.memory_space<vmem>>, %arg2: memref<1x4x32x32xf32, #tpu.memory_space<vmem>>, %arg3: memref<1x4x32x32xf32, #tpu.memory_space<vmem>>, %arg4: memref<1x4x1x32xf32, #tpu.memory_space<vmem>>, %arg5: memref<1x8x2x32xf32, #tpu.memory_space<vmem>>, %arg6: memref<1x2x32xf32, #tpu.memory_space<vmem>>, %arg7: memref<8x2x32xf32, #tpu.memory_space<vmem>>, %arg8: memref<8x2x32xf32, #tpu.memory_space<vmem>>, %arg9: memref<8x2x32xf32, #tpu.memory_space<vmem>>, %arg10: memref<8x2x32xf32, #tpu.memory_space<vmem>>, %arg11: memref<2x32xf32, #tpu.memory_space<vmem>>, %arg12: memref<2x32xf32, #tpu.memory_space<vmem>>) attributes {dimension_semantics = [#tpu.dimension_semantics<parallel>], iteration_bounds = array<i64: 2>, scalar_prefetch = 0 : i64, scratch_operands = 6 : i64, tpu.core_type = #tpu.core_type<tc>, window_params = [{pipeline_mode = #tpu.pipeline_mode<synchronous>, transform_indices = @transform_0, window_bounds = array<i64: 8, 2, 32>}, {transform_indices = @transform_1, window_bounds = array<i64: 1, 4, 32, 32>}, {transform_indices = @transform_2, window_bounds = array<i64: 1, 4, 32, 32>}, {transform_indices = @transform_3, window_bounds = array<i64: 1, 4, 1, 32>}, {transform_indices = @transform_4, window_bounds = array<i64: 1, 8, 2, 32>}, {transform_indices = @transform_5, window_bounds = array<i64: 1, 2, 32>}]} {
    %c0 = arith.constant 0 : index
    %c0_0 = arith.constant 0 : index
    %c0_1 = arith.constant 0 : index
    %0 = vector.load %arg1[%c0, %c0_0, %c0_1] : memref<8x2x32xf32, #tpu.memory_space<vmem>>, vector<8x2x32xf32>
    %1 = vector.shape_cast %0 : vector<8x2x32xf32> to vector<16x32xf32>
    %c0_2 = arith.constant 0 : index
    %c0_3 = arith.constant 0 : index
    %c0_4 = arith.constant 0 : index
    %c0_5 = arith.constant 0 : index
    %2 = vector.load %arg2[%c0_2, %c0_3, %c0_4, %c0_5] : memref<1x4x32x32xf32, #tpu.memory_space<vmem>>, vector<1x1x32x32xf32>
    %3 = vector.shape_cast %2 : vector<1x1x32x32xf32> to vector<32x32xf32>
    %cst = arith.constant dense<0.000000e+00> : vector<16x32xf32>
    %4 = tpu.matmul %1, %3, %cst {dimension_numbers = #tpu.dot_dimension_numbers<[1], [0], [0], [1], [0, 0, 1, 1], [], []>} : vector<16x32xf32>, vector<32x32xf32>, vector<16x32xf32> -> vector<16x32xf32>
    %c0_6 = arith.constant 0 : index
    %c0_7 = arith.constant 0 : index
    %c0_8 = arith.constant 0 : index
    %c0_9 = arith.constant 0 : index
    %5 = vector.load %arg4[%c0_6, %c0_7, %c0_8, %c0_9] : memref<1x4x1x32xf32, #tpu.memory_space<vmem>>, vector<1x1x1x32xf32>
    %6 = vector.shape_cast %5 : vector<1x1x1x32xf32> to vector<1x32xf32>
    %7 = vector.broadcast %6 : vector<1x32xf32> to vector<16x32xf32>
    %8 = arith.addf %4, %7 : vector<16x32xf32>
    %9 = vector.shape_cast %8 : vector<16x32xf32> to vector<8x2x32xf32>
    %c0_10 = arith.constant 0 : index
    %c0_11 = arith.constant 0 : index
    %c0_12 = arith.constant 0 : index
    %10 = vector.load %arg7[%c0_10, %c0_11, %c0_12] : memref<8x2x32xf32, #tpu.memory_space<vmem>>, vector<8x2x32xf32>
    tpu.vector_store %arg7[%c0_10, %c0_11, %c0_12], %9 {strides = array<i32>} : memref<8x2x32xf32, #tpu.memory_space<vmem>>, vector<8x2x32xf32>,
    %c0_13 = arith.constant 0 : index
    %c1 = arith.constant 1 : index
    %c0_14 = arith.constant 0 : index
    %c0_15 = arith.constant 0 : index
    %11 = vector.load %arg2[%c0_13, %c1, %c0_14, %c0_15] : memref<1x4x32x32xf32, #tpu.memory_space<vmem>>, vector<1x1x32x32xf32>
    %12 = vector.shape_cast %11 : vector<1x1x32x32xf32> to vector<32x32xf32>
    %cst_16 = arith.constant dense<0.000000e+00> : vector<16x32xf32>
    %13 = tpu.matmul %1, %12, %cst_16 {dimension_numbers = #tpu.dot_dimension_numbers<[1], [0], [0], [1], [0, 0, 1, 1], [], []>} : vector<16x32xf32>, vector<32x32xf32>, vector<16x32xf32> -> vector<16x32xf32>
    %c0_17 = arith.constant 0 : index
    %c1_18 = arith.constant 1 : index
    %c0_19 = arith.constant 0 : index
    %c0_20 = arith.constant 0 : index
    %14 = vector.load %arg4[%c0_17, %c1_18, %c0_19, %c0_20] : memref<1x4x1x32xf32, #tpu.memory_space<vmem>>, vector<1x1x1x32xf32>
    %15 = vector.shape_cast %14 : vector<1x1x1x32xf32> to vector<1x32xf32>
    %16 = vector.broadcast %15 : vector<1x32xf32> to vector<16x32xf32>
    %17 = arith.addf %13, %16 : vector<16x32xf32>
    %18 = vector.shape_cast %17 : vector<16x32xf32> to vector<8x2x32xf32>
    %c0_21 = arith.constant 0 : index
    %c0_22 = arith.constant 0 : index
    %c0_23 = arith.constant 0 : index
    %19 = vector.load %arg8[%c0_21, %c0_22, %c0_23] : memref<8x2x32xf32, #tpu.memory_space<vmem>>, vector<8x2x32xf32>
    tpu.vector_store %arg8[%c0_21, %c0_22, %c0_23], %18 {strides = array<i32>} : memref<8x2x32xf32, #tpu.memory_space<vmem>>, vector<8x2x32xf32>,
    %c0_24 = arith.constant 0 : index
    %c2 = arith.constant 2 : index
    %c0_25 = arith.constant 0 : index
    %c0_26 = arith.constant 0 : index
    %20 = vector.load %arg2[%c0_24, %c2, %c0_25, %c0_26] : memref<1x4x32x32xf32, #tpu.memory_space<vmem>>, vector<1x1x32x32xf32>
    %21 = vector.shape_cast %20 : vector<1x1x32x32xf32> to vector<32x32xf32>
    %cst_27 = arith.constant dense<0.000000e+00> : vector<16x32xf32>
    %22 = tpu.matmul %1, %21, %cst_27 {dimension_numbers = #tpu.dot_dimension_numbers<[1], [0], [0], [1], [0, 0, 1, 1], [], []>} : vector<16x32xf32>, vector<32x32xf32>, vector<16x32xf32> -> vector<16x32xf32>
    %c0_28 = arith.constant 0 : index
    %c2_29 = arith.constant 2 : index
    %c0_30 = arith.constant 0 : index
    %c0_31 = arith.constant 0 : index
    %23 = vector.load %arg4[%c0_28, %c2_29, %c0_30, %c0_31] : memref<1x4x1x32xf32, #tpu.memory_space<vmem>>, vector<1x1x1x32xf32>
    %24 = vector.shape_cast %23 : vector<1x1x1x32xf32> to vector<1x32xf32>
    %25 = vector.broadcast %24 : vector<1x32xf32> to vector<16x32xf32>
    %26 = arith.addf %22, %25 : vector<16x32xf32>
    %27 = vector.shape_cast %26 : vector<16x32xf32> to vector<8x2x32xf32>
    %c0_32 = arith.constant 0 : index
    %c0_33 = arith.constant 0 : index
    %c0_34 = arith.constant 0 : index
    %28 = vector.load %arg9[%c0_32, %c0_33, %c0_34] : memref<8x2x32xf32, #tpu.memory_space<vmem>>, vector<8x2x32xf32>
    tpu.vector_store %arg9[%c0_32, %c0_33, %c0_34], %27 {strides = array<i32>} : memref<8x2x32xf32, #tpu.memory_space<vmem>>, vector<8x2x32xf32>,
    %c0_35 = arith.constant 0 : index
    %c3 = arith.constant 3 : index
    %c0_36 = arith.constant 0 : index
    %c0_37 = arith.constant 0 : index
    %29 = vector.load %arg2[%c0_35, %c3, %c0_36, %c0_37] : memref<1x4x32x32xf32, #tpu.memory_space<vmem>>, vector<1x1x32x32xf32>
    %30 = vector.shape_cast %29 : vector<1x1x32x32xf32> to vector<32x32xf32>
    %cst_38 = arith.constant dense<0.000000e+00> : vector<16x32xf32>
    %31 = tpu.matmul %1, %30, %cst_38 {dimension_numbers = #tpu.dot_dimension_numbers<[1], [0], [0], [1], [0, 0, 1, 1], [], []>} : vector<16x32xf32>, vector<32x32xf32>, vector<16x32xf32> -> vector<16x32xf32>
    %c0_39 = arith.constant 0 : index
    %c3_40 = arith.constant 3 : index
    %c0_41 = arith.constant 0 : index
    %c0_42 = arith.constant 0 : index
    %32 = vector.load %arg4[%c0_39, %c3_40, %c0_41, %c0_42] : memref<1x4x1x32xf32, #tpu.memory_space<vmem>>, vector<1x1x1x32xf32>
    %33 = vector.shape_cast %32 : vector<1x1x1x32xf32> to vector<1x32xf32>
    %34 = vector.broadcast %33 : vector<1x32xf32> to vector<16x32xf32>
    %35 = arith.addf %31, %34 : vector<16x32xf32>
    %36 = vector.shape_cast %35 : vector<16x32xf32> to vector<8x2x32xf32>
    %c0_43 = arith.constant 0 : index
    %c0_44 = arith.constant 0 : index
    %c0_45 = arith.constant 0 : index
    %37 = vector.load %arg10[%c0_43, %c0_44, %c0_45] : memref<8x2x32xf32, #tpu.memory_space<vmem>>, vector<8x2x32xf32>
    tpu.vector_store %arg10[%c0_43, %c0_44, %c0_45], %36 {strides = array<i32>} : memref<8x2x32xf32, #tpu.memory_space<vmem>>, vector<8x2x32xf32>,
    %cst_46 = arith.constant 0.000000e+00 : f32
    %38 = vector.broadcast %cst_46 : f32 to vector<2x32xf32>
    %c0_47 = arith.constant 0 : index
    %c0_48 = arith.constant 0 : index
    %39 = vector.load %arg11[%c0_47, %c0_48] : memref<2x32xf32, #tpu.memory_space<vmem>>, vector<2x32xf32>
    tpu.vector_store %arg11[%c0_47, %c0_48], %38 {strides = array<i32>} : memref<2x32xf32, #tpu.memory_space<vmem>>, vector<2x32xf32>,
    %cst_49 = arith.constant 0.000000e+00 : f32
    %40 = vector.broadcast %cst_49 : f32 to vector<2x32xf32>
    %c0_50 = arith.constant 0 : index
    %c0_51 = arith.constant 0 : index
    %41 = vector.load %arg12[%c0_50, %c0_51] : memref<2x32xf32, #tpu.memory_space<vmem>>, vector<2x32xf32>
    tpu.vector_store %arg12[%c0_50, %c0_51], %40 {strides = array<i32>} : memref<2x32xf32, #tpu.memory_space<vmem>>, vector<2x32xf32>,
    %c7_i32 = arith.constant 7 : i32
    %42 = arith.muli %arg0, %c7_i32 : i32
    %c2_i32 = arith.constant 2 : i32
    %43 = arith.muli %c2_i32, %arg0 : i32
    %c1_i32 = arith.constant 1 : i32
    %44 = arith.subi %c1_i32, %43 : i32
    %c0_i32 = arith.constant 0 : i32
    %45 = arith.muli %44, %c0_i32 : i32
    %46 = arith.addi %42, %45 : i32
    %c0_52 = arith.constant 0 : index
    %c0_53 = arith.constant 0 : index
    %47 = vector.load %arg11[%c0_52, %c0_53] : memref<2x32xf32, #tpu.memory_space<vmem>>, vector<2x32xf32>
    %48 = arith.index_cast %46 : i32 to index
    %c0_54 = arith.constant 0 : index
    %c0_55 = arith.constant 0 : index
    %49 = vector.load %arg7[%48, %c0_54, %c0_55] : memref<8x2x32xf32, #tpu.memory_space<vmem>>, vector<1x2x32xf32>
    %50 = vector.shape_cast %49 : vector<1x2x32xf32> to vector<2x32xf32>
    %c0_56 = arith.constant 0 : index
    %c0_57 = arith.constant 0 : index
    %c0_58 = arith.constant 0 : index
    %c0_59 = arith.constant 0 : index
    %51 = vector.load %arg3[%c0_56, %c0_57, %c0_58, %c0_59] : memref<1x4x32x32xf32, #tpu.memory_space<vmem>>, vector<1x1x32x32xf32>
    %52 = vector.shape_cast %51 : vector<1x1x32x32xf32> to vector<32x32xf32>
    %cst_60 = arith.constant dense<0.000000e+00> : vector<2x32xf32>
    %53 = tpu.matmul %47, %52, %cst_60 {dimension_numbers = #tpu.dot_dimension_numbers<[1], [0], [0], [1], [0, 0, 1, 1], [], []>} : vector<2x32xf32>, vector<32x32xf32>, vector<2x32xf32> -> vector<2x32xf32>
    %54 = arith.addf %50, %53 : vector<2x32xf32>
    %55 = arith.index_cast %46 : i32 to index
    %c0_61 = arith.constant 0 : index
    %c0_62 = arith.constant 0 : index
    %56 = vector.load %arg8[%55, %c0_61, %c0_62] : memref<8x2x32xf32, #tpu.memory_space<vmem>>, vector<1x2x32xf32>
    %57 = vector.shape_cast %56 : vector<1x2x32xf32> to vector<2x32xf32>
    %c0_63 = arith.constant 0 : index
    %c1_64 = arith.constant 1 : index
    %c0_65 = arith.constant 0 : index
    %c0_66 = arith.constant 0 : index
    %58 = vector.load %arg3[%c0_63, %c1_64, %c0_65, %c0_66] : memref<1x4x32x32xf32, #tpu.memory_space<vmem>>, vector<1x1x32x32xf32>
    %59 = vector.shape_cast %58 : vector<1x1x32x32xf32> to vector<32x32xf32>
    %cst_67 = arith.constant dense<0.000000e+00> : vector<2x32xf32>
    %60 = tpu.matmul %47, %59, %cst_67 {dimension_numbers = #tpu.dot_dimension_numbers<[1], [0], [0], [1], [0, 0, 1, 1], [], []>} : vector<2x32xf32>, vector<32x32xf32>, vector<2x32xf32> -> vector<2x32xf32>
    %61 = arith.addf %57, %60 : vector<2x32xf32>
    %62 = arith.index_cast %46 : i32 to index
    %c0_68 = arith.constant 0 : index
    %c0_69 = arith.constant 0 : index
    %63 = vector.load %arg9[%62, %c0_68, %c0_69] : memref<8x2x32xf32, #tpu.memory_space<vmem>>, vector<1x2x32xf32>
    %64 = vector.shape_cast %63 : vector<1x2x32xf32> to vector<2x32xf32>
    %c0_70 = arith.constant 0 : index
    %c2_71 = arith.constant 2 : index
    %c0_72 = arith.constant 0 : index
    %c0_73 = arith.constant 0 : index
    %65 = vector.load %arg3[%c0_70, %c2_71, %c0_72, %c0_73] : memref<1x4x32x32xf32, #tpu.memory_space<vmem>>, vector<1x1x32x32xf32>
    %66 = vector.shape_cast %65 : vector<1x1x32x32xf32> to vector<32x32xf32>
    %cst_74 = arith.constant dense<0.000000e+00> : vector<2x32xf32>
    %67 = tpu.matmul %47, %66, %cst_74 {dimension_numbers = #tpu.dot_dimension_numbers<[1], [0], [0], [1], [0, 0, 1, 1], [], []>} : vector<2x32xf32>, vector<32x32xf32>, vector<2x32xf32> -> vector<2x32xf32>
    %68 = arith.addf %64, %67 : vector<2x32xf32>
    %69 = arith.index_cast %46 : i32 to index
    %c0_75 = arith.constant 0 : index
    %c0_76 = arith.constant 0 : index
    %70 = vector.load %arg10[%69, %c0_75, %c0_76] : memref<8x2x32xf32, #tpu.memory_space<vmem>>, vector<1x2x32xf32>
    %71 = vector.shape_cast %70 : vector<1x2x32xf32> to vector<2x32xf32>
    %c0_77 = arith.constant 0 : index
    %c3_78 = arith.constant 3 : index
    %c0_79 = arith.constant 0 : index
    %c0_80 = arith.constant 0 : index
    %72 = vector.load %arg3[%c0_77, %c3_78, %c0_79, %c0_80] : memref<1x4x32x32xf32, #tpu.memory_space<vmem>>, vector<1x1x32x32xf32>
    %73 = vector.shape_cast %72 : vector<1x1x32x32xf32> to vector<32x32xf32>
    %cst_81 = arith.constant dense<0.000000e+00> : vector<2x32xf32>
    %74 = tpu.matmul %47, %73, %cst_81 {dimension_numbers = #tpu.dot_dimension_numbers<[1], [0], [0], [1], [0, 0, 1, 1], [], []>} : vector<2x32xf32>, vector<32x32xf32>, vector<2x32xf32> -> vector<2x32xf32>
    %75 = arith.addf %71, %74 : vector<2x32xf32>
    %76 = arith.negf %54 : vector<2x32xf32>
    %77 = math.exp %76 : vector<2x32xf32>
    %cst_82 = arith.constant 1.000000e+00 : f32
    %78 = vector.broadcast %cst_82 : f32 to vector<2x32xf32>
    %79 = arith.addf %78, %77 : vector<2x32xf32>
    %80 = arith.divf %78, %79 : vector<2x32xf32>
    %81 = arith.negf %61 : vector<2x32xf32>
    %82 = math.exp %81 : vector<2x32xf32>
    %cst_83 = arith.constant 1.000000e+00 : f32
    %83 = vector.broadcast %cst_83 : f32 to vector<2x32xf32>
    %84 = arith.addf %83, %82 : vector<2x32xf32>
    %85 = arith.divf %83, %84 : vector<2x32xf32>
    %86 = math.tanh %68 : vector<2x32xf32>
    %87 = arith.negf %75 : vector<2x32xf32>
    %88 = math.exp %87 : vector<2x32xf32>
    %cst_84 = arith.constant 1.000000e+00 : f32
    %89 = vector.broadcast %cst_84 : f32 to vector<2x32xf32>
    %90 = arith.addf %89, %88 : vector<2x32xf32>
    %91 = arith.divf %89, %90 : vector<2x32xf32>
    %c0_85 = arith.constant 0 : index
    %c0_86 = arith.constant 0 : index
    %92 = vector.load %arg12[%c0_85, %c0_86] : memref<2x32xf32, #tpu.memory_space<vmem>>, vector<2x32xf32>
    %93 = arith.mulf %85, %92 : vector<2x32xf32>
    %94 = arith.mulf %80, %86 : vector<2x32xf32>
    %95 = arith.addf %93, %94 : vector<2x32xf32>
    %96 = math.tanh %95 : vector<2x32xf32>
    %97 = arith.mulf %91, %96 : vector<2x32xf32>
    %c0_87 = arith.constant 0 : index
    %c0_88 = arith.constant 0 : index
    %98 = vector.load %arg12[%c0_87, %c0_88] : memref<2x32xf32, #tpu.memory_space<vmem>>, vector<2x32xf32>
    tpu.vector_store %arg12[%c0_87, %c0_88], %95 {strides = array<i32>} : memref<2x32xf32, #tpu.memory_space<vmem>>, vector<2x32xf32>,
    %c0_89 = arith.constant 0 : index
    %c0_90 = arith.constant 0 : index
    %99 = vector.load %arg11[%c0_89, %c0_90] : memref<2x32xf32, #tpu.memory_space<vmem>>, vector<2x32xf32>
    tpu.vector_store %arg11[%c0_89, %c0_90], %97 {strides = array<i32>} : memref<2x32xf32, #tpu.memory_space<vmem>>, vector<2x32xf32>,
    %c0_91 = arith.constant 0 : index
    %100 = arith.index_cast %46 : i32 to index
    %c0_92 = arith.constant 0 : index
    %c0_93 = arith.constant 0 : index
    %101 = vector.load %arg5[%c0_91, %100, %c0_92, %c0_93] : memref<1x8x2x32xf32, #tpu.memory_space<vmem>>, vector<1x1x2x32xf32>
    %102 = vector.shape_cast %101 : vector<1x1x2x32xf32> to vector<2x32xf32>
    %103 = vector.shape_cast %97 : vector<2x32xf32> to vector<1x1x2x32xf32>
    tpu.vector_store %arg5[%c0_91, %100, %c0_92, %c0_93], %103 {strides = array<i32>} : memref<1x8x2x32xf32, #tpu.memory_space<vmem>>, vector<1x1x2x32xf32>,
    %c1_i32_94 = arith.constant 1 : i32
    %104 = arith.muli %44, %c1_i32_94 : i32
    %105 = arith.addi %42, %104 : i32
    %c0_95 = arith.constant 0 : index
    %c0_96 = arith.constant 0 : index
    %106 = vector.load %arg11[%c0_95, %c0_96] : memref<2x32xf32, #tpu.memory_space<vmem>>, vector<2x32xf32>
    %107 = arith.index_cast %105 : i32 to index
    %c0_97 = arith.constant 0 : index
    %c0_98 = arith.constant 0 : index
    %108 = vector.load %arg7[%107, %c0_97, %c0_98] : memref<8x2x32xf32, #tpu.memory_space<vmem>>, vector<1x2x32xf32>
    %109 = vector.shape_cast %108 : vector<1x2x32xf32> to vector<2x32xf32>
    %c0_99 = arith.constant 0 : index
    %c0_100 = arith.constant 0 : index
    %c0_101 = arith.constant 0 : index
    %c0_102 = arith.constant 0 : index
    %110 = vector.load %arg3[%c0_99, %c0_100, %c0_101, %c0_102] : memref<1x4x32x32xf32, #tpu.memory_space<vmem>>, vector<1x1x32x32xf32>
    %111 = vector.shape_cast %110 : vector<1x1x32x32xf32> to vector<32x32xf32>
    %cst_103 = arith.constant dense<0.000000e+00> : vector<2x32xf32>
    %112 = tpu.matmul %106, %111, %cst_103 {dimension_numbers = #tpu.dot_dimension_numbers<[1], [0], [0], [1], [0, 0, 1, 1], [], []>} : vector<2x32xf32>, vector<32x32xf32>, vector<2x32xf32> -> vector<2x32xf32>
    %113 = arith.addf %109, %112 : vector<2x32xf32>
    %114 = arith.index_cast %105 : i32 to index
    %c0_104 = arith.constant 0 : index
    %c0_105 = arith.constant 0 : index
    %115 = vector.load %arg8[%114, %c0_104, %c0_105] : memref<8x2x32xf32, #tpu.memory_space<vmem>>, vector<1x2x32xf32>
    %116 = vector.shape_cast %115 : vector<1x2x32xf32> to vector<2x32xf32>
    %c0_106 = arith.constant 0 : index
    %c1_107 = arith.constant 1 : index
    %c0_108 = arith.constant 0 : index
    %c0_109 = arith.constant 0 : index
    %117 = vector.load %arg3[%c0_106, %c1_107, %c0_108, %c0_109] : memref<1x4x32x32xf32, #tpu.memory_space<vmem>>, vector<1x1x32x32xf32>
    %118 = vector.shape_cast %117 : vector<1x1x32x32xf32> to vector<32x32xf32>
    %cst_110 = arith.constant dense<0.000000e+00> : vector<2x32xf32>
    %119 = tpu.matmul %106, %118, %cst_110 {dimension_numbers = #tpu.dot_dimension_numbers<[1], [0], [0], [1], [0, 0, 1, 1], [], []>} : vector<2x32xf32>, vector<32x32xf32>, vector<2x32xf32> -> vector<2x32xf32>
    %120 = arith.addf %116, %119 : vector<2x32xf32>
    %121 = arith.index_cast %105 : i32 to index
    %c0_111 = arith.constant 0 : index
    %c0_112 = arith.constant 0 : index
    %122 = vector.load %arg9[%121, %c0_111, %c0_112] : memref<8x2x32xf32, #tpu.memory_space<vmem>>, vector<1x2x32xf32>
    %123 = vector.shape_cast %122 : vector<1x2x32xf32> to vector<2x32xf32>
    %c0_113 = arith.constant 0 : index
    %c2_114 = arith.constant 2 : index
    %c0_115 = arith.constant 0 : index
    %c0_116 = arith.constant 0 : index
    %124 = vector.load %arg3[%c0_113, %c2_114, %c0_115, %c0_116] : memref<1x4x32x32xf32, #tpu.memory_space<vmem>>, vector<1x1x32x32xf32>
    %125 = vector.shape_cast %124 : vector<1x1x32x32xf32> to vector<32x32xf32>
    %cst_117 = arith.constant dense<0.000000e+00> : vector<2x32xf32>
    %126 = tpu.matmul %106, %125, %cst_117 {dimension_numbers = #tpu.dot_dimension_numbers<[1], [0], [0], [1], [0, 0, 1, 1], [], []>} : vector<2x32xf32>, vector<32x32xf32>, vector<2x32xf32> -> vector<2x32xf32>
    %127 = arith.addf %123, %126 : vector<2x32xf32>
    %128 = arith.index_cast %105 : i32 to index
    %c0_118 = arith.constant 0 : index
    %c0_119 = arith.constant 0 : index
    %129 = vector.load %arg10[%128, %c0_118, %c0_119] : memref<8x2x32xf32, #tpu.memory_space<vmem>>, vector<1x2x32xf32>
    %130 = vector.shape_cast %129 : vector<1x2x32xf32> to vector<2x32xf32>
    %c0_120 = arith.constant 0 : index
    %c3_121 = arith.constant 3 : index
    %c0_122 = arith.constant 0 : index
    %c0_123 = arith.constant 0 : index
    %131 = vector.load %arg3[%c0_120, %c3_121, %c0_122, %c0_123] : memref<1x4x32x32xf32, #tpu.memory_space<vmem>>, vector<1x1x32x32xf32>
    %132 = vector.shape_cast %131 : vector<1x1x32x32xf32> to vector<32x32xf32>
    %cst_124 = arith.constant dense<0.000000e+00> : vector<2x32xf32>
    %133 = tpu.matmul %106, %132, %cst_124 {dimension_numbers = #tpu.dot_dimension_numbers<[1], [0], [0], [1], [0, 0, 1, 1], [], []>} : vector<2x32xf32>, vector<32x32xf32>, vector<2x32xf32> -> vector<2x32xf32>
    %134 = arith.addf %130, %133 : vector<2x32xf32>
    %135 = arith.negf %113 : vector<2x32xf32>
    %136 = math.exp %135 : vector<2x32xf32>
    %cst_125 = arith.constant 1.000000e+00 : f32
    %137 = vector.broadcast %cst_125 : f32 to vector<2x32xf32>
    %138 = arith.addf %137, %136 : vector<2x32xf32>
    %139 = arith.divf %137, %138 : vector<2x32xf32>
    %140 = arith.negf %120 : vector<2x32xf32>
    %141 = math.exp %140 : vector<2x32xf32>
    %cst_126 = arith.constant 1.000000e+00 : f32
    %142 = vector.broadcast %cst_126 : f32 to vector<2x32xf32>
    %143 = arith.addf %142, %141 : vector<2x32xf32>
    %144 = arith.divf %142, %143 : vector<2x32xf32>
    %145 = math.tanh %127 : vector<2x32xf32>
    %146 = arith.negf %134 : vector<2x32xf32>
    %147 = math.exp %146 : vector<2x32xf32>
    %cst_127 = arith.constant 1.000000e+00 : f32
    %148 = vector.broadcast %cst_127 : f32 to vector<2x32xf32>
    %149 = arith.addf %148, %147 : vector<2x32xf32>
    %150 = arith.divf %148, %149 : vector<2x32xf32>
    %c0_128 = arith.constant 0 : index
    %c0_129 = arith.constant 0 : index
    %151 = vector.load %arg12[%c0_128, %c0_129] : memref<2x32xf32, #tpu.memory_space<vmem>>, vector<2x32xf32>
    %152 = arith.mulf %144, %151 : vector<2x32xf32>
    %153 = arith.mulf %139, %145 : vector<2x32xf32>
    %154 = arith.addf %152, %153 : vector<2x32xf32>
    %155 = math.tanh %154 : vector<2x32xf32>
    %156 = arith.mulf %150, %155 : vector<2x32xf32>
    %c0_130 = arith.constant 0 : index
    %c0_131 = arith.constant 0 : index
    %157 = vector.load %arg12[%c0_130, %c0_131] : memref<2x32xf32, #tpu.memory_space<vmem>>, vector<2x32xf32>
    tpu.vector_store %arg12[%c0_130, %c0_131], %154 {strides = array<i32>} : memref<2x32xf32, #tpu.memory_space<vmem>>, vector<2x32xf32>,
    %c0_132 = arith.constant 0 : index
    %c0_133 = arith.constant 0 : index
    %158 = vector.load %arg11[%c0_132, %c0_133] : memref<2x32xf32, #tpu.memory_space<vmem>>, vector<2x32xf32>
    tpu.vector_store %arg11[%c0_132, %c0_133], %156 {strides = array<i32>} : memref<2x32xf32, #tpu.memory_space<vmem>>, vector<2x32xf32>,
    %c0_134 = arith.constant 0 : index
    %159 = arith.index_cast %105 : i32 to index
    %c0_135 = arith.constant 0 : index
    %c0_136 = arith.constant 0 : index
    %160 = vector.load %arg5[%c0_134, %159, %c0_135, %c0_136] : memref<1x8x2x32xf32, #tpu.memory_space<vmem>>, vector<1x1x2x32xf32>
    %161 = vector.shape_cast %160 : vector<1x1x2x32xf32> to vector<2x32xf32>
    %162 = vector.shape_cast %156 : vector<2x32xf32> to vector<1x1x2x32xf32>
    tpu.vector_store %arg5[%c0_134, %159, %c0_135, %c0_136], %162 {strides = array<i32>} : memref<1x8x2x32xf32, #tpu.memory_space<vmem>>, vector<1x1x2x32xf32>,
    %c2_i32_137 = arith.constant 2 : i32
    %163 = arith.muli %44, %c2_i32_137 : i32
    %164 = arith.addi %42, %163 : i32
    %c0_138 = arith.constant 0 : index
    %c0_139 = arith.constant 0 : index
    %165 = vector.load %arg11[%c0_138, %c0_139] : memref<2x32xf32, #tpu.memory_space<vmem>>, vector<2x32xf32>
    %166 = arith.index_cast %164 : i32 to index
    %c0_140 = arith.constant 0 : index
    %c0_141 = arith.constant 0 : index
    %167 = vector.load %arg7[%166, %c0_140, %c0_141] : memref<8x2x32xf32, #tpu.memory_space<vmem>>, vector<1x2x32xf32>
    %168 = vector.shape_cast %167 : vector<1x2x32xf32> to vector<2x32xf32>
    %c0_142 = arith.constant 0 : index
    %c0_143 = arith.constant 0 : index
    %c0_144 = arith.constant 0 : index
    %c0_145 = arith.constant 0 : index
    %169 = vector.load %arg3[%c0_142, %c0_143, %c0_144, %c0_145] : memref<1x4x32x32xf32, #tpu.memory_space<vmem>>, vector<1x1x32x32xf32>
    %170 = vector.shape_cast %169 : vector<1x1x32x32xf32> to vector<32x32xf32>
    %cst_146 = arith.constant dense<0.000000e+00> : vector<2x32xf32>
    %171 = tpu.matmul %165, %170, %cst_146 {dimension_numbers = #tpu.dot_dimension_numbers<[1], [0], [0], [1], [0, 0, 1, 1], [], []>} : vector<2x32xf32>, vector<32x32xf32>, vector<2x32xf32> -> vector<2x32xf32>
    %172 = arith.addf %168, %171 : vector<2x32xf32>
    %173 = arith.index_cast %164 : i32 to index
    %c0_147 = arith.constant 0 : index
    %c0_148 = arith.constant 0 : index
    %174 = vector.load %arg8[%173, %c0_147, %c0_148] : memref<8x2x32xf32, #tpu.memory_space<vmem>>, vector<1x2x32xf32>
    %175 = vector.shape_cast %174 : vector<1x2x32xf32> to vector<2x32xf32>
    %c0_149 = arith.constant 0 : index
    %c1_150 = arith.constant 1 : index
    %c0_151 = arith.constant 0 : index
    %c0_152 = arith.constant 0 : index
    %176 = vector.load %arg3[%c0_149, %c1_150, %c0_151, %c0_152] : memref<1x4x32x32xf32, #tpu.memory_space<vmem>>, vector<1x1x32x32xf32>
    %177 = vector.shape_cast %176 : vector<1x1x32x32xf32> to vector<32x32xf32>
    %cst_153 = arith.constant dense<0.000000e+00> : vector<2x32xf32>
    %178 = tpu.matmul %165, %177, %cst_153 {dimension_numbers = #tpu.dot_dimension_numbers<[1], [0], [0], [1], [0, 0, 1, 1], [], []>} : vector<2x32xf32>, vector<32x32xf32>, vector<2x32xf32> -> vector<2x32xf32>
    %179 = arith.addf %175, %178 : vector<2x32xf32>
    %180 = arith.index_cast %164 : i32 to index
    %c0_154 = arith.constant 0 : index
    %c0_155 = arith.constant 0 : index
    %181 = vector.load %arg9[%180, %c0_154, %c0_155] : memref<8x2x32xf32, #tpu.memory_space<vmem>>, vector<1x2x32xf32>
    %182 = vector.shape_cast %181 : vector<1x2x32xf32> to vector<2x32xf32>
    %c0_156 = arith.constant 0 : index
    %c2_157 = arith.constant 2 : index
    %c0_158 = arith.constant 0 : index
    %c0_159 = arith.constant 0 : index
    %183 = vector.load %arg3[%c0_156, %c2_157, %c0_158, %c0_159] : memref<1x4x32x32xf32, #tpu.memory_space<vmem>>, vector<1x1x32x32xf32>
    %184 = vector.shape_cast %183 : vector<1x1x32x32xf32> to vector<32x32xf32>
    %cst_160 = arith.constant dense<0.000000e+00> : vector<2x32xf32>
    %185 = tpu.matmul %165, %184, %cst_160 {dimension_numbers = #tpu.dot_dimension_numbers<[1], [0], [0], [1], [0, 0, 1, 1], [], []>} : vector<2x32xf32>, vector<32x32xf32>, vector<2x32xf32> -> vector<2x32xf32>
    %186 = arith.addf %182, %185 : vector<2x32xf32>
    %187 = arith.index_cast %164 : i32 to index
    %c0_161 = arith.constant 0 : index
    %c0_162 = arith.constant 0 : index
    %188 = vector.load %arg10[%187, %c0_161, %c0_162] : memref<8x2x32xf32, #tpu.memory_space<vmem>>, vector<1x2x32xf32>
    %189 = vector.shape_cast %188 : vector<1x2x32xf32> to vector<2x32xf32>
    %c0_163 = arith.constant 0 : index
    %c3_164 = arith.constant 3 : index
    %c0_165 = arith.constant 0 : index
    %c0_166 = arith.constant 0 : index
    %190 = vector.load %arg3[%c0_163, %c3_164, %c0_165, %c0_166] : memref<1x4x32x32xf32, #tpu.memory_space<vmem>>, vector<1x1x32x32xf32>
    %191 = vector.shape_cast %190 : vector<1x1x32x32xf32> to vector<32x32xf32>
    %cst_167 = arith.constant dense<0.000000e+00> : vector<2x32xf32>
    %192 = tpu.matmul %165, %191, %cst_167 {dimension_numbers = #tpu.dot_dimension_numbers<[1], [0], [0], [1], [0, 0, 1, 1], [], []>} : vector<2x32xf32>, vector<32x32xf32>, vector<2x32xf32> -> vector<2x32xf32>
    %193 = arith.addf %189, %192 : vector<2x32xf32>
    %194 = arith.negf %172 : vector<2x32xf32>
    %195 = math.exp %194 : vector<2x32xf32>
    %cst_168 = arith.constant 1.000000e+00 : f32
    %196 = vector.broadcast %cst_168 : f32 to vector<2x32xf32>
    %197 = arith.addf %196, %195 : vector<2x32xf32>
    %198 = arith.divf %196, %197 : vector<2x32xf32>
    %199 = arith.negf %179 : vector<2x32xf32>
    %200 = math.exp %199 : vector<2x32xf32>
    %cst_169 = arith.constant 1.000000e+00 : f32
    %201 = vector.broadcast %cst_169 : f32 to vector<2x32xf32>
    %202 = arith.addf %201, %200 : vector<2x32xf32>
    %203 = arith.divf %201, %202 : vector<2x32xf32>
    %204 = math.tanh %186 : vector<2x32xf32>
    %205 = arith.negf %193 : vector<2x32xf32>
    %206 = math.exp %205 : vector<2x32xf32>
    %cst_170 = arith.constant 1.000000e+00 : f32
    %207 = vector.broadcast %cst_170 : f32 to vector<2x32xf32>
    %208 = arith.addf %207, %206 : vector<2x32xf32>
    %209 = arith.divf %207, %208 : vector<2x32xf32>
    %c0_171 = arith.constant 0 : index
    %c0_172 = arith.constant 0 : index
    %210 = vector.load %arg12[%c0_171, %c0_172] : memref<2x32xf32, #tpu.memory_space<vmem>>, vector<2x32xf32>
    %211 = arith.mulf %203, %210 : vector<2x32xf32>
    %212 = arith.mulf %198, %204 : vector<2x32xf32>
    %213 = arith.addf %211, %212 : vector<2x32xf32>
    %214 = math.tanh %213 : vector<2x32xf32>
    %215 = arith.mulf %209, %214 : vector<2x32xf32>
    %c0_173 = arith.constant 0 : index
    %c0_174 = arith.constant 0 : index
    %216 = vector.load %arg12[%c0_173, %c0_174] : memref<2x32xf32, #tpu.memory_space<vmem>>, vector<2x32xf32>
    tpu.vector_store %arg12[%c0_173, %c0_174], %213 {strides = array<i32>} : memref<2x32xf32, #tpu.memory_space<vmem>>, vector<2x32xf32>,
    %c0_175 = arith.constant 0 : index
    %c0_176 = arith.constant 0 : index
    %217 = vector.load %arg11[%c0_175, %c0_176] : memref<2x32xf32, #tpu.memory_space<vmem>>, vector<2x32xf32>
    tpu.vector_store %arg11[%c0_175, %c0_176], %215 {strides = array<i32>} : memref<2x32xf32, #tpu.memory_space<vmem>>, vector<2x32xf32>,
    %c0_177 = arith.constant 0 : index
    %218 = arith.index_cast %164 : i32 to index
    %c0_178 = arith.constant 0 : index
    %c0_179 = arith.constant 0 : index
    %219 = vector.load %arg5[%c0_177, %218, %c0_178, %c0_179] : memref<1x8x2x32xf32, #tpu.memory_space<vmem>>, vector<1x1x2x32xf32>
    %220 = vector.shape_cast %219 : vector<1x1x2x32xf32> to vector<2x32xf32>
    %221 = vector.shape_cast %215 : vector<2x32xf32> to vector<1x1x2x32xf32>
    tpu.vector_store %arg5[%c0_177, %218, %c0_178, %c0_179], %221 {strides = array<i32>} : memref<1x8x2x32xf32, #tpu.memory_space<vmem>>, vector<1x1x2x32xf32>,
    %c3_i32 = arith.constant 3 : i32
    %222 = arith.muli %44, %c3_i32 : i32
    %223 = arith.addi %42, %222 : i32
    %c0_180 = arith.constant 0 : index
    %c0_181 = arith.constant 0 : index
    %224 = vector.load %arg11[%c0_180, %c0_181] : memref<2x32xf32, #tpu.memory_space<vmem>>, vector<2x32xf32>
    %225 = arith.index_cast %223 : i32 to index
    %c0_182 = arith.constant 0 : index
    %c0_183 = arith.constant 0 : index
    %226 = vector.load %arg7[%225, %c0_182, %c0_183] : memref<8x2x32xf32, #tpu.memory_space<vmem>>, vector<1x2x32xf32>
    %227 = vector.shape_cast %226 : vector<1x2x32xf32> to vector<2x32xf32>
    %c0_184 = arith.constant 0 : index
    %c0_185 = arith.constant 0 : index
    %c0_186 = arith.constant 0 : index
    %c0_187 = arith.constant 0 : index
    %228 = vector.load %arg3[%c0_184, %c0_185, %c0_186, %c0_187] : memref<1x4x32x32xf32, #tpu.memory_space<vmem>>, vector<1x1x32x32xf32>
    %229 = vector.shape_cast %228 : vector<1x1x32x32xf32> to vector<32x32xf32>
    %cst_188 = arith.constant dense<0.000000e+00> : vector<2x32xf32>
    %230 = tpu.matmul %224, %229, %cst_188 {dimension_numbers = #tpu.dot_dimension_numbers<[1], [0], [0], [1], [0, 0, 1, 1], [], []>} : vector<2x32xf32>, vector<32x32xf32>, vector<2x32xf32> -> vector<2x32xf32>
    %231 = arith.addf %227, %230 : vector<2x32xf32>
    %232 = arith.index_cast %223 : i32 to index
    %c0_189 = arith.constant 0 : index
    %c0_190 = arith.constant 0 : index
    %233 = vector.load %arg8[%232, %c0_189, %c0_190] : memref<8x2x32xf32, #tpu.memory_space<vmem>>, vector<1x2x32xf32>
    %234 = vector.shape_cast %233 : vector<1x2x32xf32> to vector<2x32xf32>
    %c0_191 = arith.constant 0 : index
    %c1_192 = arith.constant 1 : index
    %c0_193 = arith.constant 0 : index
    %c0_194 = arith.constant 0 : index
    %235 = vector.load %arg3[%c0_191, %c1_192, %c0_193, %c0_194] : memref<1x4x32x32xf32, #tpu.memory_space<vmem>>, vector<1x1x32x32xf32>
    %236 = vector.shape_cast %235 : vector<1x1x32x32xf32> to vector<32x32xf32>
    %cst_195 = arith.constant dense<0.000000e+00> : vector<2x32xf32>
    %237 = tpu.matmul %224, %236, %cst_195 {dimension_numbers = #tpu.dot_dimension_numbers<[1], [0], [0], [1], [0, 0, 1, 1], [], []>} : vector<2x32xf32>, vector<32x32xf32>, vector<2x32xf32> -> vector<2x32xf32>
    %238 = arith.addf %234, %237 : vector<2x32xf32>
    %239 = arith.index_cast %223 : i32 to index
    %c0_196 = arith.constant 0 : index
    %c0_197 = arith.constant 0 : index
    %240 = vector.load %arg9[%239, %c0_196, %c0_197] : memref<8x2x32xf32, #tpu.memory_space<vmem>>, vector<1x2x32xf32>
    %241 = vector.shape_cast %240 : vector<1x2x32xf32> to vector<2x32xf32>
    %c0_198 = arith.constant 0 : index
    %c2_199 = arith.constant 2 : index
    %c0_200 = arith.constant 0 : index
    %c0_201 = arith.constant 0 : index
    %242 = vector.load %arg3[%c0_198, %c2_199, %c0_200, %c0_201] : memref<1x4x32x32xf32, #tpu.memory_space<vmem>>, vector<1x1x32x32xf32>
    %243 = vector.shape_cast %242 : vector<1x1x32x32xf32> to vector<32x32xf32>
    %cst_202 = arith.constant dense<0.000000e+00> : vector<2x32xf32>
    %244 = tpu.matmul %224, %243, %cst_202 {dimension_numbers = #tpu.dot_dimension_numbers<[1], [0], [0], [1], [0, 0, 1, 1], [], []>} : vector<2x32xf32>, vector<32x32xf32>, vector<2x32xf32> -> vector<2x32xf32>
    %245 = arith.addf %241, %244 : vector<2x32xf32>
    %246 = arith.index_cast %223 : i32 to index
    %c0_203 = arith.constant 0 : index
    %c0_204 = arith.constant 0 : index
    %247 = vector.load %arg10[%246, %c0_203, %c0_204] : memref<8x2x32xf32, #tpu.memory_space<vmem>>, vector<1x2x32xf32>
    %248 = vector.shape_cast %247 : vector<1x2x32xf32> to vector<2x32xf32>
    %c0_205 = arith.constant 0 : index
    %c3_206 = arith.constant 3 : index
    %c0_207 = arith.constant 0 : index
    %c0_208 = arith.constant 0 : index
    %249 = vector.load %arg3[%c0_205, %c3_206, %c0_207, %c0_208] : memref<1x4x32x32xf32, #tpu.memory_space<vmem>>, vector<1x1x32x32xf32>
    %250 = vector.shape_cast %249 : vector<1x1x32x32xf32> to vector<32x32xf32>
    %cst_209 = arith.constant dense<0.000000e+00> : vector<2x32xf32>
    %251 = tpu.matmul %224, %250, %cst_209 {dimension_numbers = #tpu.dot_dimension_numbers<[1], [0], [0], [1], [0, 0, 1, 1], [], []>} : vector<2x32xf32>, vector<32x32xf32>, vector<2x32xf32> -> vector<2x32xf32>
    %252 = arith.addf %248, %251 : vector<2x32xf32>
    %253 = arith.negf %231 : vector<2x32xf32>
    %254 = math.exp %253 : vector<2x32xf32>
    %cst_210 = arith.constant 1.000000e+00 : f32
    %255 = vector.broadcast %cst_210 : f32 to vector<2x32xf32>
    %256 = arith.addf %255, %254 : vector<2x32xf32>
    %257 = arith.divf %255, %256 : vector<2x32xf32>
    %258 = arith.negf %238 : vector<2x32xf32>
    %259 = math.exp %258 : vector<2x32xf32>
    %cst_211 = arith.constant 1.000000e+00 : f32
    %260 = vector.broadcast %cst_211 : f32 to vector<2x32xf32>
    %261 = arith.addf %260, %259 : vector<2x32xf32>
    %262 = arith.divf %260, %261 : vector<2x32xf32>
    %263 = math.tanh %245 : vector<2x32xf32>
    %264 = arith.negf %252 : vector<2x32xf32>
    %265 = math.exp %264 : vector<2x32xf32>
    %cst_212 = arith.constant 1.000000e+00 : f32
    %266 = vector.broadcast %cst_212 : f32 to vector<2x32xf32>
    %267 = arith.addf %266, %265 : vector<2x32xf32>
    %268 = arith.divf %266, %267 : vector<2x32xf32>
    %c0_213 = arith.constant 0 : index
    %c0_214 = arith.constant 0 : index
    %269 = vector.load %arg12[%c0_213, %c0_214] : memref<2x32xf32, #tpu.memory_space<vmem>>, vector<2x32xf32>
    %270 = arith.mulf %262, %269 : vector<2x32xf32>
    %271 = arith.mulf %257, %263 : vector<2x32xf32>
    %272 = arith.addf %270, %271 : vector<2x32xf32>
    %273 = math.tanh %272 : vector<2x32xf32>
    %274 = arith.mulf %268, %273 : vector<2x32xf32>
    %c0_215 = arith.constant 0 : index
    %c0_216 = arith.constant 0 : index
    %275 = vector.load %arg12[%c0_215, %c0_216] : memref<2x32xf32, #tpu.memory_space<vmem>>, vector<2x32xf32>
    tpu.vector_store %arg12[%c0_215, %c0_216], %272 {strides = array<i32>} : memref<2x32xf32, #tpu.memory_space<vmem>>, vector<2x32xf32>,
    %c0_217 = arith.constant 0 : index
    %c0_218 = arith.constant 0 : index
    %276 = vector.load %arg11[%c0_217, %c0_218] : memref<2x32xf32, #tpu.memory_space<vmem>>, vector<2x32xf32>
    tpu.vector_store %arg11[%c0_217, %c0_218], %274 {strides = array<i32>} : memref<2x32xf32, #tpu.memory_space<vmem>>, vector<2x32xf32>,
    %c0_219 = arith.constant 0 : index
    %277 = arith.index_cast %223 : i32 to index
    %c0_220 = arith.constant 0 : index
    %c0_221 = arith.constant 0 : index
    %278 = vector.load %arg5[%c0_219, %277, %c0_220, %c0_221] : memref<1x8x2x32xf32, #tpu.memory_space<vmem>>, vector<1x1x2x32xf32>
    %279 = vector.shape_cast %278 : vector<1x1x2x32xf32> to vector<2x32xf32>
    %280 = vector.shape_cast %274 : vector<2x32xf32> to vector<1x1x2x32xf32>
    tpu.vector_store %arg5[%c0_219, %277, %c0_220, %c0_221], %280 {strides = array<i32>} : memref<1x8x2x32xf32, #tpu.memory_space<vmem>>, vector<1x1x2x32xf32>,
    %c4_i32 = arith.constant 4 : i32
    %281 = arith.muli %44, %c4_i32 : i32
    %282 = arith.addi %42, %281 : i32
    %c0_222 = arith.constant 0 : index
    %c0_223 = arith.constant 0 : index
    %283 = vector.load %arg11[%c0_222, %c0_223] : memref<2x32xf32, #tpu.memory_space<vmem>>, vector<2x32xf32>
    %284 = arith.index_cast %282 : i32 to index
    %c0_224 = arith.constant 0 : index
    %c0_225 = arith.constant 0 : index
    %285 = vector.load %arg7[%284, %c0_224, %c0_225] : memref<8x2x32xf32, #tpu.memory_space<vmem>>, vector<1x2x32xf32>
    %286 = vector.shape_cast %285 : vector<1x2x32xf32> to vector<2x32xf32>
    %c0_226 = arith.constant 0 : index
    %c0_227 = arith.constant 0 : index
    %c0_228 = arith.constant 0 : index
    %c0_229 = arith.constant 0 : index
    %287 = vector.load %arg3[%c0_226, %c0_227, %c0_228, %c0_229] : memref<1x4x32x32xf32, #tpu.memory_space<vmem>>, vector<1x1x32x32xf32>
    %288 = vector.shape_cast %287 : vector<1x1x32x32xf32> to vector<32x32xf32>
    %cst_230 = arith.constant dense<0.000000e+00> : vector<2x32xf32>
    %289 = tpu.matmul %283, %288, %cst_230 {dimension_numbers = #tpu.dot_dimension_numbers<[1], [0], [0], [1], [0, 0, 1, 1], [], []>} : vector<2x32xf32>, vector<32x32xf32>, vector<2x32xf32> -> vector<2x32xf32>
    %290 = arith.addf %286, %289 : vector<2x32xf32>
    %291 = arith.index_cast %282 : i32 to index
    %c0_231 = arith.constant 0 : index
    %c0_232 = arith.constant 0 : index
    %292 = vector.load %arg8[%291, %c0_231, %c0_232] : memref<8x2x32xf32, #tpu.memory_space<vmem>>, vector<1x2x32xf32>
    %293 = vector.shape_cast %292 : vector<1x2x32xf32> to vector<2x32xf32>
    %c0_233 = arith.constant 0 : index
    %c1_234 = arith.constant 1 : index
    %c0_235 = arith.constant 0 : index
    %c0_236 = arith.constant 0 : index
    %294 = vector.load %arg3[%c0_233, %c1_234, %c0_235, %c0_236] : memref<1x4x32x32xf32, #tpu.memory_space<vmem>>, vector<1x1x32x32xf32>
    %295 = vector.shape_cast %294 : vector<1x1x32x32xf32> to vector<32x32xf32>
    %cst_237 = arith.constant dense<0.000000e+00> : vector<2x32xf32>
    %296 = tpu.matmul %283, %295, %cst_237 {dimension_numbers = #tpu.dot_dimension_numbers<[1], [0], [0], [1], [0, 0, 1, 1], [], []>} : vector<2x32xf32>, vector<32x32xf32>, vector<2x32xf32> -> vector<2x32xf32>
    %297 = arith.addf %293, %296 : vector<2x32xf32>
    %298 = arith.index_cast %282 : i32 to index
    %c0_238 = arith.constant 0 : index
    %c0_239 = arith.constant 0 : index
    %299 = vector.load %arg9[%298, %c0_238, %c0_239] : memref<8x2x32xf32, #tpu.memory_space<vmem>>, vector<1x2x32xf32>
    %300 = vector.shape_cast %299 : vector<1x2x32xf32> to vector<2x32xf32>
    %c0_240 = arith.constant 0 : index
    %c2_241 = arith.constant 2 : index
    %c0_242 = arith.constant 0 : index
    %c0_243 = arith.constant 0 : index
    %301 = vector.load %arg3[%c0_240, %c2_241, %c0_242, %c0_243] : memref<1x4x32x32xf32, #tpu.memory_space<vmem>>, vector<1x1x32x32xf32>
    %302 = vector.shape_cast %301 : vector<1x1x32x32xf32> to vector<32x32xf32>
    %cst_244 = arith.constant dense<0.000000e+00> : vector<2x32xf32>
    %303 = tpu.matmul %283, %302, %cst_244 {dimension_numbers = #tpu.dot_dimension_numbers<[1], [0], [0], [1], [0, 0, 1, 1], [], []>} : vector<2x32xf32>, vector<32x32xf32>, vector<2x32xf32> -> vector<2x32xf32>
    %304 = arith.addf %300, %303 : vector<2x32xf32>
    %305 = arith.index_cast %282 : i32 to index
    %c0_245 = arith.constant 0 : index
    %c0_246 = arith.constant 0 : index
    %306 = vector.load %arg10[%305, %c0_245, %c0_246] : memref<8x2x32xf32, #tpu.memory_space<vmem>>, vector<1x2x32xf32>
    %307 = vector.shape_cast %306 : vector<1x2x32xf32> to vector<2x32xf32>
    %c0_247 = arith.constant 0 : index
    %c3_248 = arith.constant 3 : index
    %c0_249 = arith.constant 0 : index
    %c0_250 = arith.constant 0 : index
    %308 = vector.load %arg3[%c0_247, %c3_248, %c0_249, %c0_250] : memref<1x4x32x32xf32, #tpu.memory_space<vmem>>, vector<1x1x32x32xf32>
    %309 = vector.shape_cast %308 : vector<1x1x32x32xf32> to vector<32x32xf32>
    %cst_251 = arith.constant dense<0.000000e+00> : vector<2x32xf32>
    %310 = tpu.matmul %283, %309, %cst_251 {dimension_numbers = #tpu.dot_dimension_numbers<[1], [0], [0], [1], [0, 0, 1, 1], [], []>} : vector<2x32xf32>, vector<32x32xf32>, vector<2x32xf32> -> vector<2x32xf32>
    %311 = arith.addf %307, %310 : vector<2x32xf32>
    %312 = arith.negf %290 : vector<2x32xf32>
    %313 = math.exp %312 : vector<2x32xf32>
    %cst_252 = arith.constant 1.000000e+00 : f32
    %314 = vector.broadcast %cst_252 : f32 to vector<2x32xf32>
    %315 = arith.addf %314, %313 : vector<2x32xf32>
    %316 = arith.divf %314, %315 : vector<2x32xf32>
    %317 = arith.negf %297 : vector<2x32xf32>
    %318 = math.exp %317 : vector<2x32xf32>
    %cst_253 = arith.constant 1.000000e+00 : f32
    %319 = vector.broadcast %cst_253 : f32 to vector<2x32xf32>
    %320 = arith.addf %319, %318 : vector<2x32xf32>
    %321 = arith.divf %319, %320 : vector<2x32xf32>
    %322 = math.tanh %304 : vector<2x32xf32>
    %323 = arith.negf %311 : vector<2x32xf32>
    %324 = math.exp %323 : vector<2x32xf32>
    %cst_254 = arith.constant 1.000000e+00 : f32
    %325 = vector.broadcast %cst_254 : f32 to vector<2x32xf32>
    %326 = arith.addf %325, %324 : vector<2x32xf32>
    %327 = arith.divf %325, %326 : vector<2x32xf32>
    %c0_255 = arith.constant 0 : index
    %c0_256 = arith.constant 0 : index
    %328 = vector.load %arg12[%c0_255, %c0_256] : memref<2x32xf32, #tpu.memory_space<vmem>>, vector<2x32xf32>
    %329 = arith.mulf %321, %328 : vector<2x32xf32>
    %330 = arith.mulf %316, %322 : vector<2x32xf32>
    %331 = arith.addf %329, %330 : vector<2x32xf32>
    %332 = math.tanh %331 : vector<2x32xf32>
    %333 = arith.mulf %327, %332 : vector<2x32xf32>
    %c0_257 = arith.constant 0 : index
    %c0_258 = arith.constant 0 : index
    %334 = vector.load %arg12[%c0_257, %c0_258] : memref<2x32xf32, #tpu.memory_space<vmem>>, vector<2x32xf32>
    tpu.vector_store %arg12[%c0_257, %c0_258], %331 {strides = array<i32>} : memref<2x32xf32, #tpu.memory_space<vmem>>, vector<2x32xf32>,
    %c0_259 = arith.constant 0 : index
    %c0_260 = arith.constant 0 : index
    %335 = vector.load %arg11[%c0_259, %c0_260] : memref<2x32xf32, #tpu.memory_space<vmem>>, vector<2x32xf32>
    tpu.vector_store %arg11[%c0_259, %c0_260], %333 {strides = array<i32>} : memref<2x32xf32, #tpu.memory_space<vmem>>, vector<2x32xf32>,
    %c0_261 = arith.constant 0 : index
    %336 = arith.index_cast %282 : i32 to index
    %c0_262 = arith.constant 0 : index
    %c0_263 = arith.constant 0 : index
    %337 = vector.load %arg5[%c0_261, %336, %c0_262, %c0_263] : memref<1x8x2x32xf32, #tpu.memory_space<vmem>>, vector<1x1x2x32xf32>
    %338 = vector.shape_cast %337 : vector<1x1x2x32xf32> to vector<2x32xf32>
    %339 = vector.shape_cast %333 : vector<2x32xf32> to vector<1x1x2x32xf32>
    tpu.vector_store %arg5[%c0_261, %336, %c0_262, %c0_263], %339 {strides = array<i32>} : memref<1x8x2x32xf32, #tpu.memory_space<vmem>>, vector<1x1x2x32xf32>,
    %c5_i32 = arith.constant 5 : i32
    %340 = arith.muli %44, %c5_i32 : i32
    %341 = arith.addi %42, %340 : i32
    %c0_264 = arith.constant 0 : index
    %c0_265 = arith.constant 0 : index
    %342 = vector.load %arg11[%c0_264, %c0_265] : memref<2x32xf32, #tpu.memory_space<vmem>>, vector<2x32xf32>
    %343 = arith.index_cast %341 : i32 to index
    %c0_266 = arith.constant 0 : index
    %c0_267 = arith.constant 0 : index
    %344 = vector.load %arg7[%343, %c0_266, %c0_267] : memref<8x2x32xf32, #tpu.memory_space<vmem>>, vector<1x2x32xf32>
    %345 = vector.shape_cast %344 : vector<1x2x32xf32> to vector<2x32xf32>
    %c0_268 = arith.constant 0 : index
    %c0_269 = arith.constant 0 : index
    %c0_270 = arith.constant 0 : index
    %c0_271 = arith.constant 0 : index
    %346 = vector.load %arg3[%c0_268, %c0_269, %c0_270, %c0_271] : memref<1x4x32x32xf32, #tpu.memory_space<vmem>>, vector<1x1x32x32xf32>
    %347 = vector.shape_cast %346 : vector<1x1x32x32xf32> to vector<32x32xf32>
    %cst_272 = arith.constant dense<0.000000e+00> : vector<2x32xf32>
    %348 = tpu.matmul %342, %347, %cst_272 {dimension_numbers = #tpu.dot_dimension_numbers<[1], [0], [0], [1], [0, 0, 1, 1], [], []>} : vector<2x32xf32>, vector<32x32xf32>, vector<2x32xf32> -> vector<2x32xf32>
    %349 = arith.addf %345, %348 : vector<2x32xf32>
    %350 = arith.index_cast %341 : i32 to index
    %c0_273 = arith.constant 0 : index
    %c0_274 = arith.constant 0 : index
    %351 = vector.load %arg8[%350, %c0_273, %c0_274] : memref<8x2x32xf32, #tpu.memory_space<vmem>>, vector<1x2x32xf32>
    %352 = vector.shape_cast %351 : vector<1x2x32xf32> to vector<2x32xf32>
    %c0_275 = arith.constant 0 : index
    %c1_276 = arith.constant 1 : index
    %c0_277 = arith.constant 0 : index
    %c0_278 = arith.constant 0 : index
    %353 = vector.load %arg3[%c0_275, %c1_276, %c0_277, %c0_278] : memref<1x4x32x32xf32, #tpu.memory_space<vmem>>, vector<1x1x32x32xf32>
    %354 = vector.shape_cast %353 : vector<1x1x32x32xf32> to vector<32x32xf32>
    %cst_279 = arith.constant dense<0.000000e+00> : vector<2x32xf32>
    %355 = tpu.matmul %342, %354, %cst_279 {dimension_numbers = #tpu.dot_dimension_numbers<[1], [0], [0], [1], [0, 0, 1, 1], [], []>} : vector<2x32xf32>, vector<32x32xf32>, vector<2x32xf32> -> vector<2x32xf32>
    %356 = arith.addf %352, %355 : vector<2x32xf32>
    %357 = arith.index_cast %341 : i32 to index
    %c0_280 = arith.constant 0 : index
    %c0_281 = arith.constant 0 : index
    %358 = vector.load %arg9[%357, %c0_280, %c0_281] : memref<8x2x32xf32, #tpu.memory_space<vmem>>, vector<1x2x32xf32>
    %359 = vector.shape_cast %358 : vector<1x2x32xf32> to vector<2x32xf32>
    %c0_282 = arith.constant 0 : index
    %c2_283 = arith.constant 2 : index
    %c0_284 = arith.constant 0 : index
    %c0_285 = arith.constant 0 : index
    %360 = vector.load %arg3[%c0_282, %c2_283, %c0_284, %c0_285] : memref<1x4x32x32xf32, #tpu.memory_space<vmem>>, vector<1x1x32x32xf32>
    %361 = vector.shape_cast %360 : vector<1x1x32x32xf32> to vector<32x32xf32>
    %cst_286 = arith.constant dense<0.000000e+00> : vector<2x32xf32>
    %362 = tpu.matmul %342, %361, %cst_286 {dimension_numbers = #tpu.dot_dimension_numbers<[1], [0], [0], [1], [0, 0, 1, 1], [], []>} : vector<2x32xf32>, vector<32x32xf32>, vector<2x32xf32> -> vector<2x32xf32>
    %363 = arith.addf %359, %362 : vector<2x32xf32>
    %364 = arith.index_cast %341 : i32 to index
    %c0_287 = arith.constant 0 : index
    %c0_288 = arith.constant 0 : index
    %365 = vector.load %arg10[%364, %c0_287, %c0_288] : memref<8x2x32xf32, #tpu.memory_space<vmem>>, vector<1x2x32xf32>
    %366 = vector.shape_cast %365 : vector<1x2x32xf32> to vector<2x32xf32>
    %c0_289 = arith.constant 0 : index
    %c3_290 = arith.constant 3 : index
    %c0_291 = arith.constant 0 : index
    %c0_292 = arith.constant 0 : index
    %367 = vector.load %arg3[%c0_289, %c3_290, %c0_291, %c0_292] : memref<1x4x32x32xf32, #tpu.memory_space<vmem>>, vector<1x1x32x32xf32>
    %368 = vector.shape_cast %367 : vector<1x1x32x32xf32> to vector<32x32xf32>
    %cst_293 = arith.constant dense<0.000000e+00> : vector<2x32xf32>
    %369 = tpu.matmul %342, %368, %cst_293 {dimension_numbers = #tpu.dot_dimension_numbers<[1], [0], [0], [1], [0, 0, 1, 1], [], []>} : vector<2x32xf32>, vector<32x32xf32>, vector<2x32xf32> -> vector<2x32xf32>
    %370 = arith.addf %366, %369 : vector<2x32xf32>
    %371 = arith.negf %349 : vector<2x32xf32>
    %372 = math.exp %371 : vector<2x32xf32>
    %cst_294 = arith.constant 1.000000e+00 : f32
    %373 = vector.broadcast %cst_294 : f32 to vector<2x32xf32>
    %374 = arith.addf %373, %372 : vector<2x32xf32>
    %375 = arith.divf %373, %374 : vector<2x32xf32>
    %376 = arith.negf %356 : vector<2x32xf32>
    %377 = math.exp %376 : vector<2x32xf32>
    %cst_295 = arith.constant 1.000000e+00 : f32
    %378 = vector.broadcast %cst_295 : f32 to vector<2x32xf32>
    %379 = arith.addf %378, %377 : vector<2x32xf32>
    %380 = arith.divf %378, %379 : vector<2x32xf32>
    %381 = math.tanh %363 : vector<2x32xf32>
    %382 = arith.negf %370 : vector<2x32xf32>
    %383 = math.exp %382 : vector<2x32xf32>
    %cst_296 = arith.constant 1.000000e+00 : f32
    %384 = vector.broadcast %cst_296 : f32 to vector<2x32xf32>
    %385 = arith.addf %384, %383 : vector<2x32xf32>
    %386 = arith.divf %384, %385 : vector<2x32xf32>
    %c0_297 = arith.constant 0 : index
    %c0_298 = arith.constant 0 : index
    %387 = vector.load %arg12[%c0_297, %c0_298] : memref<2x32xf32, #tpu.memory_space<vmem>>, vector<2x32xf32>
    %388 = arith.mulf %380, %387 : vector<2x32xf32>
    %389 = arith.mulf %375, %381 : vector<2x32xf32>
    %390 = arith.addf %388, %389 : vector<2x32xf32>
    %391 = math.tanh %390 : vector<2x32xf32>
    %392 = arith.mulf %386, %391 : vector<2x32xf32>
    %c0_299 = arith.constant 0 : index
    %c0_300 = arith.constant 0 : index
    %393 = vector.load %arg12[%c0_299, %c0_300] : memref<2x32xf32, #tpu.memory_space<vmem>>, vector<2x32xf32>
    tpu.vector_store %arg12[%c0_299, %c0_300], %390 {strides = array<i32>} : memref<2x32xf32, #tpu.memory_space<vmem>>, vector<2x32xf32>,
    %c0_301 = arith.constant 0 : index
    %c0_302 = arith.constant 0 : index
    %394 = vector.load %arg11[%c0_301, %c0_302] : memref<2x32xf32, #tpu.memory_space<vmem>>, vector<2x32xf32>
    tpu.vector_store %arg11[%c0_301, %c0_302], %392 {strides = array<i32>} : memref<2x32xf32, #tpu.memory_space<vmem>>, vector<2x32xf32>,
    %c0_303 = arith.constant 0 : index
    %395 = arith.index_cast %341 : i32 to index
    %c0_304 = arith.constant 0 : index
    %c0_305 = arith.constant 0 : index
    %396 = vector.load %arg5[%c0_303, %395, %c0_304, %c0_305] : memref<1x8x2x32xf32, #tpu.memory_space<vmem>>, vector<1x1x2x32xf32>
    %397 = vector.shape_cast %396 : vector<1x1x2x32xf32> to vector<2x32xf32>
    %398 = vector.shape_cast %392 : vector<2x32xf32> to vector<1x1x2x32xf32>
    tpu.vector_store %arg5[%c0_303, %395, %c0_304, %c0_305], %398 {strides = array<i32>} : memref<1x8x2x32xf32, #tpu.memory_space<vmem>>, vector<1x1x2x32xf32>,
    %c6_i32 = arith.constant 6 : i32
    %399 = arith.muli %44, %c6_i32 : i32
    %400 = arith.addi %42, %399 : i32
    %c0_306 = arith.constant 0 : index
    %c0_307 = arith.constant 0 : index
    %401 = vector.load %arg11[%c0_306, %c0_307] : memref<2x32xf32, #tpu.memory_space<vmem>>, vector<2x32xf32>
    %402 = arith.index_cast %400 : i32 to index
    %c0_308 = arith.constant 0 : index
    %c0_309 = arith.constant 0 : index
    %403 = vector.load %arg7[%402, %c0_308, %c0_309] : memref<8x2x32xf32, #tpu.memory_space<vmem>>, vector<1x2x32xf32>
    %404 = vector.shape_cast %403 : vector<1x2x32xf32> to vector<2x32xf32>
    %c0_310 = arith.constant 0 : index
    %c0_311 = arith.constant 0 : index
    %c0_312 = arith.constant 0 : index
    %c0_313 = arith.constant 0 : index
    %405 = vector.load %arg3[%c0_310, %c0_311, %c0_312, %c0_313] : memref<1x4x32x32xf32, #tpu.memory_space<vmem>>, vector<1x1x32x32xf32>
    %406 = vector.shape_cast %405 : vector<1x1x32x32xf32> to vector<32x32xf32>
    %cst_314 = arith.constant dense<0.000000e+00> : vector<2x32xf32>
    %407 = tpu.matmul %401, %406, %cst_314 {dimension_numbers = #tpu.dot_dimension_numbers<[1], [0], [0], [1], [0, 0, 1, 1], [], []>} : vector<2x32xf32>, vector<32x32xf32>, vector<2x32xf32> -> vector<2x32xf32>
    %408 = arith.addf %404, %407 : vector<2x32xf32>
    %409 = arith.index_cast %400 : i32 to index
    %c0_315 = arith.constant 0 : index
    %c0_316 = arith.constant 0 : index
    %410 = vector.load %arg8[%409, %c0_315, %c0_316] : memref<8x2x32xf32, #tpu.memory_space<vmem>>, vector<1x2x32xf32>
    %411 = vector.shape_cast %410 : vector<1x2x32xf32> to vector<2x32xf32>
    %c0_317 = arith.constant 0 : index
    %c1_318 = arith.constant 1 : index
    %c0_319 = arith.constant 0 : index
    %c0_320 = arith.constant 0 : index
    %412 = vector.load %arg3[%c0_317, %c1_318, %c0_319, %c0_320] : memref<1x4x32x32xf32, #tpu.memory_space<vmem>>, vector<1x1x32x32xf32>
    %413 = vector.shape_cast %412 : vector<1x1x32x32xf32> to vector<32x32xf32>
    %cst_321 = arith.constant dense<0.000000e+00> : vector<2x32xf32>
    %414 = tpu.matmul %401, %413, %cst_321 {dimension_numbers = #tpu.dot_dimension_numbers<[1], [0], [0], [1], [0, 0, 1, 1], [], []>} : vector<2x32xf32>, vector<32x32xf32>, vector<2x32xf32> -> vector<2x32xf32>
    %415 = arith.addf %411, %414 : vector<2x32xf32>
    %416 = arith.index_cast %400 : i32 to index
    %c0_322 = arith.constant 0 : index
    %c0_323 = arith.constant 0 : index
    %417 = vector.load %arg9[%416, %c0_322, %c0_323] : memref<8x2x32xf32, #tpu.memory_space<vmem>>, vector<1x2x32xf32>
    %418 = vector.shape_cast %417 : vector<1x2x32xf32> to vector<2x32xf32>
    %c0_324 = arith.constant 0 : index
    %c2_325 = arith.constant 2 : index
    %c0_326 = arith.constant 0 : index
    %c0_327 = arith.constant 0 : index
    %419 = vector.load %arg3[%c0_324, %c2_325, %c0_326, %c0_327] : memref<1x4x32x32xf32, #tpu.memory_space<vmem>>, vector<1x1x32x32xf32>
    %420 = vector.shape_cast %419 : vector<1x1x32x32xf32> to vector<32x32xf32>
    %cst_328 = arith.constant dense<0.000000e+00> : vector<2x32xf32>
    %421 = tpu.matmul %401, %420, %cst_328 {dimension_numbers = #tpu.dot_dimension_numbers<[1], [0], [0], [1], [0, 0, 1, 1], [], []>} : vector<2x32xf32>, vector<32x32xf32>, vector<2x32xf32> -> vector<2x32xf32>
    %422 = arith.addf %418, %421 : vector<2x32xf32>
    %423 = arith.index_cast %400 : i32 to index
    %c0_329 = arith.constant 0 : index
    %c0_330 = arith.constant 0 : index
    %424 = vector.load %arg10[%423, %c0_329, %c0_330] : memref<8x2x32xf32, #tpu.memory_space<vmem>>, vector<1x2x32xf32>
    %425 = vector.shape_cast %424 : vector<1x2x32xf32> to vector<2x32xf32>
    %c0_331 = arith.constant 0 : index
    %c3_332 = arith.constant 3 : index
    %c0_333 = arith.constant 0 : index
    %c0_334 = arith.constant 0 : index
    %426 = vector.load %arg3[%c0_331, %c3_332, %c0_333, %c0_334] : memref<1x4x32x32xf32, #tpu.memory_space<vmem>>, vector<1x1x32x32xf32>
    %427 = vector.shape_cast %426 : vector<1x1x32x32xf32> to vector<32x32xf32>
    %cst_335 = arith.constant dense<0.000000e+00> : vector<2x32xf32>
    %428 = tpu.matmul %401, %427, %cst_335 {dimension_numbers = #tpu.dot_dimension_numbers<[1], [0], [0], [1], [0, 0, 1, 1], [], []>} : vector<2x32xf32>, vector<32x32xf32>, vector<2x32xf32> -> vector<2x32xf32>
    %429 = arith.addf %425, %428 : vector<2x32xf32>
    %430 = arith.negf %408 : vector<2x32xf32>
    %431 = math.exp %430 : vector<2x32xf32>
    %cst_336 = arith.constant 1.000000e+00 : f32
    %432 = vector.broadcast %cst_336 : f32 to vector<2x32xf32>
    %433 = arith.addf %432, %431 : vector<2x32xf32>
    %434 = arith.divf %432, %433 : vector<2x32xf32>
    %435 = arith.negf %415 : vector<2x32xf32>
    %436 = math.exp %435 : vector<2x32xf32>
    %cst_337 = arith.constant 1.000000e+00 : f32
    %437 = vector.broadcast %cst_337 : f32 to vector<2x32xf32>
    %438 = arith.addf %437, %436 : vector<2x32xf32>
    %439 = arith.divf %437, %438 : vector<2x32xf32>
    %440 = math.tanh %422 : vector<2x32xf32>
    %441 = arith.negf %429 : vector<2x32xf32>
    %442 = math.exp %441 : vector<2x32xf32>
    %cst_338 = arith.constant 1.000000e+00 : f32
    %443 = vector.broadcast %cst_338 : f32 to vector<2x32xf32>
    %444 = arith.addf %443, %442 : vector<2x32xf32>
    %445 = arith.divf %443, %444 : vector<2x32xf32>
    %c0_339 = arith.constant 0 : index
    %c0_340 = arith.constant 0 : index
    %446 = vector.load %arg12[%c0_339, %c0_340] : memref<2x32xf32, #tpu.memory_space<vmem>>, vector<2x32xf32>
    %447 = arith.mulf %439, %446 : vector<2x32xf32>
    %448 = arith.mulf %434, %440 : vector<2x32xf32>
    %449 = arith.addf %447, %448 : vector<2x32xf32>
    %450 = math.tanh %449 : vector<2x32xf32>
    %451 = arith.mulf %445, %450 : vector<2x32xf32>
    %c0_341 = arith.constant 0 : index
    %c0_342 = arith.constant 0 : index
    %452 = vector.load %arg12[%c0_341, %c0_342] : memref<2x32xf32, #tpu.memory_space<vmem>>, vector<2x32xf32>
    tpu.vector_store %arg12[%c0_341, %c0_342], %449 {strides = array<i32>} : memref<2x32xf32, #tpu.memory_space<vmem>>, vector<2x32xf32>,
    %c0_343 = arith.constant 0 : index
    %c0_344 = arith.constant 0 : index
    %453 = vector.load %arg11[%c0_343, %c0_344] : memref<2x32xf32, #tpu.memory_space<vmem>>, vector<2x32xf32>
    tpu.vector_store %arg11[%c0_343, %c0_344], %451 {strides = array<i32>} : memref<2x32xf32, #tpu.memory_space<vmem>>, vector<2x32xf32>,
    %c0_345 = arith.constant 0 : index
    %454 = arith.index_cast %400 : i32 to index
    %c0_346 = arith.constant 0 : index
    %c0_347 = arith.constant 0 : index
    %455 = vector.load %arg5[%c0_345, %454, %c0_346, %c0_347] : memref<1x8x2x32xf32, #tpu.memory_space<vmem>>, vector<1x1x2x32xf32>
    %456 = vector.shape_cast %455 : vector<1x1x2x32xf32> to vector<2x32xf32>
    %457 = vector.shape_cast %451 : vector<2x32xf32> to vector<1x1x2x32xf32>
    tpu.vector_store %arg5[%c0_345, %454, %c0_346, %c0_347], %457 {strides = array<i32>} : memref<1x8x2x32xf32, #tpu.memory_space<vmem>>, vector<1x1x2x32xf32>,
    %c7_i32_348 = arith.constant 7 : i32
    %458 = arith.muli %44, %c7_i32_348 : i32
    %459 = arith.addi %42, %458 : i32
    %c0_349 = arith.constant 0 : index
    %c0_350 = arith.constant 0 : index
    %460 = vector.load %arg11[%c0_349, %c0_350] : memref<2x32xf32, #tpu.memory_space<vmem>>, vector<2x32xf32>
    %461 = arith.index_cast %459 : i32 to index
    %c0_351 = arith.constant 0 : index
    %c0_352 = arith.constant 0 : index
    %462 = vector.load %arg7[%461, %c0_351, %c0_352] : memref<8x2x32xf32, #tpu.memory_space<vmem>>, vector<1x2x32xf32>
    %463 = vector.shape_cast %462 : vector<1x2x32xf32> to vector<2x32xf32>
    %c0_353 = arith.constant 0 : index
    %c0_354 = arith.constant 0 : index
    %c0_355 = arith.constant 0 : index
    %c0_356 = arith.constant 0 : index
    %464 = vector.load %arg3[%c0_353, %c0_354, %c0_355, %c0_356] : memref<1x4x32x32xf32, #tpu.memory_space<vmem>>, vector<1x1x32x32xf32>
    %465 = vector.shape_cast %464 : vector<1x1x32x32xf32> to vector<32x32xf32>
    %cst_357 = arith.constant dense<0.000000e+00> : vector<2x32xf32>
    %466 = tpu.matmul %460, %465, %cst_357 {dimension_numbers = #tpu.dot_dimension_numbers<[1], [0], [0], [1], [0, 0, 1, 1], [], []>} : vector<2x32xf32>, vector<32x32xf32>, vector<2x32xf32> -> vector<2x32xf32>
    %467 = arith.addf %463, %466 : vector<2x32xf32>
    %468 = arith.index_cast %459 : i32 to index
    %c0_358 = arith.constant 0 : index
    %c0_359 = arith.constant 0 : index
    %469 = vector.load %arg8[%468, %c0_358, %c0_359] : memref<8x2x32xf32, #tpu.memory_space<vmem>>, vector<1x2x32xf32>
    %470 = vector.shape_cast %469 : vector<1x2x32xf32> to vector<2x32xf32>
    %c0_360 = arith.constant 0 : index
    %c1_361 = arith.constant 1 : index
    %c0_362 = arith.constant 0 : index
    %c0_363 = arith.constant 0 : index
    %471 = vector.load %arg3[%c0_360, %c1_361, %c0_362, %c0_363] : memref<1x4x32x32xf32, #tpu.memory_space<vmem>>, vector<1x1x32x32xf32>
    %472 = vector.shape_cast %471 : vector<1x1x32x32xf32> to vector<32x32xf32>
    %cst_364 = arith.constant dense<0.000000e+00> : vector<2x32xf32>
    %473 = tpu.matmul %460, %472, %cst_364 {dimension_numbers = #tpu.dot_dimension_numbers<[1], [0], [0], [1], [0, 0, 1, 1], [], []>} : vector<2x32xf32>, vector<32x32xf32>, vector<2x32xf32> -> vector<2x32xf32>
    %474 = arith.addf %470, %473 : vector<2x32xf32>
    %475 = arith.index_cast %459 : i32 to index
    %c0_365 = arith.constant 0 : index
    %c0_366 = arith.constant 0 : index
    %476 = vector.load %arg9[%475, %c0_365, %c0_366] : memref<8x2x32xf32, #tpu.memory_space<vmem>>, vector<1x2x32xf32>
    %477 = vector.shape_cast %476 : vector<1x2x32xf32> to vector<2x32xf32>
    %c0_367 = arith.constant 0 : index
    %c2_368 = arith.constant 2 : index
    %c0_369 = arith.constant 0 : index
    %c0_370 = arith.constant 0 : index
    %478 = vector.load %arg3[%c0_367, %c2_368, %c0_369, %c0_370] : memref<1x4x32x32xf32, #tpu.memory_space<vmem>>, vector<1x1x32x32xf32>
    %479 = vector.shape_cast %478 : vector<1x1x32x32xf32> to vector<32x32xf32>
    %cst_371 = arith.constant dense<0.000000e+00> : vector<2x32xf32>
    %480 = tpu.matmul %460, %479, %cst_371 {dimension_numbers = #tpu.dot_dimension_numbers<[1], [0], [0], [1], [0, 0, 1, 1], [], []>} : vector<2x32xf32>, vector<32x32xf32>, vector<2x32xf32> -> vector<2x32xf32>
    %481 = arith.addf %477, %480 : vector<2x32xf32>
    %482 = arith.index_cast %459 : i32 to index
    %c0_372 = arith.constant 0 : index
    %c0_373 = arith.constant 0 : index
    %483 = vector.load %arg10[%482, %c0_372, %c0_373] : memref<8x2x32xf32, #tpu.memory_space<vmem>>, vector<1x2x32xf32>
    %484 = vector.shape_cast %483 : vector<1x2x32xf32> to vector<2x32xf32>
    %c0_374 = arith.constant 0 : index
    %c3_375 = arith.constant 3 : index
    %c0_376 = arith.constant 0 : index
    %c0_377 = arith.constant 0 : index
    %485 = vector.load %arg3[%c0_374, %c3_375, %c0_376, %c0_377] : memref<1x4x32x32xf32, #tpu.memory_space<vmem>>, vector<1x1x32x32xf32>
    %486 = vector.shape_cast %485 : vector<1x1x32x32xf32> to vector<32x32xf32>
    %cst_378 = arith.constant dense<0.000000e+00> : vector<2x32xf32>
    %487 = tpu.matmul %460, %486, %cst_378 {dimension_numbers = #tpu.dot_dimension_numbers<[1], [0], [0], [1], [0, 0, 1, 1], [], []>} : vector<2x32xf32>, vector<32x32xf32>, vector<2x32xf32> -> vector<2x32xf32>
    %488 = arith.addf %484, %487 : vector<2x32xf32>
    %489 = arith.negf %467 : vector<2x32xf32>
    %490 = math.exp %489 : vector<2x32xf32>
    %cst_379 = arith.constant 1.000000e+00 : f32
    %491 = vector.broadcast %cst_379 : f32 to vector<2x32xf32>
    %492 = arith.addf %491, %490 : vector<2x32xf32>
    %493 = arith.divf %491, %492 : vector<2x32xf32>
    %494 = arith.negf %474 : vector<2x32xf32>
    %495 = math.exp %494 : vector<2x32xf32>
    %cst_380 = arith.constant 1.000000e+00 : f32
    %496 = vector.broadcast %cst_380 : f32 to vector<2x32xf32>
    %497 = arith.addf %496, %495 : vector<2x32xf32>
    %498 = arith.divf %496, %497 : vector<2x32xf32>
    %499 = math.tanh %481 : vector<2x32xf32>
    %500 = arith.negf %488 : vector<2x32xf32>
    %501 = math.exp %500 : vector<2x32xf32>
    %cst_381 = arith.constant 1.000000e+00 : f32
    %502 = vector.broadcast %cst_381 : f32 to vector<2x32xf32>
    %503 = arith.addf %502, %501 : vector<2x32xf32>
    %504 = arith.divf %502, %503 : vector<2x32xf32>
    %c0_382 = arith.constant 0 : index
    %c0_383 = arith.constant 0 : index
    %505 = vector.load %arg12[%c0_382, %c0_383] : memref<2x32xf32, #tpu.memory_space<vmem>>, vector<2x32xf32>
    %506 = arith.mulf %498, %505 : vector<2x32xf32>
    %507 = arith.mulf %493, %499 : vector<2x32xf32>
    %508 = arith.addf %506, %507 : vector<2x32xf32>
    %509 = math.tanh %508 : vector<2x32xf32>
    %510 = arith.mulf %504, %509 : vector<2x32xf32>
    %c0_384 = arith.constant 0 : index
    %c0_385 = arith.constant 0 : index
    %511 = vector.load %arg12[%c0_384, %c0_385] : memref<2x32xf32, #tpu.memory_space<vmem>>, vector<2x32xf32>
    tpu.vector_store %arg12[%c0_384, %c0_385], %508 {strides = array<i32>} : memref<2x32xf32, #tpu.memory_space<vmem>>, vector<2x32xf32>,
    %c0_386 = arith.constant 0 : index
    %c0_387 = arith.constant 0 : index
    %512 = vector.load %arg11[%c0_386, %c0_387] : memref<2x32xf32, #tpu.memory_space<vmem>>, vector<2x32xf32>
    tpu.vector_store %arg11[%c0_386, %c0_387], %510 {strides = array<i32>} : memref<2x32xf32, #tpu.memory_space<vmem>>, vector<2x32xf32>,
    %c0_388 = arith.constant 0 : index
    %513 = arith.index_cast %459 : i32 to index
    %c0_389 = arith.constant 0 : index
    %c0_390 = arith.constant 0 : index
    %514 = vector.load %arg5[%c0_388, %513, %c0_389, %c0_390] : memref<1x8x2x32xf32, #tpu.memory_space<vmem>>, vector<1x1x2x32xf32>
    %515 = vector.shape_cast %514 : vector<1x1x2x32xf32> to vector<2x32xf32>
    %516 = vector.shape_cast %510 : vector<2x32xf32> to vector<1x1x2x32xf32>
    tpu.vector_store %arg5[%c0_388, %513, %c0_389, %c0_390], %516 {strides = array<i32>} : memref<1x8x2x32xf32, #tpu.memory_space<vmem>>, vector<1x1x2x32xf32>,
    %c8_i32 = arith.constant 8 : i32
    %c0_391 = arith.constant 0 : index
    %c0_392 = arith.constant 0 : index
    %517 = vector.load %arg11[%c0_391, %c0_392] : memref<2x32xf32, #tpu.memory_space<vmem>>, vector<2x32xf32>
    %c0_393 = arith.constant 0 : index
    %c0_394 = arith.constant 0 : index
    %c0_395 = arith.constant 0 : index
    %518 = vector.load %arg6[%c0_393, %c0_394, %c0_395] : memref<1x2x32xf32, #tpu.memory_space<vmem>>, vector<1x2x32xf32>
    %519 = vector.shape_cast %518 : vector<1x2x32xf32> to vector<2x32xf32>
    %520 = vector.shape_cast %517 : vector<2x32xf32> to vector<1x2x32xf32>
    tpu.vector_store %arg6[%c0_393, %c0_394, %c0_395], %520 {strides = array<i32>} : memref<1x2x32xf32, #tpu.memory_space<vmem>>, vector<1x2x32xf32>,
    return
  }
  func.func @transform_0(%arg0: i32) -> (i32, i32, i32) {
    %c0_i32 = arith.constant 0 : i32
    %c0_i32_0 = arith.constant 0 : i32
    %c0_i32_1 = arith.constant 0 : i32
    %c0_i32_2 = arith.constant 0 : i32
    return %c0_i32, %c0_i32_0, %c0_i32_1 : i32, i32, i32
  }
  func.func @transform_1(%arg0: i32) -> (i32, i32, i32, i32) {
    %c0_i32 = arith.constant 0 : i32
    %c0_i32_0 = arith.constant 0 : i32
    %c0_i32_1 = arith.constant 0 : i32
    %c0_i32_2 = arith.constant 0 : i32
    return %arg0, %c0_i32, %c0_i32_0, %c0_i32_1 : i32, i32, i32, i32
  }
  func.func @transform_2(%arg0: i32) -> (i32, i32, i32, i32) {
    %c0_i32 = arith.constant 0 : i32
    %c0_i32_0 = arith.constant 0 : i32
    %c0_i32_1 = arith.constant 0 : i32
    %c0_i32_2 = arith.constant 0 : i32
    return %arg0, %c0_i32, %c0_i32_0, %c0_i32_1 : i32, i32, i32, i32
  }
  func.func @transform_3(%arg0: i32) -> (i32, i32, i32, i32) {
    %c0_i32 = arith.constant 0 : i32
    %c0_i32_0 = arith.constant 0 : i32
    %c0_i32_1 = arith.constant 0 : i32
    %c0_i32_2 = arith.constant 0 : i32
    return %arg0, %c0_i32, %c0_i32_0, %c0_i32_1 : i32, i32, i32, i32
  }
  func.func @transform_4(%arg0: i32) -> (i32, i32, i32, i32) {
    %c0_i32 = arith.constant 0 : i32
    %c0_i32_0 = arith.constant 0 : i32
    %c0_i32_1 = arith.constant 0 : i32
    %c0_i32_2 = arith.constant 0 : i32
    return %arg0, %c0_i32, %c0_i32_0, %c0_i32_1 : i32, i32, i32, i32
  }
  func.func @transform_5(%arg0: i32) -> (i32, i32, i32) {
    %c0_i32 = arith.constant 0 : i32
    %c0_i32_0 = arith.constant 0 : i32
    %c0_i32_1 = arith.constant 0 : i32
    return %arg0, %c0_i32, %c0_i32_0 : i32, i32, i32
  }
}

</mosaic_0001>

<bundles_post_ra>
// kernel: bert_multi_lstm_forward.5
= control target key start
LH: loop header
LB: loop body
LE: loop exit
PB: predicated region body
PF: predicated region fallthrough
CT: control target
= control target key end

     0   :  { %s153_s0 = inlined_call_operand.vmem [shape: f32[2,64], index: 0, kind: input, shape index: {}]   ;;  %s154_s1 = inlined_call_operand.vmem [shape: f32[64,16], index: 1, kind: input, shape index: {}]   ;;  %s155_s2 = inlined_call_operand.vmem [shape: f32[1,16], index: 2, kind: input, shape index: {}]   ;;  %s156_s3 = inlined_call_operand.hbm [shape: f32[2,16], index: 3, kind: output, shape index: {}]  }
   0x1   :  { %v23_v0 = vld [vmem:[%s154_s1 + $0x38] sm:$0xff]  ;;  %v22_v1 = vld [vmem:[%s154_s1 + $0x30] sm:$0xff]  ;;  %v21_v2 = vld [vmem:[%s154_s1 + $0x28] sm:$0xff] }
   0x2   :  { %40 = vmatpush.msra.mxu0 %v23_v0 }
   0x4   :  { %41 = vmatpush.msra.mxu0 %v22_v1 }
   0x5   :  { %8 = vsyncpa [#allocation3], 0  ;;  %v20_v3 = vld [vmem:[%s154_s1 + $0x20] sm:$0xff]  ;;  %v19_v4 = vld [vmem:[%s154_s1 + $0x18] sm:$0xff]  ;;  %vm28_vm0 = vcmask 523264   ;;  %s99_s5 = smov [#allocation2]  }
   0x6   :  { %42 = vmatpush.msra.mxu0 %v21_v2  ;;  %v18_v5 = vld [vmem:[%s154_s1 + $0x10] sm:$0xff]  ;;  %v17_v6 = vld [vmem:[%s154_s1 + $0x8] sm:$0xff]  ;;  %v16_v7 = vld [vmem:[%s154_s1] sm:$0xff]  ;;  %s59_s6 = sshll.u32 %s99_s5, 4  ;;  %s61_s9 = sshll.u32 %s156_s3, 4  ;;  %vm52_vm1 = vcmask 123904   ;;  %s60_s6 = int_to_ptr.vmem [resolvable:$true] %s59_s6  ;;  %s62_s9 = int_to_ptr.hbm [resolvable:$true] %s61_s9 }
   0x7   :  { %v15_v8 = vld [vmem:[%s153_s0] sm:$0x3] }
   0x8   :  { %43 = vmatpush.msra.mxu0 %v20_v3  ;;  %v72_v9 = vld [vmem:[%s155_s2] ss:$0 sm:$0xff] }
   0xa   :  { %44 = vmatpush.msra.mxu0 %v19_v4 }
   0xc   :  { %45 = vmatpush.msra.mxu0 %v18_v5 }
   0xe   :  { %46 = vmatpush.msra.mxu0 %v17_v6 }
  0x10   :  { %47 = vmatpush.msra.mxu0 %v16_v7 }
  0x11   :  { %70 = vmatmul.msk.f32.vlgmr.msra.gmra.mxu0 %vm28_vm0, %v15_v8 }
  0x8e   :  { %v49_v10 = vpop.f32.mrf.mxu0 }
  0x8f   :  { %v50_v11 = vadd.f32 %v72_v9, %v49_v10 }
  0x91   :  { %53 = vst.msk [vmem:[#allocation2] sm:$0x3] %vm52_vm1, %v50_v11 }
  0x92   :  { %64 = dma.vmem_to_hbm [thread:$0]  %s60_s6, 32, %s62_s9, [#allocation3]  }
  0x93   :  { %97 = dma.done.wait [#allocation3], 32  }
  0x94   :  { %98 = vsyncadd [#allocation3], 4294967264 }
  0x95   :  { %69 = vsyncpa [#allocation3], 1 }

// kernel: bert_multi_lstm_forward.4
= control target key start
LH: loop header
LB: loop body
LE: loop exit
PB: predicated region body
PF: predicated region fallthrough
CT: control target
= control target key end

     0   :  { %s3633_s0 = inlined_call_operand.vmem [shape: f32[8,2,32], index: 0, kind: input, shape index: {}]   ;;  %s3634_s1 = inlined_call_operand.vmem [shape: f32[2,4,32,32], index: 1, kind: input, shape index: {}]   ;;  %s3635_s2 = inlined_call_operand.hbm [shape: f32[2,4,32,32], index: 2, kind: input, shape index: {}]   ;;  %s3636_s3 = inlined_call_operand.vmem [shape: f32[2,4,1,32], index: 3, kind: input, shape index: {}]   ;;  %s3637_s4 = inlined_call_operand.hbm [shape: f32[2,8,2,32], index: 4, kind: output, shape index: {0}]   ;;  %s3638_s5 = inlined_call_operand.vmem [shape: f32[2,2,32], index: 5, kind: output, shape index: {1}]  }
   0x1   :  { %3639 = sst [smem:[#allocation14_spill]] %s3633_s0 }
   0x2   :  { %11 = vsyncpa [#allocation9], 0 }
   0x3   :  { %13 = vsyncpa [#allocation9 + $0x1], 0 }
   0x4   :  { %14 = vsyncpa [#allocation10], 0 }
   0x5   :  { %16 = vsyncpa [#allocation10 + $0x1], 0  ;;  %s2931_s18 = smov 0   ;;  %s2933_s19 = smov 0  }
   0x6   :  { %s2935_s20 = smov 0   ;;  %s2937_s21 = smov 0  }
   0x7 LB: > { %s2952_s22 = sadd.s32 4294967295, %s2894_s21   ;;  %s2408_s23 = sadd.s32 4294967294, %s2894_s21   ;;  %s2894_s21 = sphi %s2937_s21, %s3650_s21   ;;  %s2890_s20 = sphi %s2935_s20, %s3649_s20   ;;  %s2886_s19 = sphi %s2933_s19, %s3648_s19   ;;  %s2882_s18 = sphi %s2931_s18, %s3647_s18  }
   0x8   : > { %s2956_s24 = sadd.s32 1, %s2894_s21   ;;  %s76_s25 = sadd.s32 1, %s2890_s20 }
   0x9   : > { %s73_s26 = ssub.s32 %s2894_s21, %s2956_s24  ;;  %p83_p0 = scmp.ne.s32.totalorder %s2890_s20, %s2886_s19 }
   0xa   : > { %p74_p1 = scmp.eq.s32.totalorder %s73_s26, 0  ;;  %p84_p2 = scmp.eq.s32.totalorder %s2894_s21, 0 }
   0xb   : > { %p89_p3 = scmp.ne.s32.totalorder %s2886_s19, %s2882_s18  ;;  %p90_p4 = scmp.eq.s32.totalorder %s2952_s22, 0 }
   0xc   : > { %s2968_s27 = scalar_select %p74_p1, %s2890_s20, %s76_s25  }
   0xd   : > { %p2970_p5 = por %p84_p2, %p83_p0  ;;  %p2974_p6 = por %p90_p4, %p89_p3 }
   0xe   : > { %p139_p7 = scmp.eq.s32.totalorder %s2952_s22, 1  ;;  %p145_p8 = scmp.eq.s32.totalorder %s2408_s23, 1 }
   0xf   : > { %p2627_p10 = scmp.lt.s32.totalorder %s2894_s21, 2  ;;  %s202_s7 = sand.u32 1, %s2890_s20  }
  0x10   : > { %p2981_p11 = por %p139_p7, %p83_p0  ;;  %p2985_p12 = por %p145_p8, %p89_p3 }
  0x11   : > { %s2612_s8 = sshll.u32 %s2894_s21, 7  ;;  %s2411_s9 = sshll.u32 %s202_s7, 7 }
  0x12   : > { %s211_s12 = scalar_lea.hbm %s3635_s2, %s2612_s8  ;;  %s206_s14 = scalar_lea.vmem [#allocation8], %s2411_s9 }
  0x13   : > { %s212_s13 = sshll.u32 %s211_s12, 4  ;;  %s214_s15 = sshll.u32 %s206_s14, 4  ;;  %s213_s13 = int_to_ptr.hbm [resolvable:$true] %s212_s13  ;;  %s215_s15 = int_to_ptr.vmem [resolvable:$true] %s214_s15 }
  0x14   : > { %p2996_p13 = pnand %p2627_p10, %p2970_p5  ;;  %p2414_p0 = scmp.ge.s32.totalorder %s2894_s21, 1 }
  0x15   : > { %p229_p1 = scmp.lt.s32.totalorder %s2894_s21, 3  ;;  %s203_s17 = scalar_lea.sflag [#allocation9], %s202_s7 }
  0x16   : > { %s2798_s23 = sshra.s32 %s213_s13, 4  ;;  %p2802_p3 = pneg %p2996_p13  ;;  %s2799_s23 = int_to_ptr.hbm [resolvable:$true] %s2798_s23 }
  0x17   : > { %s2800_s25 = scalar_lea.hbm %s2799_s23, 128  ;;  %s2805_s28 = scalar_lea.hbm %s3635_s2, 256 }
  0x18   : > { %p2801_p2 = scmp.ne.s32.totalorder %s2799_s23, %s2800_s25  ;;  %p2806_p5 = scmp.lt.s32.totalorder %s2799_s23, %s3635_s2 }
  0x19   : > { %p2807_p8 = scmp.lt.s32.totalorder %s2805_s28, %s2800_s25 }
  0x1a   : > { %p2803_p4 = pnand %p2802_p3, %p2801_p2 }
  0x1b   : > { %p2808_p10 = por %p2807_p8, %p2806_p5 }
  0x1c   : > { %p2804_p7 = pneg %p2803_p4 }
  0x1e   : > { %p2809_p9 = pnand %p2808_p10, %p2804_p7 }
  0x20   : > { %2812 = shalt.err (!%p2809_p9)
}
  0x21   : > { %s2896_s7 = smov 128   ;;  %s2897_s11 = smov 8  }
  0x22   : > { %2622 = dma.hbm_to_vmem [thread:$0]  (!%p2996_p13), %s213_s13, 2048, %s215_s15, %s203_s17, %s2896_s7, %s2896_s7, %s2897_s11  }
  0x23   : > { %p230_p2 = pnand %p2414_p0, %p229_p1 }
  0x24   : > { %s3017_s12 = sand.u32 (!%p230_p2), 1, %s2886_s19  }
  0x25   : > { %233 = sbr.rel (%p230_p2) target bundleno = 1537 (0x601), region = 36  ;;  %s2415_s14 = sshll.u32 (!%p230_p2), %s3017_s12, 7 }
  0x26   : > { %s236_s23 = scalar_lea.sflag (!%p230_p2), [#allocation9], %s3017_s12  ;;  %s3021_s25 = scalar_lea.vmem (!%p230_p2), [#allocation8], %s2415_s14 }
  0x2a   : > { %2873 = dma.done.wait (%p2974_p6), %s236_s23, 2048  }
  0x2b   : > { %2875 = vsyncadd (%p2974_p6), %s236_s23, 4294965248  ;;  %p280_p9 = scmp.lt.s32.totalorder %s2952_s22, 1  ;;  %s3645_s0 = sld [smem:[#allocation14_spill]]  ;;  %vm376_vm0 = vcmask 254976   ;;  %v3096_v19 = vld [vmem:[%s3021_s25 + $0x18] sm:$0xff]  ;;  %v3099_v20 = vld [vmem:[%s3021_s25 + $0x10] sm:$0xff] }
  0x2c   : > { %vm334_vm1 = vcmask 261120   ;;  %v3108_v24 = vld [vmem:[%s3021_s25 + $0x8] sm:$0xff]  ;;  %v3111_v25 = vld [vmem:[%s3021_s25] sm:$0xff]  ;;  %v3114_v26 = vld [vmem:[%s3021_s25 + $0x38] sm:$0xff]  ;;  %v2898_v27 = vmov 0.0  }
  0x2d   : > { %s3029_s13 = scalar_select %p280_p9, %s2952_s22, 1  ;;  %613 = vst.msk [vmem:[#allocation6] sm:$0x3] %vm376_vm0, %v2898_v27  ;;  %v3127_v29 = vld [vmem:[%s3021_s25 + $0x30] sm:$0xff]  ;;  %v3139_v32 = vld [vmem:[%s3021_s25 + $0x28] sm:$0xff]  ;;  %v3142_v33 = vld [vmem:[%s3021_s25 + $0x78] sm:$0xff] }
  0x2e   : > { %614 = vst.msk [vmem:[#allocation7] sm:$0x3] %vm376_vm0, %v2898_v27  ;;  %v3146_v34 = vld [vmem:[%s3021_s25 + $0x20] sm:$0xff]  ;;  %v3149_v35 = vld [vmem:[%s3021_s25 + $0x58] sm:$0xff]  ;;  %v3156_v37 = vld [vmem:[%s3021_s25 + $0x50] sm:$0xff] }
  0x2f   : > { %s2613_s15 = sshll.u32 %s3029_s13, 7  ;;  %s2419_s10 = sshll.u32 %s3029_s13, 2  ;;  %v3169_v38 = vld [vmem:[%s3021_s25 + $0x70] sm:$0xff]  ;;  %v3172_v39 = vld [vmem:[%s3021_s25 + $0x48] sm:$0xff]  ;;  %v3175_v40 = vld [vmem:[%s3021_s25 + $0x40] sm:$0xff] }
  0x30   : > { %s3035_s26 = scalar_lea.vmem %s3634_s1, %s2613_s15  ;;  %s3121_s23 = scalar_lea.vmem %s3636_s3, %s2419_s10  ;;  %v3181_v42 = vld [vmem:[%s3021_s25 + $0x68] sm:$0xff]  ;;  %v3186_v43 = vld [vmem:[%s3021_s25 + $0x60] sm:$0xff] }
  0x31   : > { %v304_v0 = vld [vmem:[%s3035_s26 + $0x18] sm:$0xff]  ;;  %v303_v1 = vld [vmem:[%s3035_s26 + $0x10] sm:$0xff]  ;;  %v302_v2 = vld [vmem:[%s3035_s26 + $0x8] sm:$0xff]  ;;  %s3235_s15 = smul.u32 7, %s2952_s22 }
  0x32   : > { %351 = vmatpush.msra.mxu0 %v304_v0  ;;  %v3043_v3 = vld [vmem:[%s3645_s0] sm:$0x3]  ;;  %v3048_v4 = vld [vmem:[%s3645_s0 + $0x2] sm:$0x3]  ;;  %v3054_v5 = vld [vmem:[%s3645_s0 + $0x4] sm:$0x3] }
  0x33   : > { %v3059_v6 = vld [vmem:[%s3645_s0 + $0x6] sm:$0x3]  ;;  %317 = vst [vmem:[#allocation1] ss:$4 sm:$0xff] %v3043_v3  ;;  %v2426_v8 = vld [vmem:[%s3035_s26 + $0x38] sm:$0xff]  ;;  %v2425_v9 = vld [vmem:[%s3035_s26 + $0x30] sm:$0xff] }
  0x34   : > { %352 = vmatpush.msra.mxu0 %v303_v1  ;;  %v301_v7 = vld [vmem:[%s3035_s26] sm:$0xff]  ;;  %319 = vst [vmem:[#allocation1 + $0x1] ss:$4 sm:$0xff] %v3048_v4  ;;  %428 = vmatpush.msra.mxu1 %v2426_v8  ;;  %v2424_v10 = vld [vmem:[%s3035_s26 + $0x28] sm:$0xff]  ;;  %v2433_v12 = vld [vmem:[%s3035_s26 + $0x58] sm:$0xff] }
  0x35   : > { %321 = vst [vmem:[#allocation1 + $0x2] ss:$4 sm:$0xff] %v3054_v5  ;;  %v3071_v11 = vld [vmem:[%s3645_s0 + $0x8] sm:$0x3]  ;;  %v3078_v13 = vld [vmem:[%s3645_s0 + $0xa] sm:$0x3]  ;;  %504 = vmatpush.msra.mxu2 %v2433_v12 }
  0x36   : > { %353 = vmatpush.msra.mxu0 %v302_v2  ;;  %323 = vst [vmem:[#allocation1 + $0x3] ss:$4 sm:$0xff] %v3059_v6  ;;  %v3083_v14 = vld [vmem:[%s3645_s0 + $0xc] sm:$0x3]  ;;  %429 = vmatpush.msra.mxu1 %v2425_v9  ;;  %v3088_v15 = vld [vmem:[%s3645_s0 + $0xe] sm:$0x3] }
  0x37   : > { %325 = vst [vmem:[#allocation1 + $0x20] ss:$4 sm:$0xff] %v3071_v11  ;;  %v2432_v16 = vld [vmem:[%s3035_s26 + $0x50] sm:$0xff]  ;;  %v2431_v17 = vld [vmem:[%s3035_s26 + $0x48] sm:$0xff]  ;;  %v2423_v18 = vld [vmem:[%s3035_s26 + $0x20] sm:$0xff] }
  0x38   : > { %354 = vmatpush.msra.mxu0 %v301_v7  ;;  %327 = vst [vmem:[#allocation1 + $0x21] ss:$4 sm:$0xff] %v3078_v13  ;;  %505 = vmatpush.msra.mxu2 %v2432_v16  ;;  %v2430_v21 = vld [vmem:[%s3035_s26 + $0x40] sm:$0xff]  ;;  %v2440_v22 = vld [vmem:[%s3035_s26 + $0x78] sm:$0xff]  ;;  %v2439_v23 = vld [vmem:[%s3035_s26 + $0x70] sm:$0xff] }
  0x39   : > { %430 = vmatpush.msra.mxu1 %v2424_v10  ;;  %329 = vst [vmem:[#allocation1 + $0x22] ss:$4 sm:$0xff] %v3083_v14  ;;  %580 = vmatpush.msra.mxu3 %v2440_v22  ;;  %v2438_v28 = vld [vmem:[%s3035_s26 + $0x68] sm:$0xff]  ;;  %v2437_v31 = vld [vmem:[%s3035_s26 + $0x60] sm:$0xff]  ;;  %s2444_s26 = sshll.u32 %s2952_s22, 1 }
  0x3a   : > { %641 = vmatpush.msrb.mxu0 %v3096_v19  ;;  %331 = vst [vmem:[#allocation1 + $0x23] ss:$4 sm:$0xff] %v3088_v15  ;;  %506 = vmatpush.msra.mxu2 %v2431_v17  ;;  %v3192_v44 = vld [vmem:[#allocation6] sm:$0x3]  ;;  %s3230_s10 = ssub.s32 1, %s2444_s26 }
  0x3b   : > { %431 = vmatpush.msra.mxu1 %v2423_v18  ;;  %581 = vmatpush.msra.mxu3 %v2439_v23  ;;  %s2485_s16 = sshll.u32 %s3230_s10, 1  ;;  %s1167_s29 = smul.u32 3, %s3230_s10  ;;  %v2666_v50 = vld [vmem:[%s3121_s23] ss:$0 sm:$0xff]  ;;  %v2667_v57 = vld [vmem:[%s3121_s23 + $0x1] ss:$0 sm:$0xff] }
  0x3c   : > { %642 = vmatpush.msrb.mxu0 %v3099_v20  ;;  %507 = vmatpush.msra.mxu2 %v2430_v21  ;;  %s3242_s17 = sadd.s32 %s2485_s16, %s3235_s15  ;;  %s2526_s28 = sshll.u32 %s3230_s10, 2 }
  0x3d   : > { %v332_v30 = vld.sshfl [vmem:[#allocation1] sm:$0xff pattern:$0x73625140]  ;;  %669 = vmatpush.msrb.mxu1 %v3114_v26  ;;  %582 = vmatpush.msra.mxu3 %v2438_v28  ;;  %s3251_s8 = sadd.s32 %s1167_s29, %s3235_s15  ;;  %s3257_s9 = sadd.s32 %s2526_s28, %s3235_s15 }
  0x3e   : > { %643 = vmatpush.msrb.mxu0 %v3108_v24  ;;  %395 = vst [vmem:[#allocation1] ss:$4 sm:$0xff] %v3043_v3  ;;  %697 = vmatpush.msrb.mxu2 %v3149_v35  ;;  %s1533_s7 = smul.u32 5, %s3230_s10 }
  0x3f   : > { %2421 = vmatmul.msk.f32.vlgmr.msra.gmra.mxu0 %vm334_vm1, %v332_v30  ;;  %397 = vst [vmem:[#allocation1 + $0x1] ss:$4 sm:$0xff] %v3048_v4  ;;  %670 = vmatpush.msrb.mxu1 %v3127_v29  ;;  %s1716_s14 = smul.u32 6, %s3230_s10 }
  0x40   : > { %644 = vmatpush.msrb.mxu0 %v3111_v25  ;;  %399 = vst [vmem:[#allocation1 + $0x2] ss:$4 sm:$0xff] %v3054_v5  ;;  %583 = vmatpush.msra.mxu3 %v2437_v31  ;;  %s3263_s11 = sadd.s32 %s1533_s7, %s3235_s15  ;;  %s1899_s26 = smul.u32 7, %s3230_s10  ;;  %v2669_v31 = vld [vmem:[%s3121_s23 + $0x3] ss:$0 sm:$0xff] }
  0x41   : > { %401 = vst [vmem:[#allocation1 + $0x3] ss:$4 sm:$0xff] %v3059_v6  ;;  %v333_v36 = vld.sshfl [vmem:[#allocation1 + $0x20] sm:$0xff pattern:$0x73625140]  ;;  %671 = vmatpush.msrb.mxu1 %v3139_v32  ;;  %698 = vmatpush.msrb.mxu2 %v3156_v37  ;;  %s3268_s16 = sadd.s32 %s1716_s14, %s3235_s15  ;;  %s3291_s28 = smul.u32 14, %s2952_s22 }
  0x42   : > { %826 = vmatpush.msra.mxu0 %v3096_v19  ;;  %725 = vmatpush.msrb.mxu3 %v3142_v33  ;;  %403 = vst [vmem:[#allocation1 + $0x20] ss:$4 sm:$0xff] %v3071_v11  ;;  %s3271_s29 = sadd.s32 %s1899_s26, %s3235_s15 }
  0x43   : > { %405 = vst [vmem:[#allocation1 + $0x21] ss:$4 sm:$0xff] %v3078_v13  ;;  %672 = vmatpush.msrb.mxu1 %v3146_v34  ;;  %699 = vmatpush.msrb.mxu2 %v3172_v39  ;;  %s620_s7 = scalar_lea.vmem [#allocation2], %s3291_s28  ;;  %s650_s14 = scalar_lea.vmem [#allocation3], %s3291_s28 }
  0x44   : > { %827 = vmatpush.msra.mxu0 %v3099_v20  ;;  %407 = vst [vmem:[#allocation1 + $0x22] ss:$4 sm:$0xff] %v3083_v14  ;;  %726 = vmatpush.msrb.mxu3 %v3169_v38  ;;  %s706_s26 = scalar_lea.vmem [#allocation5], %s3291_s28 }
  0x45   : > { %409 = vst [vmem:[#allocation1 + $0x23] ss:$4 sm:$0xff] %v3088_v15  ;;  %700 = vmatpush.msrb.mxu2 %v3175_v40 }
  0x46   : > { %828 = vmatpush.msra.mxu0 %v3108_v24  ;;  %727 = vmatpush.msrb.mxu3 %v3181_v42 }
  0x47   : > { %2422 = vmatmul.msk.f32.gmra.mxu0 %vm334_vm1, %v333_v36 }
  0x48   : > { %829 = vmatpush.msra.mxu0 %v3111_v25  ;;  %v410_v41 = vld.sshfl [vmem:[#allocation1] sm:$0xff pattern:$0x73625140]  ;;  %728 = vmatpush.msrb.mxu3 %v3186_v43 }
  0x49   : > { %2428 = vmatmul.msk.f32.vlgmr.msra.gmra.mxu1 %vm334_vm1, %v410_v41  ;;  %471 = vst [vmem:[#allocation1] ss:$4 sm:$0xff] %v3043_v3 }
  0x4a   : > { %473 = vst [vmem:[#allocation1 + $0x1] ss:$4 sm:$0xff] %v3048_v4  ;;  %853 = vmatpush.msra.mxu1 %v3114_v26 }
  0x4b   : > { %475 = vst [vmem:[#allocation1 + $0x2] ss:$4 sm:$0xff] %v3054_v5 }
  0x4c   : > { %477 = vst [vmem:[#allocation1 + $0x3] ss:$4 sm:$0xff] %v3059_v6  ;;  %v411_v45 = vld.sshfl [vmem:[#allocation1 + $0x20] sm:$0xff pattern:$0x73625140]  ;;  %854 = vmatpush.msra.mxu1 %v3127_v29 }
  0x4d   : > { %479 = vst [vmem:[#allocation1 + $0x20] ss:$4 sm:$0xff] %v3071_v11 }
  0x4e   : > { %481 = vst [vmem:[#allocation1 + $0x21] ss:$4 sm:$0xff] %v3078_v13  ;;  %855 = vmatpush.msra.mxu1 %v3139_v32 }
  0x4f   : > { %2446 = vmatmul.msk.f32.vlgmr.msrb.gmra.mxu0 %vm334_vm1, %v3192_v44  ;;  %483 = vst [vmem:[#allocation1 + $0x22] ss:$4 sm:$0xff] %v3083_v14 }
  0x50   : > { %1009 = vmatpush.msrb.mxu0 %v3096_v19  ;;  %485 = vst [vmem:[#allocation1 + $0x23] ss:$4 sm:$0xff] %v3088_v15  ;;  %856 = vmatpush.msra.mxu1 %v3146_v34 }
  0x51   : > { %2429 = vmatmul.msk.f32.gmra.mxu1 %vm334_vm1, %v411_v45 }
  0x52   : > { %1010 = vmatpush.msrb.mxu0 %v3099_v20 }
  0x53   : > { %v486_v46 = vld.sshfl [vmem:[#allocation1] sm:$0xff pattern:$0x73625140] }
  0x54   : > { %1011 = vmatpush.msrb.mxu0 %v3108_v24  ;;  %2435 = vmatmul.msk.f32.vlgmr.msra.gmra.mxu2 %vm334_vm1, %v486_v46  ;;  %547 = vst [vmem:[#allocation1] ss:$4 sm:$0xff] %v3043_v3 }
  0x55   : > { %549 = vst [vmem:[#allocation1 + $0x1] ss:$4 sm:$0xff] %v3048_v4  ;;  %880 = vmatpush.msra.mxu2 %v3149_v35 }
  0x56   : > { %1012 = vmatpush.msrb.mxu0 %v3111_v25  ;;  %551 = vst [vmem:[#allocation1 + $0x2] ss:$4 sm:$0xff] %v3054_v5 }
  0x57   : > { %553 = vst [vmem:[#allocation1 + $0x3] ss:$4 sm:$0xff] %v3059_v6  ;;  %v487_v47 = vld.sshfl [vmem:[#allocation1 + $0x20] sm:$0xff pattern:$0x73625140]  ;;  %881 = vmatpush.msra.mxu2 %v3156_v37 }
  0x58   : > { %555 = vst [vmem:[#allocation1 + $0x20] ss:$4 sm:$0xff] %v3071_v11  ;;  %v2668_v11 = vld [vmem:[%s3121_s23 + $0x2] ss:$0 sm:$0xff]  ;;  %s678_s23 = scalar_lea.vmem [#allocation4], %s3291_s28 }
  0x59   : > { %557 = vst [vmem:[#allocation1 + $0x21] ss:$4 sm:$0xff] %v3078_v13  ;;  %2451 = vmatmul.msk.f32.vlgmr.msrb.gmra.mxu1 %vm334_vm1, %v3192_v44  ;;  %882 = vmatpush.msra.mxu2 %v3172_v39 }
  0x5a   : > { %559 = vst [vmem:[#allocation1 + $0x22] ss:$4 sm:$0xff] %v3083_v14  ;;  %1036 = vmatpush.msrb.mxu1 %v3114_v26 }
  0x5b   : > { %561 = vst [vmem:[#allocation1 + $0x23] ss:$4 sm:$0xff] %v3088_v15  ;;  %883 = vmatpush.msra.mxu2 %v3175_v40 }
  0x5c   : > { %2436 = vmatmul.msk.f32.gmra.mxu2 %vm334_vm1, %v487_v47  ;;  %1037 = vmatpush.msrb.mxu1 %v3127_v29 }
  0x5e   : > { %v562_v48 = vld.sshfl [vmem:[#allocation1] sm:$0xff pattern:$0x73625140]  ;;  %1038 = vmatpush.msrb.mxu1 %v3139_v32 }
  0x5f   : > { %2442 = vmatmul.msk.f32.vlgmr.msra.gmra.mxu3 %vm334_vm1, %v562_v48 }
  0x60   : > { %907 = vmatpush.msra.mxu3 %v3142_v33  ;;  %1039 = vmatpush.msrb.mxu1 %v3146_v34 }
  0x62   : > { %908 = vmatpush.msra.mxu3 %v3169_v38  ;;  %v563_v49 = vld.sshfl [vmem:[#allocation1 + $0x20] sm:$0xff pattern:$0x73625140] }
  0x64   : > { %2456 = vmatmul.msk.f32.vlgmr.msrb.gmra.mxu2 %vm334_vm1, %v3192_v44  ;;  %909 = vmatpush.msra.mxu3 %v3181_v42 }
  0x65   : > { %1063 = vmatpush.msrb.mxu2 %v3149_v35 }
  0x66   : > { %910 = vmatpush.msra.mxu3 %v3186_v43 }
  0x67   : > { %2443 = vmatmul.msk.f32.gmra.mxu3 %vm334_vm1, %v563_v49  ;;  %1064 = vmatpush.msrb.mxu2 %v3156_v37 }
  0x69   : > { %1065 = vmatpush.msrb.mxu2 %v3172_v39 }
  0x6b   : > { %1066 = vmatpush.msrb.mxu2 %v3175_v40 }
  0x6f   : > { %2461 = vmatmul.msk.f32.vlgmr.msrb.gmra.mxu3 %vm334_vm1, %v3192_v44 }
  0x70   : > { %1090 = vmatpush.msrb.mxu3 %v3142_v33 }
  0x72   : > { %1091 = vmatpush.msrb.mxu3 %v3169_v38 }
  0x74   : > { %1092 = vmatpush.msrb.mxu3 %v3181_v42 }
  0x76   : > { %1093 = vmatpush.msrb.mxu3 %v3186_v43 }
  0xbc   : > { %v356_v51 = vpop.f32.mrf.mxu0 }
  0xbd   : > { %v357_v52 = vadd.f32 %v2666_v50, %v356_v51 }
  0xbf   : > { %v364_v53 = vrot.slane %v357_v52, 2  ;;  %v365_v54 = vrot.slane %v357_v52, 4  ;;  %v366_v55 = vrot.slane %v357_v52, 6  ;;  %377 = vst.msk [vmem:[#allocation2] sm:$0x3] %vm376_vm0, %v357_v52 }
  0xc1   : > { %378 = vst.msk [vmem:[#allocation2 + $0x2] sm:$0x3] %vm376_vm0, %v364_v53 }
  0xc2   : > { %379 = vst.msk [vmem:[#allocation2 + $0x4] sm:$0x3] %vm376_vm0, %v365_v54 }
  0xc3   : > { %380 = vst.msk [vmem:[#allocation2 + $0x6] sm:$0x3] %vm376_vm0, %v366_v55 }
  0xc4   : > { %v359_v56 = vpop.f32.mrf.mxu0 }
  0xc5   : > { %v360_v58 = vadd.f32 %v2666_v50, %v359_v56 }
  0xc6   : > { %v433_v62 = vpop.f32.mrf.mxu1 }
  0xc7   : > { %v367_v59 = vrot.slane %v360_v58, 2  ;;  %v368_v60 = vrot.slane %v360_v58, 4  ;;  %v369_v61 = vrot.slane %v360_v58, 6  ;;  %381 = vst.msk [vmem:[#allocation2 + $0x8] sm:$0x3] %vm376_vm0, %v360_v58  ;;  %v434_v63 = vadd.f32 %v2667_v57, %v433_v62 }
  0xc9   : > { %382 = vst.msk [vmem:[#allocation2 + $0xa] sm:$0x3] %vm376_vm0, %v367_v59  ;;  %v441_v0 = vrot.slane %v434_v63, 2  ;;  %v442_v1 = vrot.slane %v434_v63, 4  ;;  %v443_v2 = vrot.slane %v434_v63, 6 }
  0xca   : > { %383 = vst.msk [vmem:[#allocation2 + $0xc] sm:$0x3] %vm376_vm0, %v368_v60 }
  0xcb   : > { %384 = vst.msk [vmem:[#allocation2 + $0xe] sm:$0x3] %vm376_vm0, %v369_v61 }
  0xcc   : > { %453 = vst.msk [vmem:[#allocation3] sm:$0x3] %vm376_vm0, %v434_v63  ;;  %v646_v5 = vpop.f32.mrf.mxu0 }
  0xcd   : > { %454 = vst.msk [vmem:[#allocation3 + $0x2] sm:$0x3] %vm376_vm0, %v441_v0 }
  0xce   : > { %455 = vst.msk [vmem:[#allocation3 + $0x4] sm:$0x3] %vm376_vm0, %v442_v1  ;;  %v436_v3 = vpop.f32.mrf.mxu1 }
  0xcf   : > { %456 = vst.msk [vmem:[#allocation3 + $0x6] sm:$0x3] %vm376_vm0, %v443_v2  ;;  %v437_v4 = vadd.f32 %v2667_v57, %v436_v3 }
  0xd1   : > { %v444_v6 = vrot.slane %v437_v4, 2  ;;  %v445_v7 = vrot.slane %v437_v4, 4  ;;  %v446_v8 = vrot.slane %v437_v4, 6  ;;  %457 = vst.msk [vmem:[#allocation3 + $0x8] sm:$0x3] %vm376_vm0, %v437_v4 }
  0xd2   : > { %v621_v9 = vld [vmem:[%s620_s7] sm:$0x3]  ;;  %s2416_s7 = sshll.u32 %s3017_s12, 4 }
  0xd3   : > { %458 = vst.msk [vmem:[#allocation3 + $0xa] sm:$0x3] %vm376_vm0, %v444_v6  ;;  %v649_v10 = vadd.f32 %v646_v5, %v621_v9 }
  0xd4   : > { %459 = vst.msk [vmem:[#allocation3 + $0xc] sm:$0x3] %vm376_vm0, %v445_v7 }
  0xd5   : > { %460 = vst.msk [vmem:[#allocation3 + $0xe] sm:$0x3] %vm376_vm0, %v446_v8  ;;  %v2462_v12 = vmul.f32 -1.442695, %v649_v10 }
  0xd6   : > { %v674_v18 = vpop.f32.mrf.mxu1 }
  0xd7   : > { %2670 = vpow2.f32 %v2462_v12  ;;  %v509_v13 = vpop.f32.mrf.mxu2 }
  0xd8   : > { %v510_v14 = vadd.f32 %v2668_v11, %v509_v13 }
  0xda   : > { %v517_v15 = vrot.slane %v510_v14, 2  ;;  %v518_v16 = vrot.slane %v510_v14, 4  ;;  %v519_v17 = vrot.slane %v510_v14, 6  ;;  %529 = vst.msk [vmem:[#allocation4] sm:$0x3] %vm376_vm0, %v510_v14 }
  0xdc   : > { %530 = vst.msk [vmem:[#allocation4 + $0x2] sm:$0x3] %vm376_vm0, %v517_v15  ;;  %v651_v21 = vld [vmem:[%s650_s14] sm:$0x3]  ;;  %s3324_s14 = scalar_lea.vmem [#allocation11], %s2416_s7 }
  0xdd   : > { %v2671_v22 = vpop.eup %2670  ;;  %531 = vst.msk [vmem:[#allocation4 + $0x4] sm:$0x3] %vm376_vm0, %v518_v16  ;;  %v677_v23 = vadd.f32 %v674_v18, %v651_v21 }
  0xde   : > { %v737_v27 = vadd.f32 1.0, %v2671_v22  ;;  %532 = vst.msk [vmem:[#allocation4 + $0x6] sm:$0x3] %vm376_vm0, %v519_v17  ;;  %v792_v17 = vld [vmem:[#allocation7] sm:$0x3] }
  0xdf   : > { %v2463_v28 = vmul.f32 -1.442695, %v677_v23  ;;  %v512_v30 = vpop.f32.mrf.mxu2 }
  0xe0   : > { %2672 = vrcp.f32 %v737_v27  ;;  %v513_v36 = vadd.f32 %v2668_v11, %v512_v30  ;;  %vm743_vm2 = vweird.f32 %v737_v27  ;;  %v749_v4 = vand.u32 2147483648, %v737_v27 }
  0xe1   : > { %2674 = vpow2.f32 %v2463_v28  ;;  %v747_v6 = vand.u32 2147483647, %v737_v27 }
  0xe2   : > { %v520_v41 = vrot.slane %v513_v36, 2  ;;  %v521_v44 = vrot.slane %v513_v36, 4  ;;  %v522_v45 = vrot.slane %v513_v36, 6  ;;  %533 = vst.msk [vmem:[#allocation4 + $0x8] sm:$0x3] %vm376_vm0, %v513_v36  ;;  %v585_v46 = vpop.f32.mrf.mxu3  ;;  %v750_v11 = vor.u32 1.1754944e-38, %v749_v4 }
  0xe3   : > { %v586_v47 = vadd.f32 %v2669_v31, %v585_v46  ;;  %vm748_vm7 = vcmp.eq.f32.partialorder %v747_v6, 8.507059e+37 }
  0xe4   : > { %534 = vst.msk [vmem:[#allocation4 + $0xa] sm:$0x3] %vm376_vm0, %v520_v41 }
  0xe5   : > { %535 = vst.msk [vmem:[#allocation4 + $0xc] sm:$0x3] %vm376_vm0, %v521_v44  ;;  %v593_v48 = vrot.slane %v586_v47, 2  ;;  %v594_v49 = vrot.slane %v586_v47, 4  ;;  %v595_v51 = vrot.slane %v586_v47, 6 }
  0xe6   : > { %v2673_v50 = vpop.eup %2672  ;;  %536 = vst.msk [vmem:[#allocation4 + $0xe] sm:$0x3] %vm376_vm0, %v522_v45 }
  0xe7   : > { %v2675_v52 = vpop.eup %2674  ;;  %v739_v53 = vmul.f32 %v2673_v50, %v737_v27  ;;  %605 = vst.msk [vmem:[#allocation5] sm:$0x3] %vm376_vm0, %v586_v47  ;;  %v702_v58 = vpop.f32.mrf.mxu2  ;;  %vm744_vm3 = vweird.f32 %v2673_v50 }
  0xe8   : > { %v756_v54 = vadd.f32 1.0, %v2675_v52  ;;  %606 = vst.msk [vmem:[#allocation5 + $0x2] sm:$0x3] %vm376_vm0, %v593_v48  ;;  %vm745_vm4 = vmor %vm743_vm2, %vm744_vm3 }
  0xe9   : > { %v740_v55 = vsub.f32 1.0, %v739_v53  ;;  %607 = vst.msk [vmem:[#allocation5 + $0x4] sm:$0x3] %vm376_vm0, %v594_v49 }
  0xea   : > { %2676 = vrcp.f32 %v756_v54  ;;  %608 = vst.msk [vmem:[#allocation5 + $0x6] sm:$0x3] %vm376_vm0, %v595_v51  ;;  %v588_v56 = vpop.f32.mrf.mxu3  ;;  %v768_v7 = vand.u32 2147483648, %v756_v54  ;;  %v766_v10 = vand.u32 2147483647, %v756_v54  ;;  %vm762_vm6 = vweird.f32 %v756_v54 }
  0xeb   : > { %v589_v57 = vadd.f32 %v2669_v31, %v588_v56  ;;  %v741_v62 = vmul.f32 %v2673_v50, %v740_v55 }
  0xec   : > { %v769_v15 = vor.u32 1.1754944e-38, %v768_v7  ;;  %vm767_vm9 = vcmp.eq.f32.partialorder %v766_v10, 8.507059e+37 }
  0xed   : > { %v596_v59 = vrot.slane %v589_v57, 2  ;;  %v597_v60 = vrot.slane %v589_v57, 4  ;;  %v598_v61 = vrot.slane %v589_v57, 6  ;;  %609 = vst.msk [vmem:[#allocation5 + $0x8] sm:$0x3] %vm376_vm0, %v589_v57  ;;  %v742_v3 = vadd.f32 %v2673_v50, %v741_v62 }
  0xee   : > { %v679_v63 = vld [vmem:[%s678_s23] sm:$0x3]  ;;  %s800_s23 = scalar_lea.vmem %s3324_s14, %s3291_s28 [#allocation11]  ;;  %s802_s28 = sadd.s32 %s3230_s10, %s3235_s15 }
  0xef   : > { %610 = vst.msk [vmem:[#allocation5 + $0xa] sm:$0x3] %vm376_vm0, %v596_v59  ;;  %v705_v0 = vadd.f32 %v702_v58, %v679_v63  ;;  %v746_v9 = vsel %vm745_vm4, %v2673_v50, %v742_v3  ;;  %s3368_s15 = sshll.u32 %s3242_s17, 1 }
  0xf0   : > { %v2677_v1 = vpop.eup %2676  ;;  %611 = vst.msk [vmem:[#allocation5 + $0xc] sm:$0x3] %vm376_vm0, %v597_v60  ;;  %v751_v16 = vsel %vm748_vm7, %v750_v11, %v746_v9  ;;  %s1045_s17 = scalar_lea.vmem [#allocation4], %s3368_s15 }
  0xf1   : > { %v758_v2 = vmul.f32 %v2677_v1, %v756_v54  ;;  %612 = vst.msk [vmem:[#allocation5 + $0xe] sm:$0x3] %vm376_vm0, %v598_v61  ;;  %2678 = vtanh.f32 %v705_v0  ;;  %vm763_vm5 = vweird.f32 %v2677_v1 }
  0xf2   : > { %v730_v12 = vpop.f32.mrf.mxu3  ;;  %vm764_vm8 = vmor %vm762_vm6, %vm763_vm5 }
  0xf3   : > { %v759_v5 = vsub.f32 1.0, %v758_v2 }
  0xf5   : > { %v760_v8 = vmul.f32 %v2677_v1, %v759_v5 }
  0xf7   : > { %v761_v13 = vadd.f32 %v2677_v1, %v760_v8  ;;  %v2679_v14 = vpop.eup %2678 }
  0xf8   : > { %v707_v18 = vld [vmem:[%s706_s26] sm:$0x3]  ;;  %v794_v28 = vmul.f32 %v2679_v14, %v751_v16  ;;  %s3352_s26 = sshll.u32 %s802_s28, 1  ;;  %s988_s28 = scalar_lea.vmem [#allocation2], %s3368_s15 }
  0xf9   : > { %v765_v21 = vsel %vm764_vm8, %v2677_v1, %v761_v13  ;;  %v733_v22 = vadd.f32 %v730_v12, %v707_v18  ;;  %s805_s7 = scalar_lea.vmem [#allocation2], %s3352_s26  ;;  %s889_s0 = scalar_lea.vmem [#allocation5], %s3352_s26 }
  0xfa   : > { %v770_v23 = vsel %vm767_vm9, %v769_v15, %v765_v21  ;;  %s862_s10 = scalar_lea.vmem [#allocation4], %s3352_s26 }
  0xfb   : > { %v793_v27 = vmul.f32 %v792_v17, %v770_v23  ;;  %v2464_v30 = vmul.f32 -1.442695, %v733_v22  ;;  %v863_v59 = vld [vmem:[%s862_s10] sm:$0x3]  ;;  %s3384_s10 = sshll.u32 %s3251_s8, 1 }
  0xfc   : > { %s1255_s8 = scalar_lea.vmem [#allocation5], %s3384_s10 }
  0xfd   : > { %v795_v31 = vadd.f32 %v794_v28, %v793_v27  ;;  %2680 = vpow2.f32 %v2464_v30 }
  0xff   : > { %798 = vst.msk [vmem:[#allocation7] sm:$0x3] %vm376_vm0, %v795_v31 }
 0x103   : > { %v2681_v36 = vpop.eup %2680 }
 0x104   : > { %v776_v41 = vadd.f32 1.0, %v2681_v36 }
 0x106   : > { %2682 = vrcp.f32 %v776_v41  ;;  %v788_v47 = vand.u32 2147483648, %v776_v41  ;;  %v786_v49 = vand.u32 2147483647, %v776_v41  ;;  %vm782_vm11 = vweird.f32 %v776_v41  ;;  %v974_v27 = vld [vmem:[#allocation7] sm:$0x3] }
 0x107   : > { %2684 = vtanh.f32 %v795_v31 }
 0x108   : > { %v789_v51 = vor.u32 1.1754944e-38, %v788_v47  ;;  %vm787_vm13 = vcmp.eq.f32.partialorder %v786_v49, 8.507059e+37 }
 0x10c   : > { %v2683_v44 = vpop.eup %2682 }
 0x10d   : > { %v778_v45 = vmul.f32 %v2683_v44, %v776_v41  ;;  %vm783_vm10 = vweird.f32 %v2683_v44  ;;  %v2685_v53 = vpop.eup %2684 }
 0x10e   : > { %vm784_vm12 = vmor %vm782_vm11, %vm783_vm10 }
 0x10f   : > { %v779_v46 = vsub.f32 1.0, %v778_v45 }
 0x111   : > { %v780_v48 = vmul.f32 %v2683_v44, %v779_v46 }
 0x113   : > { %v781_v50 = vadd.f32 %v2683_v44, %v780_v48 }
 0x115   : > { %v785_v52 = vsel %vm784_vm12, %v2683_v44, %v781_v50 }
 0x116   : > { %v790_v54 = vsel %vm787_vm13, %v789_v51, %v785_v52  ;;  %v989_v52 = vld [vmem:[%s988_s28] sm:$0x3]  ;;  %s1228_s28 = scalar_lea.vmem [#allocation4], %s3384_s10 }
 0x117   : > { %v797_v55 = vmul.f32 %v2685_v53, %v790_v54 }
 0x119   : > { %799 = vst.msk [vmem:[#allocation6] sm:$0x3] %vm376_vm0, %v797_v55 }
 0x11a   : > { %801 = vst.msk [vmem:[%s800_s23] sm:$0x3] %vm376_vm0, %v797_v55  ;;  %s835_s23 = scalar_lea.vmem [#allocation3], %s3352_s26 }
 0x120   : > { %v803_v56 = vld [vmem:[#allocation6] sm:$0x3] }
 0x121   : > { %2466 = vmatmul.msk.f32.vlgmr.msra.gmra.mxu0 %vm334_vm1, %v803_v56  ;;  %2471 = vmatmul.msk.f32.vlgmr.msra.gmra.mxu1 %vm334_vm1, %v803_v56 }
 0x122   : > { %2476 = vmatmul.msk.f32.vlgmr.msra.gmra.mxu2 %vm334_vm1, %v803_v56  ;;  %2481 = vmatmul.msk.f32.vlgmr.msra.gmra.mxu3 %vm334_vm1, %v803_v56 }
 0x123   : > { %1192 = vmatpush.msra.mxu0 %v3096_v19  ;;  %1219 = vmatpush.msra.mxu1 %v3114_v26  ;;  %v806_v19 = vld [vmem:[%s805_s7] sm:$0x3]  ;;  %s1072_s7 = scalar_lea.vmem [#allocation5], %s3368_s15 }
 0x124   : > { %1246 = vmatpush.msra.mxu2 %v3149_v35  ;;  %1273 = vmatpush.msra.mxu3 %v3142_v33 }
 0x125   : > { %1193 = vmatpush.msra.mxu0 %v3099_v20  ;;  %1220 = vmatpush.msra.mxu1 %v3127_v29 }
 0x126   : > { %1247 = vmatpush.msra.mxu2 %v3156_v37  ;;  %1274 = vmatpush.msra.mxu3 %v3169_v38 }
 0x127   : > { %1194 = vmatpush.msra.mxu0 %v3108_v24  ;;  %1221 = vmatpush.msra.mxu1 %v3139_v32  ;;  %v836_v24 = vld [vmem:[%s835_s23] sm:$0x3]  ;;  %s1165_s23 = scalar_lea.vmem %s3324_s14, %s3368_s15 [#allocation11] }
 0x128   : > { %1248 = vmatpush.msra.mxu2 %v3172_v39  ;;  %1275 = vmatpush.msra.mxu3 %v3181_v42 }
 0x129   : > { %1195 = vmatpush.msra.mxu0 %v3111_v25  ;;  %1222 = vmatpush.msra.mxu1 %v3146_v34  ;;  %v890_v34 = vld [vmem:[%s889_s0] sm:$0x3]  ;;  %s982_s0 = scalar_lea.vmem %s3324_s14, %s3352_s26 [#allocation11]  ;;  %s1018_s26 = scalar_lea.vmem [#allocation3], %s3368_s15 }
 0x12a   : > { %1249 = vmatpush.msra.mxu2 %v3175_v40  ;;  %1276 = vmatpush.msra.mxu3 %v3186_v43  ;;  %v1019_v54 = vld [vmem:[%s1018_s26] sm:$0x3]  ;;  %s1201_s15 = scalar_lea.vmem [#allocation3], %s3384_s10  ;;  %s3519_s26 = sshll.u32 %s3257_s9, 1 }
 0x12b   : > { %s1411_s9 = scalar_lea.vmem [#allocation4], %s3519_s26 }
 0x19e   : > { %v831_v20 = vpop.f32.mrf.mxu0  ;;  %v858_v26 = vpop.f32.mrf.mxu1 }
 0x19f   : > { %v834_v29 = vadd.f32 %v831_v20, %v806_v19  ;;  %v861_v25 = vadd.f32 %v858_v26, %v836_v24  ;;  %v1073_v26 = vld [vmem:[%s1072_s7] sm:$0x3]  ;;  %s1354_s7 = scalar_lea.vmem [#allocation2], %s3519_s26 }
 0x1a1   : > { %v2482_v32 = vmul.f32 -1.442695, %v834_v29  ;;  %v2483_v33 = vmul.f32 -1.442695, %v861_v25 }
 0x1a3   : > { %2686 = vpow2.f32 %v2482_v32 }
 0x1a4   : > { %2688 = vpow2.f32 %v2483_v33 }
 0x1a5   : > { %v912_v35 = vpop.f32.mrf.mxu3  ;;  %v885_v57 = vpop.f32.mrf.mxu2 }
 0x1a6   : > { %v915_v37 = vadd.f32 %v912_v35, %v890_v34  ;;  %v888_v62 = vadd.f32 %v885_v57, %v863_v59 }
 0x1a8   : > { %v2484_v38 = vmul.f32 -1.442695, %v915_v37 }
 0x1a9   : > { %v2687_v39 = vpop.eup %2686 }
 0x1aa   : > { %v2689_v40 = vpop.eup %2688  ;;  %v919_v42 = vadd.f32 1.0, %v2687_v39  ;;  %2690 = vpow2.f32 %v2484_v38 }
 0x1ab   : > { %v938_v43 = vadd.f32 1.0, %v2689_v40  ;;  %v1046_v40 = vld [vmem:[%s1045_s17] sm:$0x3]  ;;  %s1384_s17 = scalar_lea.vmem [#allocation3], %s3519_s26 }
 0x1ac   : > { %2692 = vrcp.f32 %v919_v42  ;;  %v931_v4 = vand.u32 2147483648, %v919_v42  ;;  %v929_v7 = vand.u32 2147483647, %v919_v42  ;;  %vm925_vm2 = vweird.f32 %v919_v42 }
 0x1ad   : > { %2694 = vrcp.f32 %v938_v43  ;;  %v950_v5 = vand.u32 2147483648, %v938_v43  ;;  %v948_v9 = vand.u32 2147483647, %v938_v43  ;;  %vm944_vm3 = vweird.f32 %v938_v43 }
 0x1ae   : > { %v932_v12 = vor.u32 1.1754944e-38, %v931_v4  ;;  %vm930_vm6 = vcmp.eq.f32.partialorder %v929_v7, 8.507059e+37 }
 0x1af   : > { %v951_v15 = vor.u32 1.1754944e-38, %v950_v5  ;;  %vm949_vm7 = vcmp.eq.f32.partialorder %v948_v9, 8.507059e+37 }
 0x1b0   : > { %v2691_v58 = vpop.eup %2690 }
 0x1b1   : > { %v958_v60 = vadd.f32 1.0, %v2691_v58 }
 0x1b2   : > { %v2693_v61 = vpop.eup %2692 }
 0x1b3   : > { %v2695_v63 = vpop.eup %2694  ;;  %v921_v0 = vmul.f32 %v2693_v61, %v919_v42  ;;  %2696 = vrcp.f32 %v958_v60  ;;  %vm926_vm14 = vweird.f32 %v2693_v61  ;;  %v970_v44 = vand.u32 2147483648, %v958_v60 }
 0x1b4   : > { %v940_v1 = vmul.f32 %v2695_v63, %v938_v43  ;;  %2698 = vtanh.f32 %v888_v62  ;;  %vm945_vm15 = vweird.f32 %v2695_v63  ;;  %vm927_vm4 = vmor %vm925_vm2, %vm926_vm14  ;;  %vm964_vm9 = vweird.f32 %v958_v60 }
 0x1b5   : > { %v922_v2 = vsub.f32 1.0, %v921_v0  ;;  %vm946_vm5 = vmor %vm944_vm3, %vm945_vm15  ;;  %v968_v45 = vand.u32 2147483647, %v958_v60  ;;  %v971_v47 = vor.u32 1.1754944e-38, %v970_v44 }
 0x1b6   : > { %v941_v3 = vsub.f32 1.0, %v940_v1 }
 0x1b7   : > { %v923_v6 = vmul.f32 %v2693_v61, %v922_v2  ;;  %vm969_vm11 = vcmp.eq.f32.partialorder %v968_v45, 8.507059e+37 }
 0x1b8   : > { %v942_v8 = vmul.f32 %v2695_v63, %v941_v3 }
 0x1b9   : > { %v2697_v10 = vpop.eup %2696  ;;  %v924_v11 = vadd.f32 %v2693_v61, %v923_v6 }
 0x1ba   : > { %v943_v13 = vadd.f32 %v2695_v63, %v942_v8  ;;  %v960_v14 = vmul.f32 %v2697_v10, %v958_v60  ;;  %v2699_v17 = vpop.eup %2698  ;;  %vm965_vm8 = vweird.f32 %v2697_v10 }
 0x1bb   : > { %v928_v16 = vsel %vm927_vm4, %v2693_v61, %v924_v11  ;;  %vm966_vm10 = vmor %vm964_vm9, %vm965_vm8 }
 0x1bc   : > { %v933_v18 = vsel %vm930_vm6, %v932_v12, %v928_v16  ;;  %v947_v21 = vsel %vm946_vm5, %v2695_v63, %v943_v13  ;;  %v961_v22 = vsub.f32 1.0, %v960_v14 }
 0x1bd   : > { %v952_v23 = vsel %vm949_vm7, %v951_v15, %v947_v21  ;;  %v976_v28 = vmul.f32 %v2699_v17, %v933_v18 }
 0x1be   : > { %v975_v30 = vmul.f32 %v974_v27, %v952_v23  ;;  %v962_v31 = vmul.f32 %v2697_v10, %v961_v22 }
 0x1c0   : > { %v977_v36 = vadd.f32 %v976_v28, %v975_v30  ;;  %v963_v41 = vadd.f32 %v2697_v10, %v962_v31 }
 0x1c2   : > { %2700 = vtanh.f32 %v977_v36  ;;  %980 = vst.msk [vmem:[#allocation7] sm:$0x3] %vm376_vm0, %v977_v36  ;;  %v967_v46 = vsel %vm966_vm10, %v2697_v10, %v963_v41 }
 0x1c3   : > { %v972_v49 = vsel %vm969_vm11, %v971_v47, %v967_v46 }
 0x1c8   : > { %v2701_v48 = vpop.eup %2700 }
 0x1c9   : > { %v979_v50 = vmul.f32 %v2701_v48, %v972_v49  ;;  %v1157_v17 = vld [vmem:[#allocation7] sm:$0x3]  ;;  %v1202_v49 = vld [vmem:[%s1201_s15] sm:$0x3] }
 0x1cb   : > { %981 = vst.msk [vmem:[#allocation6] sm:$0x3] %vm376_vm0, %v979_v50 }
 0x1cc   : > { %983 = vst.msk [vmem:[%s982_s0] sm:$0x3] %vm376_vm0, %v979_v50  ;;  %s1171_s0 = scalar_lea.vmem [#allocation2], %s3384_s10 }
 0x1cd   : > { %v1172_v47 = vld [vmem:[%s1171_s0] sm:$0x3]  ;;  %s3551_s0 = sshll.u32 %s3263_s11, 1 }
 0x1ce   : > { %s1537_s15 = scalar_lea.vmem [#allocation2], %s3551_s0  ;;  %s1594_s11 = scalar_lea.vmem [#allocation4], %s3551_s0 }
 0x1d2   : > { %v986_v51 = vld [vmem:[#allocation6] sm:$0x3] }
 0x1d3   : > { %2487 = vmatmul.msk.f32.vlgmr.msrb.gmra.mxu0 %vm334_vm1, %v986_v51  ;;  %2492 = vmatmul.msk.f32.vlgmr.msrb.gmra.mxu1 %vm334_vm1, %v986_v51 }
 0x1d4   : > { %2497 = vmatmul.msk.f32.vlgmr.msrb.gmra.mxu2 %vm334_vm1, %v986_v51  ;;  %2502 = vmatmul.msk.f32.vlgmr.msrb.gmra.mxu3 %vm334_vm1, %v986_v51 }
 0x250   : > { %v1014_v53 = vpop.f32.mrf.mxu0  ;;  %v1041_v55 = vpop.f32.mrf.mxu1 }
 0x251   : > { %v1017_v56 = vadd.f32 %v1014_v53, %v989_v52  ;;  %v1044_v19 = vadd.f32 %v1041_v55, %v1019_v54  ;;  %v1256_v55 = vld [vmem:[%s1255_s8] sm:$0x3]  ;;  %s1567_s8 = scalar_lea.vmem [#allocation3], %s3551_s0 }
 0x253   : > { %v2503_v20 = vmul.f32 -1.442695, %v1017_v56  ;;  %v2504_v24 = vmul.f32 -1.442695, %v1044_v19 }
 0x255   : > { %2702 = vpow2.f32 %v2503_v20 }
 0x256   : > { %2704 = vpow2.f32 %v2504_v24 }
 0x257   : > { %v1095_v29 = vpop.f32.mrf.mxu3  ;;  %v1068_v38 = vpop.f32.mrf.mxu2 }
 0x258   : > { %v1098_v25 = vadd.f32 %v1095_v29, %v1073_v26  ;;  %v1071_v57 = vadd.f32 %v1068_v38, %v1046_v40  ;;  %v3413_v38 = vld [vmem:[%s3021_s25 + $0x30] sm:$0xff] }
 0x259   : > { %v3421_v40 = vld [vmem:[%s3021_s25 + $0x70] sm:$0xff] }
 0x25a   : > { %v2505_v32 = vmul.f32 -1.442695, %v1098_v25 }
 0x25b   : > { %v2703_v33 = vpop.eup %2702 }
 0x25c   : > { %v2705_v34 = vpop.eup %2704  ;;  %v1102_v35 = vadd.f32 1.0, %v2703_v33  ;;  %2706 = vpow2.f32 %v2505_v32  ;;  %v3395_v32 = vld [vmem:[%s3021_s25 + $0x18] sm:$0xff] }
 0x25d   : > { %v1121_v37 = vadd.f32 1.0, %v2705_v34  ;;  %v3398_v33 = vld [vmem:[%s3021_s25 + $0x38] sm:$0xff]  ;;  %1375 = vmatpush.msrb.mxu0 %v3395_v32 }
 0x25e   : > { %2708 = vrcp.f32 %v1102_v35  ;;  %v1114_v63 = vand.u32 2147483648, %v1102_v35  ;;  %v1112_v2 = vand.u32 2147483647, %v1102_v35  ;;  %vm1108_vm14 = vweird.f32 %v1102_v35  ;;  %v3401_v34 = vld [vmem:[%s3021_s25 + $0x58] sm:$0xff]  ;;  %1402 = vmatpush.msrb.mxu1 %v3398_v33 }
 0x25f   : > { %2710 = vrcp.f32 %v1121_v37  ;;  %v1133_v0 = vand.u32 2147483648, %v1121_v37  ;;  %v1131_v4 = vand.u32 2147483647, %v1121_v37  ;;  %vm1127_vm15 = vweird.f32 %v1121_v37  ;;  %1429 = vmatpush.msrb.mxu2 %v3401_v34 }
 0x260   : > { %v1115_v7 = vor.u32 1.1754944e-38, %v1114_v63  ;;  %vm1113_vm4 = vcmp.eq.f32.partialorder %v1112_v2, 8.507059e+37  ;;  %1403 = vmatpush.msrb.mxu1 %v3413_v38  ;;  %v1229_v63 = vld [vmem:[%s1228_s28] sm:$0x3]  ;;  %v3454_v2 = vld [vmem:[%s3021_s25 + $0x60] sm:$0xff]  ;;  %s1621_s28 = scalar_lea.vmem [#allocation5], %s3551_s0 }
 0x261   : > { %v1134_v10 = vor.u32 1.1754944e-38, %v1133_v0  ;;  %vm1132_vm5 = vcmp.eq.f32.partialorder %v1131_v4, 8.507059e+37 }
 0x262   : > { %v2707_v39 = vpop.eup %2706 }
 0x263   : > { %v1141_v42 = vadd.f32 1.0, %v2707_v39  ;;  %v3418_v39 = vld [vmem:[%s3021_s25 + $0x50] sm:$0xff] }
 0x264   : > { %v2709_v43 = vpop.eup %2708  ;;  %1430 = vmatpush.msrb.mxu2 %v3418_v39 }
 0x265   : > { %v2711_v58 = vpop.eup %2710  ;;  %v1104_v59 = vmul.f32 %v2709_v43, %v1102_v35  ;;  %2712 = vrcp.f32 %v1141_v42  ;;  %vm1109_vm12 = vweird.f32 %v2709_v43  ;;  %v1153_v28 = vand.u32 2147483648, %v1141_v42  ;;  %v3407_v35 = vld [vmem:[%s3021_s25 + $0x78] sm:$0xff] }
 0x266   : > { %v1123_v60 = vmul.f32 %v2711_v58, %v1121_v37  ;;  %2714 = vtanh.f32 %v1071_v57  ;;  %vm1128_vm13 = vweird.f32 %v2711_v58  ;;  %vm1110_vm2 = vmor %vm1108_vm14, %vm1109_vm12  ;;  %vm1147_vm7 = vweird.f32 %v1141_v42  ;;  %v3410_v37 = vld [vmem:[%s3021_s25 + $0x10] sm:$0xff]  ;;  %1456 = vmatpush.msrb.mxu3 %v3407_v35  ;;  %v3429_v57 = vld [vmem:[%s3021_s25 + $0x28] sm:$0xff] }
 0x267   : > { %v1105_v61 = vsub.f32 1.0, %v1104_v59  ;;  %vm1129_vm3 = vmor %vm1127_vm15, %vm1128_vm13  ;;  %v1151_v30 = vand.u32 2147483647, %v1141_v42  ;;  %v1154_v36 = vor.u32 1.1754944e-38, %v1153_v28  ;;  %1376 = vmatpush.msrb.mxu0 %v3410_v37  ;;  %v3435_v59 = vld [vmem:[%s3021_s25 + $0x68] sm:$0xff]  ;;  %1404 = vmatpush.msrb.mxu1 %v3429_v57 }
 0x268   : > { %v1124_v62 = vsub.f32 1.0, %v1123_v60  ;;  %1457 = vmatpush.msrb.mxu3 %v3421_v40 }
 0x269   : > { %v1106_v1 = vmul.f32 %v2709_v43, %v1105_v61  ;;  %vm1152_vm9 = vcmp.eq.f32.partialorder %v1151_v30, 8.507059e+37  ;;  %v3440_v61 = vld [vmem:[%s3021_s25] sm:$0xff] }
 0x26a   : > { %v1125_v3 = vmul.f32 %v2711_v58, %v1124_v62  ;;  %v3443_v62 = vld [vmem:[%s3021_s25 + $0x20] sm:$0xff]  ;;  %1458 = vmatpush.msrb.mxu3 %v3435_v59 }
 0x26b   : > { %v2713_v5 = vpop.eup %2712  ;;  %v1107_v6 = vadd.f32 %v2709_v43, %v1106_v1  ;;  %v3451_v1 = vld [vmem:[%s3021_s25 + $0x40] sm:$0xff]  ;;  %1405 = vmatpush.msrb.mxu1 %v3443_v62 }
 0x26c   : > { %v1126_v8 = vadd.f32 %v2711_v58, %v1125_v3  ;;  %v1143_v9 = vmul.f32 %v2713_v5, %v1141_v42  ;;  %v2715_v12 = vpop.eup %2714  ;;  %vm1148_vm6 = vweird.f32 %v2713_v5  ;;  %v3424_v42 = vld [vmem:[%s3021_s25 + $0x8] sm:$0xff]  ;;  %1459 = vmatpush.msrb.mxu3 %v3454_v2 }
 0x26d   : > { %v1111_v11 = vsel %vm1110_vm2, %v2709_v43, %v1107_v6  ;;  %vm1149_vm8 = vmor %vm1147_vm7, %vm1148_vm6  ;;  %1377 = vmatpush.msrb.mxu0 %v3424_v42 }
 0x26e   : > { %v1116_v13 = vsel %vm1113_vm4, %v1115_v7, %v1111_v11  ;;  %v1130_v14 = vsel %vm1129_vm3, %v2711_v58, %v1126_v8  ;;  %v1144_v15 = vsub.f32 1.0, %v1143_v9  ;;  %v3432_v58 = vld [vmem:[%s3021_s25 + $0x48] sm:$0xff]  ;;  %s1348_s25 = scalar_lea.vmem %s3324_s14, %s3384_s10 [#allocation11]  ;;  %s1531_s10 = scalar_lea.vmem %s3324_s14, %s3519_s26 [#allocation11] }
 0x26f   : > { %v1135_v16 = vsel %vm1132_vm5, %v1134_v10, %v1130_v14  ;;  %v1159_v18 = vmul.f32 %v2715_v12, %v1116_v13  ;;  %1431 = vmatpush.msrb.mxu2 %v3432_v58  ;;  %1378 = vmatpush.msrb.mxu0 %v3440_v61 }
 0x270   : > { %v1158_v21 = vmul.f32 %v1157_v17, %v1135_v16  ;;  %v1145_v22 = vmul.f32 %v2713_v5, %v1144_v15 }
 0x271   : > { %1432 = vmatpush.msrb.mxu2 %v3451_v1 }
 0x272   : > { %v1160_v23 = vadd.f32 %v1159_v18, %v1158_v21  ;;  %v1146_v27 = vadd.f32 %v2713_v5, %v1145_v22 }
 0x274   : > { %2716 = vtanh.f32 %v1160_v23  ;;  %1163 = vst.msk [vmem:[#allocation7] sm:$0x3] %vm376_vm0, %v1160_v23  ;;  %v1150_v31 = vsel %vm1149_vm8, %v2713_v5, %v1146_v27 }
 0x275   : > { %v1155_v44 = vsel %vm1152_vm9, %v1154_v36, %v1150_v31 }
 0x27a   : > { %v2717_v41 = vpop.eup %2716 }
 0x27b   : > { %v1162_v45 = vmul.f32 %v2717_v41, %v1155_v44  ;;  %v1340_v44 = vld [vmem:[#allocation7] sm:$0x3] }
 0x27d   : > { %1164 = vst.msk [vmem:[#allocation6] sm:$0x3] %vm376_vm0, %v1162_v45 }
 0x27e   : > { %1166 = vst.msk [vmem:[%s1165_s23] sm:$0x3] %vm376_vm0, %v1162_v45  ;;  %s1438_s23 = scalar_lea.vmem [#allocation5], %s3519_s26  ;;  %s3567_s26 = sshll.u32 %s3268_s16, 1 }
 0x27f   : > { %s1777_s16 = scalar_lea.vmem [#allocation4], %s3567_s26 }
 0x284   : > { %v1169_v46 = vld [vmem:[#allocation6] sm:$0x3] }
 0x285   : > { %2507 = vmatmul.msk.f32.vlgmr.msra.gmra.mxu0 %vm334_vm1, %v1169_v46  ;;  %2512 = vmatmul.msk.f32.vlgmr.msra.gmra.mxu1 %vm334_vm1, %v1169_v46 }
 0x286   : > { %2517 = vmatmul.msk.f32.vlgmr.msra.gmra.mxu2 %vm334_vm1, %v1169_v46  ;;  %2522 = vmatmul.msk.f32.vlgmr.msra.gmra.mxu3 %vm334_vm1, %v1169_v46 }
 0x287   : > { %1558 = vmatpush.msra.mxu0 %v3395_v32  ;;  %1585 = vmatpush.msra.mxu1 %v3398_v33 }
 0x288   : > { %1612 = vmatpush.msra.mxu2 %v3401_v34  ;;  %1639 = vmatpush.msra.mxu3 %v3407_v35 }
 0x289   : > { %1559 = vmatpush.msra.mxu0 %v3410_v37  ;;  %1586 = vmatpush.msra.mxu1 %v3413_v38 }
 0x28a   : > { %1613 = vmatpush.msra.mxu2 %v3418_v39  ;;  %1640 = vmatpush.msra.mxu3 %v3421_v40 }
 0x28b   : > { %1560 = vmatpush.msra.mxu0 %v3424_v42  ;;  %1587 = vmatpush.msra.mxu1 %v3429_v57 }
 0x28c   : > { %1614 = vmatpush.msra.mxu2 %v3432_v58  ;;  %1641 = vmatpush.msra.mxu3 %v3435_v59 }
 0x28d   : > { %1561 = vmatpush.msra.mxu0 %v3440_v61  ;;  %1588 = vmatpush.msra.mxu1 %v3443_v62 }
 0x28e   : > { %1615 = vmatpush.msra.mxu2 %v3451_v1  ;;  %1642 = vmatpush.msra.mxu3 %v3454_v2 }
 0x302   : > { %v1197_v48 = vpop.f32.mrf.mxu0  ;;  %v1224_v50 = vpop.f32.mrf.mxu1 }
 0x303   : > { %v1200_v51 = vadd.f32 %v1197_v48, %v1172_v47  ;;  %v1227_v52 = vadd.f32 %v1224_v50, %v1202_v49 }
 0x305   : > { %v2523_v53 = vmul.f32 -1.442695, %v1200_v51  ;;  %v2524_v54 = vmul.f32 -1.442695, %v1227_v52 }
 0x307   : > { %2718 = vpow2.f32 %v2523_v53 }
 0x308   : > { %2720 = vpow2.f32 %v2524_v54 }
 0x309   : > { %v1278_v56 = vpop.f32.mrf.mxu3  ;;  %v1251_v43 = vpop.f32.mrf.mxu2 }
 0x30a   : > { %v1281_v19 = vadd.f32 %v1278_v56, %v1256_v55  ;;  %v1254_v4 = vadd.f32 %v1251_v43, %v1229_v63 }
 0x30c   : > { %v2525_v20 = vmul.f32 -1.442695, %v1281_v19 }
 0x30d   : > { %v2719_v24 = vpop.eup %2718 }
 0x30e   : > { %v2721_v26 = vpop.eup %2720  ;;  %v3389_v29 = vadd.f32 1.0, %v2719_v24  ;;  %2722 = vpow2.f32 %v2525_v20  ;;  %v1355_v20 = vld [vmem:[%s1354_s7] sm:$0x3]  ;;  %s1720_s7 = scalar_lea.vmem [#allocation2], %s3567_s26 }
 0x30f   : > { %v3391_v25 = vadd.f32 1.0, %v2721_v26  ;;  %v1385_v26 = vld [vmem:[%s1384_s17] sm:$0x3]  ;;  %s1750_s17 = scalar_lea.vmem [#allocation3], %s3567_s26 }
 0x310   : > { %2724 = vrcp.f32 %v3389_v29  ;;  %v1297_v10 = vand.u32 2147483648, %v3389_v29  ;;  %v1295_v13 = vand.u32 2147483647, %v3389_v29  ;;  %vm1291_vm12 = vweird.f32 %v3389_v29 }
 0x311   : > { %2726 = vrcp.f32 %v3391_v25  ;;  %v1316_v11 = vand.u32 2147483648, %v3391_v25  ;;  %v1314_v15 = vand.u32 2147483647, %v3391_v25  ;;  %vm1310_vm13 = vweird.f32 %v3391_v25 }
 0x312   : > { %v1298_v18 = vor.u32 1.1754944e-38, %v1297_v10  ;;  %vm1296_vm2 = vcmp.eq.f32.partialorder %v1295_v13, 8.507059e+37 }
 0x313   : > { %v1317_v23 = vor.u32 1.1754944e-38, %v1316_v11  ;;  %vm1315_vm3 = vcmp.eq.f32.partialorder %v1314_v15, 8.507059e+37 }
 0x314   : > { %v2723_v60 = vpop.eup %2722 }
 0x315   : > { %v3446_v0 = vadd.f32 1.0, %v2723_v60 }
 0x316   : > { %v2725_v3 = vpop.eup %2724 }
 0x317   : > { %v2727_v5 = vpop.eup %2726  ;;  %v1287_v6 = vmul.f32 %v2725_v3, %v3389_v29  ;;  %2728 = vrcp.f32 %v3446_v0  ;;  %vm1292_vm10 = vweird.f32 %v2725_v3  ;;  %v1336_v50 = vand.u32 2147483648, %v3446_v0 }
 0x318   : > { %v1306_v7 = vmul.f32 %v2727_v5, %v3391_v25  ;;  %2730 = vtanh.f32 %v1254_v4  ;;  %vm1311_vm11 = vweird.f32 %v2727_v5  ;;  %vm1293_vm14 = vmor %vm1291_vm12, %vm1292_vm10  ;;  %vm1330_vm5 = vweird.f32 %v3446_v0 }
 0x319   : > { %v1288_v8 = vsub.f32 1.0, %v1287_v6  ;;  %vm1312_vm15 = vmor %vm1310_vm13, %vm1311_vm11  ;;  %v1334_v51 = vand.u32 2147483647, %v3446_v0  ;;  %v1337_v53 = vor.u32 1.1754944e-38, %v1336_v50 }
 0x31a   : > { %v1307_v9 = vsub.f32 1.0, %v1306_v7 }
 0x31b   : > { %v1289_v12 = vmul.f32 %v2725_v3, %v1288_v8  ;;  %vm1335_vm7 = vcmp.eq.f32.partialorder %v1334_v51, 8.507059e+37 }
 0x31c   : > { %v1308_v14 = vmul.f32 %v2727_v5, %v1307_v9 }
 0x31d   : > { %v2729_v16 = vpop.eup %2728  ;;  %v1290_v17 = vadd.f32 %v2725_v3, %v1289_v12  ;;  %v1412_v12 = vld [vmem:[%s1411_s9] sm:$0x3]  ;;  %s1897_s9 = scalar_lea.vmem %s3324_s14, %s3567_s26 [#allocation11] }
 0x31e   : > { %v1309_v21 = vadd.f32 %v2727_v5, %v1308_v14  ;;  %v1326_v22 = vmul.f32 %v2729_v16, %v3446_v0  ;;  %v2731_v28 = vpop.eup %2730  ;;  %vm1331_vm4 = vweird.f32 %v2729_v16  ;;  %v1439_v0 = vld [vmem:[%s1438_s23] sm:$0x3]  ;;  %s1804_s23 = scalar_lea.vmem [#allocation5], %s3567_s26 }
 0x31f   : > { %v1294_v27 = vsel %vm1293_vm14, %v2725_v3, %v1290_v17  ;;  %vm1332_vm6 = vmor %vm1330_vm5, %vm1331_vm4 }
 0x320   : > { %v1299_v30 = vsel %vm1296_vm2, %v1298_v18, %v1294_v27  ;;  %v1313_v31 = vsel %vm1312_vm15, %v2727_v5, %v1309_v21  ;;  %v1327_v36 = vsub.f32 1.0, %v1326_v22 }
 0x321   : > { %v1318_v41 = vsel %vm1315_vm3, %v1317_v23, %v1313_v31  ;;  %v1342_v45 = vmul.f32 %v2731_v28, %v1299_v30 }
 0x322   : > { %v1341_v46 = vmul.f32 %v1340_v44, %v1318_v41  ;;  %v1328_v47 = vmul.f32 %v2729_v16, %v1327_v36 }
 0x324   : > { %v1343_v48 = vadd.f32 %v1342_v45, %v1341_v46  ;;  %v1329_v49 = vadd.f32 %v2729_v16, %v1328_v47 }
 0x326   : > { %2732 = vtanh.f32 %v1343_v48  ;;  %1346 = vst.msk [vmem:[#allocation7] sm:$0x3] %vm376_vm0, %v1343_v48  ;;  %v1333_v52 = vsel %vm1332_vm6, %v2729_v16, %v1329_v49 }
 0x327   : > { %v1338_v55 = vsel %vm1335_vm7, %v1337_v53, %v1333_v52 }
 0x32c   : > { %v2733_v54 = vpop.eup %2732 }
 0x32d   : > { %v1345_v56 = vmul.f32 %v2733_v54, %v1338_v55  ;;  %v1523_v55 = vld [vmem:[#allocation7] sm:$0x3] }
 0x32f   : > { %1349 = vst.msk [vmem:[%s1348_s25] sm:$0x3] %vm376_vm0, %v1345_v56  ;;  %s1714_s25 = scalar_lea.vmem %s3324_s14, %s3551_s0 [#allocation11] }
 0x330   : > { %1347 = vst.msk [vmem:[#allocation6] sm:$0x3] %vm376_vm0, %v1345_v56 }
 0x337   : > { %v1352_v19 = vld [vmem:[#allocation6] sm:$0x3] }
 0x338   : > { %2528 = vmatmul.msk.f32.vlgmr.msrb.gmra.mxu0 %vm334_vm1, %v1352_v19  ;;  %2533 = vmatmul.msk.f32.vlgmr.msrb.gmra.mxu1 %vm334_vm1, %v1352_v19 }
 0x339   : > { %2538 = vmatmul.msk.f32.vlgmr.msrb.gmra.mxu2 %vm334_vm1, %v1352_v19  ;;  %2543 = vmatmul.msk.f32.vlgmr.msrb.gmra.mxu3 %vm334_vm1, %v1352_v19 }
 0x33a   : > { %1741 = vmatpush.msrb.mxu0 %v3395_v32  ;;  %1768 = vmatpush.msrb.mxu1 %v3398_v33 }
 0x33b   : > { %1795 = vmatpush.msrb.mxu2 %v3401_v34  ;;  %1822 = vmatpush.msrb.mxu3 %v3407_v35 }
 0x33c   : > { %1742 = vmatpush.msrb.mxu0 %v3410_v37  ;;  %1769 = vmatpush.msrb.mxu1 %v3413_v38 }
 0x33d   : > { %1796 = vmatpush.msrb.mxu2 %v3418_v39  ;;  %1823 = vmatpush.msrb.mxu3 %v3421_v40 }
 0x33e   : > { %1743 = vmatpush.msrb.mxu0 %v3424_v42  ;;  %1770 = vmatpush.msrb.mxu1 %v3429_v57 }
 0x33f   : > { %1797 = vmatpush.msrb.mxu2 %v3432_v58  ;;  %1824 = vmatpush.msrb.mxu3 %v3435_v59 }
 0x340   : > { %1744 = vmatpush.msrb.mxu0 %v3440_v61  ;;  %1771 = vmatpush.msrb.mxu1 %v3443_v62 }
 0x341   : > { %1798 = vmatpush.msrb.mxu2 %v3451_v1  ;;  %1825 = vmatpush.msrb.mxu3 %v3454_v2 }
 0x3b5   : > { %v1380_v24 = vpop.f32.mrf.mxu0  ;;  %v1407_v29 = vpop.f32.mrf.mxu1 }
 0x3b6   : > { %v1383_v25 = vadd.f32 %v1380_v24, %v1355_v20  ;;  %v1410_v43 = vadd.f32 %v1407_v29, %v1385_v26 }
 0x3b8   : > { %v2544_v60 = vmul.f32 -1.442695, %v1383_v25  ;;  %v2545_v63 = vmul.f32 -1.442695, %v1410_v43 }
 0x3ba   : > { %2734 = vpow2.f32 %v2544_v60 }
 0x3bb   : > { %2736 = vpow2.f32 %v2545_v63 }
 0x3bc   : > { %v1461_v3 = vpop.f32.mrf.mxu3  ;;  %v1434_v10 = vpop.f32.mrf.mxu2 }
 0x3bd   : > { %v1464_v4 = vadd.f32 %v1461_v3, %v1439_v0  ;;  %v1437_v15 = vadd.f32 %v1434_v10, %v1412_v12 }
 0x3bf   : > { %v2546_v5 = vmul.f32 -1.442695, %v1464_v4 }
 0x3c0   : > { %v2735_v6 = vpop.eup %2734 }
 0x3c1   : > { %v2737_v7 = vpop.eup %2736  ;;  %v1468_v8 = vadd.f32 1.0, %v2735_v6  ;;  %2738 = vpow2.f32 %v2546_v5 }
 0x3c2   : > { %v1487_v9 = vadd.f32 1.0, %v2737_v7  ;;  %v1595_v7 = vld [vmem:[%s1594_s11] sm:$0x3] }
 0x3c3   : > { %2740 = vrcp.f32 %v1468_v8  ;;  %v1480_v23 = vand.u32 2147483648, %v1468_v8  ;;  %v1478_v30 = vand.u32 2147483647, %v1468_v8  ;;  %vm1474_vm10 = vweird.f32 %v1468_v8 }
 0x3c4   : > { %2742 = vrcp.f32 %v1487_v9  ;;  %v1499_v27 = vand.u32 2147483648, %v1487_v9  ;;  %v1497_v36 = vand.u32 2147483647, %v1487_v9  ;;  %vm1493_vm11 = vweird.f32 %v1487_v9 }
 0x3c5   : > { %v1481_v45 = vor.u32 1.1754944e-38, %v1480_v23  ;;  %vm1479_vm14 = vcmp.eq.f32.partialorder %v1478_v30, 8.507059e+37 }
 0x3c6   : > { %v1500_v48 = vor.u32 1.1754944e-38, %v1499_v27  ;;  %vm1498_vm15 = vcmp.eq.f32.partialorder %v1497_v36, 8.507059e+37 }
 0x3c7   : > { %v2739_v11 = vpop.eup %2738 }
 0x3c8   : > { %v1507_v13 = vadd.f32 1.0, %v2739_v11 }
 0x3c9   : > { %v2741_v14 = vpop.eup %2740 }
 0x3ca   : > { %v2743_v16 = vpop.eup %2742  ;;  %v1470_v17 = vmul.f32 %v2741_v14, %v1468_v8  ;;  %2744 = vrcp.f32 %v1507_v13  ;;  %vm1475_vm8 = vweird.f32 %v2741_v14  ;;  %v1519_v29 = vand.u32 2147483648, %v1507_v13 }
 0x3cb   : > { %v1489_v18 = vmul.f32 %v2743_v16, %v1487_v9  ;;  %2746 = vtanh.f32 %v1437_v15  ;;  %vm1494_vm9 = vweird.f32 %v2743_v16  ;;  %vm1476_vm12 = vmor %vm1474_vm10, %vm1475_vm8  ;;  %vm1513_vm3 = vweird.f32 %v1507_v13 }
 0x3cc   : > { %v1471_v21 = vsub.f32 1.0, %v1470_v17  ;;  %vm1495_vm13 = vmor %vm1493_vm11, %vm1494_vm9  ;;  %v1517_v25 = vand.u32 2147483647, %v1507_v13  ;;  %v1520_v60 = vor.u32 1.1754944e-38, %v1519_v29 }
 0x3cd   : > { %v1490_v22 = vsub.f32 1.0, %v1489_v18 }
 0x3ce   : > { %v1472_v28 = vmul.f32 %v2741_v14, %v1471_v21  ;;  %vm1518_vm5 = vcmp.eq.f32.partialorder %v1517_v25, 8.507059e+37 }
 0x3cf   : > { %v1491_v31 = vmul.f32 %v2743_v16, %v1490_v22 }
 0x3d0   : > { %v2745_v41 = vpop.eup %2744  ;;  %v1473_v44 = vadd.f32 %v2741_v14, %v1472_v28 }
 0x3d1   : > { %v1492_v46 = vadd.f32 %v2743_v16, %v1491_v31  ;;  %v1509_v47 = vmul.f32 %v2745_v41, %v1507_v13  ;;  %v2747_v50 = vpop.eup %2746  ;;  %vm1514_vm2 = vweird.f32 %v2745_v41 }
 0x3d2   : > { %v1477_v49 = vsel %vm1476_vm12, %v2741_v14, %v1473_v44  ;;  %vm1515_vm4 = vmor %vm1513_vm3, %vm1514_vm2 }
 0x3d3   : > { %v1482_v51 = vsel %vm1479_vm14, %v1481_v45, %v1477_v49  ;;  %v1496_v52 = vsel %vm1495_vm13, %v2743_v16, %v1492_v46  ;;  %v1510_v53 = vsub.f32 1.0, %v1509_v47 }
 0x3d4   : > { %v1501_v54 = vsel %vm1498_vm15, %v1500_v48, %v1496_v52  ;;  %v1525_v56 = vmul.f32 %v2747_v50, %v1482_v51 }
 0x3d5   : > { %v1524_v19 = vmul.f32 %v1523_v55, %v1501_v54  ;;  %v1511_v20 = vmul.f32 %v2745_v41, %v1510_v53 }
 0x3d7   : > { %v1526_v24 = vadd.f32 %v1525_v56, %v1524_v19  ;;  %v1512_v26 = vadd.f32 %v2745_v41, %v1511_v20 }
 0x3d9   : > { %2748 = vtanh.f32 %v1526_v24  ;;  %1529 = vst.msk [vmem:[#allocation7] sm:$0x3] %vm376_vm0, %v1526_v24  ;;  %v1516_v43 = vsel %vm1515_vm4, %v2745_v41, %v1512_v26 }
 0x3da   : > { %v1521_v0 = vsel %vm1518_vm5, %v1520_v60, %v1516_v43  ;;  %v1721_v60 = vld [vmem:[%s1720_s7] sm:$0x3] }
 0x3df   : > { %v2749_v63 = vpop.eup %2748 }
 0x3e0   : > { %v1528_v3 = vmul.f32 %v2749_v63, %v1521_v0  ;;  %v1706_v50 = vld [vmem:[#allocation7] sm:$0x3]  ;;  %v1751_v0 = vld [vmem:[%s1750_s17] sm:$0x3] }
 0x3e2   : > { %1530 = vst.msk [vmem:[#allocation6] sm:$0x3] %vm376_vm0, %v1528_v3 }
 0x3e3   : > { %1532 = vst.msk [vmem:[%s1531_s10] sm:$0x3] %vm376_vm0, %v1528_v3  ;;  %s3583_s10 = sshll.u32 %s3271_s29, 1 }
 0x3e4   : > { %s1903_s0 = scalar_lea.vmem [#allocation2], %s3583_s10  ;;  %s1960_s29 = scalar_lea.vmem [#allocation4], %s3583_s10 }
 0x3e5   : > { %s2080_s17 = scalar_lea.vmem %s3324_s14, %s3583_s10 [#allocation11] }
 0x3e9   : > { %v1535_v4 = vld [vmem:[#allocation6] sm:$0x3] }
 0x3ea   : > { %2548 = vmatmul.msk.f32.vlgmr.msra.gmra.mxu0 %vm334_vm1, %v1535_v4  ;;  %2553 = vmatmul.msk.f32.vlgmr.msra.gmra.mxu1 %vm334_vm1, %v1535_v4 }
 0x3eb   : > { %2558 = vmatmul.msk.f32.vlgmr.msra.gmra.mxu2 %vm334_vm1, %v1535_v4  ;;  %2563 = vmatmul.msk.f32.vlgmr.msra.gmra.mxu3 %vm334_vm1, %v1535_v4 }
 0x3ec   : > { %1924 = vmatpush.msra.mxu0 %v3395_v32  ;;  %1951 = vmatpush.msra.mxu1 %v3398_v33  ;;  %v1538_v32 = vld [vmem:[%s1537_s15] sm:$0x3]  ;;  %s1933_s15 = scalar_lea.vmem [#allocation3], %s3583_s10 }
 0x3ed   : > { %1978 = vmatpush.msra.mxu2 %v3401_v34  ;;  %2005 = vmatpush.msra.mxu3 %v3407_v35  ;;  %v1568_v34 = vld [vmem:[%s1567_s8] sm:$0x3]  ;;  %s1987_s8 = scalar_lea.vmem [#allocation5], %s3583_s10 }
 0x3ee   : > { %1925 = vmatpush.msra.mxu0 %v3410_v37  ;;  %1952 = vmatpush.msra.mxu1 %v3413_v38 }
 0x3ef   : > { %1979 = vmatpush.msra.mxu2 %v3418_v39  ;;  %2006 = vmatpush.msra.mxu3 %v3421_v40 }
 0x3f0   : > { %1926 = vmatpush.msra.mxu0 %v3424_v42  ;;  %1953 = vmatpush.msra.mxu1 %v3429_v57  ;;  %v1622_v42 = vld [vmem:[%s1621_s28] sm:$0x3]  ;;  %s2614_s28 = sshll.u32 %s2952_s22, 4  ;;  %s2101_s22 = sshll.u32 %s3324_s14, 4  ;;  %s2102_s22 = int_to_ptr.vmem [resolvable:$true] %s2101_s22 }
 0x3f1   : > { %1980 = vmatpush.msra.mxu2 %v3432_v58  ;;  %2007 = vmatpush.msra.mxu3 %v3435_v59  ;;  %s2100_s26 = scalar_lea.hbm %s3637_s4, %s2614_s28  ;;  %s2848_s14 = scalar_lea.hbm %s3637_s4, 32 }
 0x3f2   : > { %1927 = vmatpush.msra.mxu0 %v3440_v61  ;;  %1954 = vmatpush.msra.mxu1 %v3443_v62  ;;  %s2103_s7 = sshll.u32 %s2100_s26, 4  ;;  %s2104_s7 = int_to_ptr.hbm [resolvable:$true] %s2103_s7 }
 0x3f3   : > { %1981 = vmatpush.msra.mxu2 %v3451_v1  ;;  %2008 = vmatpush.msra.mxu3 %v3454_v2 }
 0x467   : > { %v1563_v33 = vpop.f32.mrf.mxu0  ;;  %v1590_v35 = vpop.f32.mrf.mxu1 }
 0x468   : > { %v1566_v37 = vadd.f32 %v1563_v33, %v1538_v32  ;;  %v1593_v38 = vadd.f32 %v1590_v35, %v1568_v34  ;;  %v1805_v35 = vld [vmem:[%s1804_s23] sm:$0x3]  ;;  %s2420_s23 = sshll.u32 %s3029_s13, 1 }
 0x46a   : > { %v2564_v39 = vmul.f32 -1.442695, %v1566_v37  ;;  %v2565_v40 = vmul.f32 -1.442695, %v1593_v38 }
 0x46c   : > { %2750 = vpow2.f32 %v2564_v39 }
 0x46d   : > { %2752 = vpow2.f32 %v2565_v40 }
 0x46e   : > { %v1644_v57 = vpop.f32.mrf.mxu3  ;;  %v1617_v5 = vpop.f32.mrf.mxu2 }
 0x46f   : > { %v1647_v58 = vadd.f32 %v1644_v57, %v1622_v42  ;;  %v1620_v10 = vadd.f32 %v1617_v5, %v1595_v7 }
 0x471   : > { %v2566_v59 = vmul.f32 -1.442695, %v1647_v58 }
 0x472   : > { %v2751_v61 = vpop.eup %2750 }
 0x473   : > { %v2753_v62 = vpop.eup %2752  ;;  %v1651_v1 = vadd.f32 1.0, %v2751_v61  ;;  %2754 = vpow2.f32 %v2566_v59 }
 0x474   : > { %v1670_v2 = vadd.f32 1.0, %v2753_v62  ;;  %v1778_v62 = vld [vmem:[%s1777_s16] sm:$0x3]  ;;  %s2085_s16 = scalar_lea.sflag [#allocation10], %s3017_s12 }
 0x475   : > { %2756 = vrcp.f32 %v1651_v1  ;;  %v1663_v16 = vand.u32 2147483648, %v1651_v1  ;;  %v1661_v21 = vand.u32 2147483647, %v1651_v1  ;;  %vm1657_vm8 = vweird.f32 %v1651_v1 }
 0x476   : > { %2758 = vrcp.f32 %v1670_v2  ;;  %v1682_v17 = vand.u32 2147483648, %v1670_v2  ;;  %v1680_v23 = vand.u32 2147483647, %v1670_v2  ;;  %vm1676_vm9 = vweird.f32 %v1670_v2 }
 0x477   : > { %v1664_v30 = vor.u32 1.1754944e-38, %v1663_v16  ;;  %vm1662_vm12 = vcmp.eq.f32.partialorder %v1661_v21, 8.507059e+37 }
 0x478   : > { %v1683_v41 = vor.u32 1.1754944e-38, %v1682_v17  ;;  %vm1681_vm13 = vcmp.eq.f32.partialorder %v1680_v23, 8.507059e+37 }
 0x479   : > { %v2755_v6 = vpop.eup %2754 }
 0x47a   : > { %v1690_v8 = vadd.f32 1.0, %v2755_v6 }
 0x47b   : > { %v2757_v9 = vpop.eup %2756 }
 0x47c   : > { %v2759_v11 = vpop.eup %2758  ;;  %v1653_v12 = vmul.f32 %v2757_v9, %v1651_v1  ;;  %2760 = vrcp.f32 %v1690_v8  ;;  %vm1658_vm6 = vweird.f32 %v2757_v9  ;;  %v1702_v56 = vand.u32 2147483648, %v1690_v8 }
 0x47d   : > { %v1672_v13 = vmul.f32 %v2759_v11, %v1670_v2  ;;  %2762 = vtanh.f32 %v1620_v10  ;;  %vm1677_vm7 = vweird.f32 %v2759_v11  ;;  %vm1659_vm10 = vmor %vm1657_vm8, %vm1658_vm6  ;;  %vm1696_vm15 = vweird.f32 %v1690_v8 }
 0x47e   : > { %v1654_v14 = vsub.f32 1.0, %v1653_v12  ;;  %vm1678_vm11 = vmor %vm1676_vm9, %vm1677_vm7  ;;  %v1700_v19 = vand.u32 2147483647, %v1690_v8  ;;  %v1703_v24 = vor.u32 1.1754944e-38, %v1702_v56 }
 0x47f   : > { %v1673_v15 = vsub.f32 1.0, %v1672_v13 }
 0x480   : > { %v1655_v18 = vmul.f32 %v2757_v9, %v1654_v14  ;;  %vm1701_vm3 = vcmp.eq.f32.partialorder %v1700_v19, 8.507059e+37 }
 0x481   : > { %v1674_v22 = vmul.f32 %v2759_v11, %v1673_v15 }
 0x482   : > { %v2761_v27 = vpop.eup %2760  ;;  %v1656_v28 = vadd.f32 %v2757_v9, %v1655_v18 }
 0x483   : > { %v1675_v31 = vadd.f32 %v2759_v11, %v1674_v22  ;;  %v1692_v36 = vmul.f32 %v2761_v27, %v1690_v8  ;;  %v2763_v45 = vpop.eup %2762  ;;  %vm1697_vm14 = vweird.f32 %v2761_v27 }
 0x484   : > { %v1660_v44 = vsel %vm1659_vm10, %v2757_v9, %v1656_v28  ;;  %vm1698_vm2 = vmor %vm1696_vm15, %vm1697_vm14 }
 0x485   : > { %v1665_v46 = vsel %vm1662_vm12, %v1664_v30, %v1660_v44  ;;  %v1679_v47 = vsel %vm1678_vm11, %v2759_v11, %v1675_v31  ;;  %v1693_v48 = vsub.f32 1.0, %v1692_v36 }
 0x486   : > { %v1684_v49 = vsel %vm1681_vm13, %v1683_v41, %v1679_v47  ;;  %v1708_v51 = vmul.f32 %v2763_v45, %v1665_v46 }
 0x487   : > { %v1707_v52 = vmul.f32 %v1706_v50, %v1684_v49  ;;  %v1694_v53 = vmul.f32 %v2761_v27, %v1693_v48 }
 0x489   : > { %v1709_v54 = vadd.f32 %v1708_v51, %v1707_v52  ;;  %v1695_v55 = vadd.f32 %v2761_v27, %v1694_v53 }
 0x48b   : > { %2764 = vtanh.f32 %v1709_v54  ;;  %1712 = vst.msk [vmem:[#allocation7] sm:$0x3] %vm376_vm0, %v1709_v54  ;;  %v1699_v20 = vsel %vm1698_vm2, %v2761_v27, %v1695_v55 }
 0x48c   : > { %v1704_v29 = vsel %vm1701_vm3, %v1703_v24, %v1699_v20  ;;  %v1904_v24 = vld [vmem:[%s1903_s0] sm:$0x3] }
 0x491   : > { %v2765_v26 = vpop.eup %2764 }
 0x492   : > { %v1711_v25 = vmul.f32 %v2765_v26, %v1704_v29  ;;  %v1889_v45 = vld [vmem:[#allocation7] sm:$0x3]  ;;  %v1934_v29 = vld [vmem:[%s1933_s15] sm:$0x3] }
 0x494   : > { %1713 = vst.msk [vmem:[#allocation6] sm:$0x3] %vm376_vm0, %v1711_v25 }
 0x495   : > { %1715 = vst.msk [vmem:[%s1714_s25] sm:$0x3] %vm376_vm0, %v1711_v25 }
 0x49b   : > { %v1718_v43 = vld [vmem:[#allocation6] sm:$0x3] }
 0x49c   : > { %2568 = vmatmul.msk.f32.vlgmr.msrb.gmra.mxu0 %vm334_vm1, %v1718_v43  ;;  %2573 = vmatmul.msk.f32.vlgmr.msrb.gmra.mxu1 %vm334_vm1, %v1718_v43 }
 0x49d   : > { %2578 = vmatmul.msk.f32.vlgmr.msrb.gmra.mxu2 %vm334_vm1, %v1718_v43  ;;  %2583 = vmatmul.msk.f32.vlgmr.msrb.gmra.mxu3 %vm334_vm1, %v1718_v43 }
 0x519   : > { %v1746_v63 = vpop.f32.mrf.mxu0  ;;  %v1773_v3 = vpop.f32.mrf.mxu1 }
 0x51a   : > { %v1749_v4 = vadd.f32 %v1746_v63, %v1721_v60  ;;  %v1776_v32 = vadd.f32 %v1773_v3, %v1751_v0  ;;  %v1988_v3 = vld [vmem:[%s1987_s8] sm:$0x3] }
 0x51c   : > { %v2584_v33 = vmul.f32 -1.442695, %v1749_v4  ;;  %v2585_v34 = vmul.f32 -1.442695, %v1776_v32 }
 0x51e   : > { %2766 = vpow2.f32 %v2584_v33 }
 0x51f   : > { %2768 = vpow2.f32 %v2585_v34 }
 0x520   : > { %v1827_v37 = vpop.f32.mrf.mxu3  ;;  %v1800_v59 = vpop.f32.mrf.mxu2 }
 0x521   : > { %v1830_v38 = vadd.f32 %v1827_v37, %v1805_v35  ;;  %v1803_v5 = vadd.f32 %v1800_v59, %v1778_v62 }
 0x523   : > { %v2586_v39 = vmul.f32 -1.442695, %v1830_v38 }
 0x524   : > { %v2767_v40 = vpop.eup %2766 }
 0x525   : > { %v2769_v42 = vpop.eup %2768  ;;  %v1834_v57 = vadd.f32 1.0, %v2767_v40  ;;  %2770 = vpow2.f32 %v2586_v39 }
 0x526   : > { %v1853_v58 = vadd.f32 1.0, %v2769_v42  ;;  %v1961_v42 = vld [vmem:[%s1960_s29] sm:$0x3] }
 0x527   : > { %2772 = vrcp.f32 %v1834_v57  ;;  %v1846_v11 = vand.u32 2147483648, %v1834_v57  ;;  %v1844_v14 = vand.u32 2147483647, %v1834_v57  ;;  %vm1840_vm6 = vweird.f32 %v1834_v57 }
 0x528   : > { %2774 = vrcp.f32 %v1853_v58  ;;  %v1865_v12 = vand.u32 2147483648, %v1853_v58  ;;  %v1863_v16 = vand.u32 2147483647, %v1853_v58  ;;  %vm1859_vm7 = vweird.f32 %v1853_v58 }
 0x529   : > { %v1847_v21 = vor.u32 1.1754944e-38, %v1846_v11  ;;  %vm1845_vm10 = vcmp.eq.f32.partialorder %v1844_v14, 8.507059e+37 }
 0x52a   : > { %v1866_v27 = vor.u32 1.1754944e-38, %v1865_v12  ;;  %vm1864_vm11 = vcmp.eq.f32.partialorder %v1863_v16, 8.507059e+37 }
 0x52b   : > { %v2771_v61 = vpop.eup %2770 }
 0x52c   : > { %v1873_v1 = vadd.f32 1.0, %v2771_v61 }
 0x52d   : > { %v2773_v2 = vpop.eup %2772 }
 0x52e   : > { %v2775_v6 = vpop.eup %2774  ;;  %v1836_v7 = vmul.f32 %v2773_v2, %v1834_v57  ;;  %2776 = vrcp.f32 %v1873_v1  ;;  %vm1841_vm4 = vweird.f32 %v2773_v2  ;;  %v1885_v51 = vand.u32 2147483648, %v1873_v1 }
 0x52f   : > { %v1855_v8 = vmul.f32 %v2775_v6, %v1853_v58  ;;  %2778 = vtanh.f32 %v1803_v5  ;;  %vm1860_vm5 = vweird.f32 %v2775_v6  ;;  %vm1842_vm8 = vmor %vm1840_vm6, %vm1841_vm4  ;;  %vm1879_vm13 = vweird.f32 %v1873_v1 }
 0x530   : > { %v1837_v9 = vsub.f32 1.0, %v1836_v7  ;;  %vm1861_vm9 = vmor %vm1859_vm7, %vm1860_vm5  ;;  %v1883_v52 = vand.u32 2147483647, %v1873_v1  ;;  %v1886_v54 = vor.u32 1.1754944e-38, %v1885_v51 }
 0x531   : > { %v1856_v10 = vsub.f32 1.0, %v1855_v8 }
 0x532   : > { %v1838_v13 = vmul.f32 %v2773_v2, %v1837_v9  ;;  %vm1884_vm15 = vcmp.eq.f32.partialorder %v1883_v52, 8.507059e+37 }
 0x533   : > { %v1857_v15 = vmul.f32 %v2775_v6, %v1856_v10 }
 0x534   : > { %v2777_v17 = vpop.eup %2776  ;;  %v1839_v18 = vadd.f32 %v2773_v2, %v1838_v13 }
 0x535   : > { %v1858_v22 = vadd.f32 %v2775_v6, %v1857_v15  ;;  %v1875_v23 = vmul.f32 %v2777_v17, %v1873_v1  ;;  %v2779_v30 = vpop.eup %2778  ;;  %vm1880_vm12 = vweird.f32 %v2777_v17 }
 0x536   : > { %v1843_v28 = vsel %vm1842_vm8, %v2773_v2, %v1839_v18  ;;  %vm1881_vm14 = vmor %vm1879_vm13, %vm1880_vm12 }
 0x537   : > { %v1848_v31 = vsel %vm1845_vm10, %v1847_v21, %v1843_v28  ;;  %v1862_v36 = vsel %vm1861_vm9, %v2775_v6, %v1858_v22  ;;  %v1876_v41 = vsub.f32 1.0, %v1875_v23 }
 0x538   : > { %v1867_v44 = vsel %vm1864_vm11, %v1866_v27, %v1862_v36  ;;  %v1891_v46 = vmul.f32 %v2779_v30, %v1848_v31 }
 0x539   : > { %v1890_v47 = vmul.f32 %v1889_v45, %v1867_v44  ;;  %v1877_v48 = vmul.f32 %v2777_v17, %v1876_v41 }
 0x53b   : > { %v1892_v49 = vadd.f32 %v1891_v46, %v1890_v47  ;;  %v1878_v50 = vadd.f32 %v2777_v17, %v1877_v48 }
 0x53d   : > { %2780 = vtanh.f32 %v1892_v49  ;;  %1895 = vst.msk [vmem:[#allocation7] sm:$0x3] %vm376_vm0, %v1892_v49  ;;  %v1882_v53 = vsel %vm1881_vm14, %v2777_v17, %v1878_v50 }
 0x53e   : > { %v1887_v56 = vsel %vm1884_vm15, %v1886_v54, %v1882_v53 }
 0x543   : > { %v2781_v55 = vpop.eup %2780 }
 0x544   : > { %v1894_v19 = vmul.f32 %v2781_v55, %v1887_v56  ;;  %v2072_v30 = vld [vmem:[#allocation7] sm:$0x3] }
 0x546   : > { %1896 = vst.msk [vmem:[#allocation6] sm:$0x3] %vm376_vm0, %v1894_v19 }
 0x547   : > { %1898 = vst.msk [vmem:[%s1897_s9] sm:$0x3] %vm376_vm0, %v1894_v19  ;;  %s2842_s9 = sshra.s32 %s2104_s7, 4  ;;  %s2843_s9 = int_to_ptr.hbm [resolvable:$true] %s2842_s9 }
 0x548   : > { %s2844_s0 = scalar_lea.hbm %s2843_s9, 16  ;;  %p2849_p1 = scmp.lt.s32.totalorder %s2843_s9, %s3637_s4 }
 0x549   : > { %p2845_p6 = scmp.ne.s32.totalorder %s2843_s9, %s2844_s0  ;;  %p2850_p3 = scmp.lt.s32.totalorder %s2848_s14, %s2844_s0 }
 0x54b   : > { %p2846_p13 = pnand %p2845_p6, %p2981_p11  ;;  %p2851_p4 = por %p2850_p3, %p2849_p1 }
 0x54d   : > { %v1901_v20 = vld [vmem:[#allocation6] sm:$0x3]  ;;  %p2847_p0 = pneg %p2846_p13 }
 0x54e   : > { %2588 = vmatmul.msk.f32.vlgmr.msra.gmra.mxu0 %vm334_vm1, %v1901_v20  ;;  %2593 = vmatmul.msk.f32.vlgmr.msra.gmra.mxu1 %vm334_vm1, %v1901_v20 }
 0x54f   : > { %2598 = vmatmul.msk.f32.vlgmr.msra.gmra.mxu2 %vm334_vm1, %v1901_v20  ;;  %2603 = vmatmul.msk.f32.vlgmr.msra.gmra.mxu3 %vm334_vm1, %v1901_v20  ;;  %p2852_p7 = pnand %p2851_p4, %p2847_p0 }
 0x5cb   : > { %v1929_v26 = vpop.f32.mrf.mxu0  ;;  %v1956_v25 = vpop.f32.mrf.mxu1 }
 0x5cc   : > { %v1932_v43 = vadd.f32 %v1929_v26, %v1904_v24  ;;  %v1959_v60 = vadd.f32 %v1956_v25, %v1934_v29 }
 0x5ce   : > { %v2604_v63 = vmul.f32 -1.442695, %v1932_v43  ;;  %v2605_v0 = vmul.f32 -1.442695, %v1959_v60 }
 0x5d0   : > { %2782 = vpow2.f32 %v2604_v63 }
 0x5d1   : > { %2784 = vpow2.f32 %v2605_v0 }
 0x5d2   : > { %v2010_v4 = vpop.f32.mrf.mxu3  ;;  %v1983_v39 = vpop.f32.mrf.mxu2 }
 0x5d3   : > { %v2013_v32 = vadd.f32 %v2010_v4, %v1988_v3  ;;  %v1986_v59 = vadd.f32 %v1983_v39, %v1961_v42 }
 0x5d5   : > { %v2606_v33 = vmul.f32 -1.442695, %v2013_v32 }
 0x5d6   : > { %v2783_v34 = vpop.eup %2782 }
 0x5d7   : > { %v2785_v35 = vpop.eup %2784  ;;  %v2017_v37 = vadd.f32 1.0, %v2783_v34  ;;  %2786 = vpow2.f32 %v2606_v33 }
 0x5d8   : > { %v2036_v38 = vadd.f32 1.0, %v2785_v35 }
 0x5d9   : > { %2788 = vrcp.f32 %v2017_v37  ;;  %v2029_v6 = vand.u32 2147483648, %v2017_v37  ;;  %v2027_v9 = vand.u32 2147483647, %v2017_v37  ;;  %vm2023_vm3 = vweird.f32 %v2017_v37 }
 0x5da   : > { %2790 = vrcp.f32 %v2036_v38  ;;  %v2048_v7 = vand.u32 2147483648, %v2036_v38  ;;  %v2046_v11 = vand.u32 2147483647, %v2036_v38  ;;  %vm2042_vm4 = vweird.f32 %v2036_v38 }
 0x5db   : > { %v2030_v14 = vor.u32 1.1754944e-38, %v2029_v6  ;;  %vm2028_vm7 = vcmp.eq.f32.partialorder %v2027_v9, 8.507059e+37 }
 0x5dc   : > { %v2049_v17 = vor.u32 1.1754944e-38, %v2048_v7  ;;  %vm2047_vm8 = vcmp.eq.f32.partialorder %v2046_v11, 8.507059e+37 }
 0x5dd   : > { %v2787_v40 = vpop.eup %2786 }
 0x5de   : > { %v2056_v57 = vadd.f32 1.0, %v2787_v40 }
 0x5df   : > { %v2789_v58 = vpop.eup %2788 }
 0x5e0   : > { %v2791_v61 = vpop.eup %2790  ;;  %v2019_v62 = vmul.f32 %v2789_v58, %v2017_v37  ;;  %2792 = vrcp.f32 %v2056_v57  ;;  %vm2024_vm1 = vweird.f32 %v2789_v58  ;;  %v2068_v46 = vand.u32 2147483648, %v2056_v57 }
 0x5e1   : > { %v2038_v1 = vmul.f32 %v2791_v61, %v2036_v38  ;;  %2794 = vtanh.f32 %v1986_v59  ;;  %vm2043_vm2 = vweird.f32 %v2791_v61  ;;  %vm2025_vm5 = vmor %vm2023_vm3, %vm2024_vm1  ;;  %vm2062_vm10 = vweird.f32 %v2056_v57 }
 0x5e2   : > { %v2020_v2 = vsub.f32 1.0, %v2019_v62  ;;  %vm2044_vm6 = vmor %vm2042_vm4, %vm2043_vm2  ;;  %v2066_v47 = vand.u32 2147483647, %v2056_v57  ;;  %v2069_v49 = vor.u32 1.1754944e-38, %v2068_v46 }
 0x5e3   : > { %v2039_v5 = vsub.f32 1.0, %v2038_v1 }
 0x5e4   : > { %v2021_v8 = vmul.f32 %v2789_v58, %v2020_v2  ;;  %vm2067_vm12 = vcmp.eq.f32.partialorder %v2066_v47, 8.507059e+37 }
 0x5e5   : > { %v2040_v10 = vmul.f32 %v2791_v61, %v2039_v5 }
 0x5e6   : > { %v2793_v12 = vpop.eup %2792  ;;  %v2022_v13 = vadd.f32 %v2789_v58, %v2021_v8 }
 0x5e7   : > { %v2041_v15 = vadd.f32 %v2791_v61, %v2040_v10  ;;  %v2058_v16 = vmul.f32 %v2793_v12, %v2056_v57  ;;  %v2795_v21 = vpop.eup %2794  ;;  %vm2063_vm9 = vweird.f32 %v2793_v12 }
 0x5e8   : > { %v2026_v18 = vsel %vm2025_vm5, %v2789_v58, %v2022_v13  ;;  %vm2064_vm11 = vmor %vm2062_vm10, %vm2063_vm9 }
 0x5e9   : > { %v2031_v22 = vsel %vm2028_vm7, %v2030_v14, %v2026_v18  ;;  %v2045_v23 = vsel %vm2044_vm6, %v2791_v61, %v2041_v15  ;;  %v2059_v27 = vsub.f32 1.0, %v2058_v16 }
 0x5ea   : > { %v2050_v28 = vsel %vm2047_vm8, %v2049_v17, %v2045_v23  ;;  %v2074_v31 = vmul.f32 %v2795_v21, %v2031_v22 }
 0x5eb   : > { %v2073_v36 = vmul.f32 %v2072_v30, %v2050_v28  ;;  %v2060_v41 = vmul.f32 %v2793_v12, %v2059_v27 }
 0x5ed   : > { %v2075_v44 = vadd.f32 %v2074_v31, %v2073_v36  ;;  %v2061_v45 = vadd.f32 %v2793_v12, %v2060_v41 }
 0x5ef   : > { %2796 = vtanh.f32 %v2075_v44  ;;  %2078 = vst.msk [vmem:[#allocation7] sm:$0x3] %vm376_vm0, %v2075_v44  ;;  %v2065_v48 = vsel %vm2064_vm11, %v2793_v12, %v2061_v45 }
 0x5f0   : > { %v2070_v51 = vsel %vm2067_vm12, %v2069_v49, %v2065_v48 }
 0x5f5   : > { %v2797_v50 = vpop.eup %2796 }
 0x5f6   : > { %v2077_v52 = vmul.f32 %v2797_v50, %v2070_v51 }
 0x5f8   : > { %2079 = vst.msk [vmem:[#allocation6] sm:$0x3] %vm376_vm0, %v2077_v52 }
 0x5f9   : > { %2081 = vst.msk [vmem:[%s2080_s17] sm:$0x3] %vm376_vm0, %v2077_v52 }
 0x5fa   : > { %2855 = shalt.err (!%p2852_p7)
}
 0x5fb   : > { %s2899_s12 = smov 32   ;;  %s2900_s13 = smov 2  }
 0x5fc   : > { %2617 = dma.vmem_to_hbm [thread:$0]  (%p2981_p11), %s2102_s22, 256, %s2104_s7, %s2085_s16, %s2899_s12, %s2899_s12, %s2900_s13  }
 0x5fd   : > { %s292_s25 = scalar_lea.vmem %s3638_s5, %s2420_s23 }
 0x5ff   : > { %v2082_v53 = vld [vmem:[#allocation6] sm:$0x3] }
 0x600   : > { %2083 = vst.msk [vmem:[%s292_s25] sm:$0x3] %vm376_vm0, %v2082_v53 }
 0x601 PF: > { %s2121_s26 = sand.u32 1, %s2882_s18   ;;  %p3646_p5 = scmp.ge.s32.totalorder %s2894_s21, 2 }
 0x602   : > { %s2122_s17 = scalar_lea.sflag [#allocation10], %s2121_s26 }
 0x603   : > { %p2624_p8 = pnand %p3646_p5, %p2985_p12 }
 0x605   : > { %p2625_p10 = pneg %p2624_p8 }
 0x607   : > { %2877 = dma.done.wait (%p2625_p10), %s2122_s17, 256  }
 0x608   : > { %2879 = vsyncadd (%p2625_p10), %s2122_s17, 4294967040  ;;  %p19_p11 = scmp.ge.s32.totalorder %s2956_s24, 4   ;;  %s3647_s18 = smov %s2886_s19 }
 0x609   : > { %s3648_s19 = smov %s2890_s20  ;;  %s3649_s20 = smov %s2968_s27 }
 0x60a   : > { %s3650_s21 = smov %s2956_s24  ;;  %21 = sbr.rel (!%p19_p11) target bundleno = 7 (0x7), region = 176 }
 0x60f   :  { %2135 = vsyncpa [#allocation9], 1 }
 0x610   :  { %2137 = vsyncpa [#allocation9 + $0x1], 1 }
 0x611   :  { %2138 = vsyncpa [#allocation10], 1 }
 0x612   :  { %2140 = vsyncpa [#allocation10 + $0x1], 1 }

// kernel: bert_multi_lstm_forward.3
= control target key start
LH: loop header
LB: loop body
LE: loop exit
PB: predicated region body
PF: predicated region fallthrough
CT: control target
= control target key end

     0   :  { %vm58_vm0 = vcmask 261120   ;;  %v2072_v2 = vmov 32.0   ;;  %s2075_s24 = smov 96   ;;  %s2076_s25 = smov 88   ;;  %vm160_vm5 = vcmask 64512   ;;  %vm297_vm9 = vcmask 130112   ;;  %s2729_s0 = inlined_call_operand.vmem [shape: f32[16,32], index: 0, kind: input, shape index: {}]   ;;  %s2730_s2 = inlined_call_operand.vmem [shape: f32[1,32], index: 2, kind: input, shape index: {}]   ;;  %s2731_s3 = inlined_call_operand.vmem [shape: f32[1,32], index: 3, kind: input, shape index: {}]   ;;  %s2732_s5 = inlined_call_operand.vmem [shape: f32[2,1,96], index: 5, kind: input, shape index: {}]   ;;  %s2733_s4 = inlined_call_operand.vmem [shape: f32[2,32,96], index: 4, kind: input, shape index: {}]   ;;  %s2734_s1 = inlined_call_operand.vmem [shape: f32[2,8], index: 1, kind: input, shape index: {}]   ;;  %s2735_s7 = inlined_call_operand.vmem [shape: f32[2,1,32], index: 7, kind: input, shape index: {}]   ;;  %s2736_s6 = inlined_call_operand.vmem [shape: f32[2,32,32], index: 6, kind: input, shape index: {}]   ;;  %s2737_s8 = inlined_call_operand.vmem [shape: f32[2,1,32], index: 8, kind: input, shape index: {}]   ;;  %s2738_s9 = inlined_call_operand.vmem [shape: f32[2,1,32], index: 9, kind: input, shape index: {}]   ;;  %s2739_s11 = inlined_call_operand.vmem [shape: f32[2,1,64], index: 11, kind: input, shape index: {}]   ;;  %s2740_s10 = inlined_call_operand.vmem [shape: f32[2,32,64], index: 10, kind: input, shape index: {}]   ;;  %s2741_s12 = inlined_call_operand.vmem [shape: f32[2,64,32], index: 12, kind: input, shape index: {}]   ;;  %s2742_s13 = inlined_call_operand.vmem [shape: f32[2,1,32], index: 13, kind: input, shape index: {}]   ;;  %s2743_s14 = inlined_call_operand.vmem [shape: f32[2,1,32], index: 14, kind: input, shape index: {}]   ;;  %s2744_s15 = inlined_call_operand.vmem [shape: f32[2,1,32], index: 15, kind: input, shape index: {}]   ;;  %s2745_s16 = inlined_call_operand.vmem [shape: f32[16,32], index: 16, kind: output, shape index: {}]  }
   0x1   :  { %2759 = sst [smem:[#allocation3_spill]] %s2729_s0  ;;  %1978 = vrcp.f32 %v2072_v2  ;;  %v123_v14 = vld [vmem:[%s2733_s4 + $0x18] sm:$0xff]  ;;  %v122_v15 = vld [vmem:[%s2733_s4 + $0x10] sm:$0xff]  ;;  %v121_v16 = vld [vmem:[%s2733_s4 + $0x8] sm:$0xff]  ;;  %s2077_s28 = smov 56   ;;  %vm370_vm10 = vcmask 195712  }
   0x2   :  { %s2760_s23 = sld [smem:[#allocation3_spill]]  ;;  %146 = vmatpush.msra.mxu0 %v123_v14  ;;  %v120_v17 = vld [vmem:[%s2733_s4] sm:$0xff]  ;;  %s2747_s29 = smov 104   ;;  %vm443_vm11 = vcmask 261312   ;;  %vm893_vm15 = vcmask 523264  }
   0x3   :  { %v2196_v27 = vld [vmem:[%s2730_s2] ss:$0 sm:$0xff]  ;;  %s2749_s2 = smov 64   ;;  %s2753_s30 = smov 72  }
   0x4   :  { %147 = vmatpush.msra.mxu0 %v122_v15  ;;  %v2201_v30 = vld [vmem:[%s2731_s3] ss:$0 sm:$0xff]  ;;  %s2074_s3 = smov 120   ;;  %s2081_s0 = smov 80  }
   0x5   :  { %v2212_v33 = vld [vmem:[%s2732_s5] ss:$0 sm:$0xff]  ;;  %s2083_s19 = smov 40   ;;  %s2084_s20 = smov 8  }
   0x6   :  { %148 = vmatpush.msra.mxu0 %v121_v16  ;;  %v2233_v40 = vld [vmem:[%s2734_s1] sm:$0x3]  ;;  %s2751_s1 = smov 112   ;;  %s2755_s21 = smov 16  }
   0x7   :  { %v1979_v3 = vpop.eup %1978  ;;  %v2236_v41 = vperm.slane %v2233_v40, 0  ;;  %s2757_s22 = smov 24  }
   0x8   :  { %v54_v0 = vld [vmem:[%s2760_s23] sm:$0xff]  ;;  %v66_v4 = vmul.f32 32.0, %v1979_v3  ;;  %vm70_vm1 = vweird.f32 %v1979_v3  ;;  %149 = vmatpush.msra.mxu0 %v120_v17  ;;  %v55_v61 = vld [vmem:[%s2760_s23 + $0x8] sm:$0xff]  ;;  %s2082_s23 = smov 48  }
   0x9   :  { %v59_v1 = vsel %vm58_vm0, %v54_v0, 0.0  ;;  %v62_v62 = vsel %vm58_vm0, %v55_v61, 0.0 }
   0xa   :  { %60 = vadd.xlane.f32.xlu0 %v59_v1  ;;  %v67_v5 = vsub.f32 1.0, %v66_v4 }
   0xc   :  { %v68_v6 = vmul.f32 %v1979_v3, %v67_v5 }
   0xe   :  { %v69_v7 = vadd.f32 %v1979_v3, %v68_v6 }
  0x10   :  { %v2176_v8 = vsel %vm70_vm1, %v1979_v3, %v69_v7 }
  0x7d   :  { %v61_v9 = vpop.xlane.xlu0 %60 }
  0x7e   :  { %v72_v10 = vmul.f32 %v2176_v8, %v61_v9 }
  0x80   :  { %v74_v11 = vsub.f32 %v54_v0, %v72_v10 }
  0x82   :  { %v76_v12 = vmul.f32 %v74_v11, %v74_v11 }
  0x84   :  { %v78_v13 = vsel %vm58_vm0, %v76_v12, 0.0 }
  0x85   :  { %79 = vadd.xlane.f32.xlu0 %v78_v13 }
  0xf8   :  { %v80_v18 = vpop.xlane.xlu0 %79 }
  0xf9   :  { %v84_v19 = vmul.f32 %v80_v18, %v2176_v8 }
  0xfb   :  { %v86_v20 = vadd.f32 1e-12, %v84_v19 }
  0xfd   :  { %1980 = vrsqrt.f32 %v86_v20  ;;  %vm94_vm3 = vweird.f32 %v86_v20 }
 0x103   :  { %v1981_v21 = vpop.eup %1980 }
 0x104   :  { %v89_v22 = vmul.f32 %v1981_v21, %v86_v20  ;;  %vm95_vm2 = vweird.f32 %v1981_v21 }
 0x105   :  { %vm96_vm4 = vmor %vm94_vm3, %vm95_vm2 }
 0x106   :  { %v90_v23 = vmul.f32 %v1981_v21, %v89_v22 }
 0x108   :  { %v91_v24 = vmul.f32 0.5, %v90_v23 }
 0x10a   :  { %v92_v25 = vsub.f32 1.5, %v91_v24 }
 0x10c   :  { %v93_v26 = vmul.f32 %v1981_v21, %v92_v25 }
 0x10e   :  { %v97_v28 = vsel %vm96_vm4, %v1981_v21, %v93_v26 }
 0x10f   :  { %v108_v29 = vmul.f32 %v97_v28, %v74_v11 }
 0x111   :  { %v113_v31 = vmul.f32 %v2196_v27, %v108_v29 }
 0x113   :  { %v2205_v32 = vadd.f32 %v2201_v30, %v113_v31 }
 0x115   :  { %1853 = vmatmul.msk.f32.vlgmr.msra.gmra.mxu0 %vm58_vm0, %v2205_v32 }
 0x192   :  { %v151_v34 = vpop.f32.mrf.mxu0 }
 0x193   :  { %v2215_v35 = vadd.f32 %v2212_v33, %v151_v34 }
 0x195   :  { %199 = vrot.lane.b32.xlu0 %v2215_v35, %s2749_s2  ;;  %226 = vrot.lane.b32.xlu2 %v2215_v35, %s2074_s3 }
 0x196   :  { %158 = vrot.lane.b32.xlu1 %v2215_v35, %s2075_s24 }
 0x19e   :  { %228 = vrot.lane.b32.xlu1 %v2215_v35, %s2076_s25 }
 0x1ef   :  { %v227_v39 = vpop.permute.xlu2 %226 }
 0x207   :  { %v200_v36 = vpop.permute.xlu0 %199 }
 0x208   :  { %v159_v37 = vpop.permute.xlu1 %158  ;;  %220 = vmatpush.msra.mxu2 %v200_v36 }
 0x209   :  { %1855 = vmatpush.xpose.msk.msra.mxu3 %vm160_vm5, %v159_v37 }
 0x20c   :  { %1856 = vmatmul.msk.f32.vlgmr.msra.gmra.mxu3 %vm160_vm5, %v2215_v35 }
 0x210   :  { %v229_v38 = vpop.permute.xlu1 %228 }
 0x211   :  { %1858 = vmatpush.xpose.msk.msrb.mxu3 %vm160_vm5, %v229_v38 }
 0x214   :  { %1859 = vmatmul.msk.f32.vlgmr.msrb.gmra.mxu3 %vm160_vm5, %v227_v39 }
 0x28f   :  { %v182_v42 = vpop.f32.mrf.mxu3 }
 0x290   :  { %v185_v43 = vmul.f32 0.35355338, %v182_v42 }
 0x292   :  { %v187_v44 = vadd.f32 %v2236_v41, %v185_v43 }
 0x294   :  { %v188_v45 = vsel %vm160_vm5, %v187_v44, -inf }
 0x295   :  { %189 = vmax.xlane.f32.xlu2 %v188_v45 }
 0x297   :  { %v251_v46 = vpop.f32.mrf.mxu3 }
 0x298   :  { %v254_v47 = vmul.f32 0.35355338, %v251_v46 }
 0x29a   :  { %v255_v48 = vadd.f32 %v254_v47, %v2236_v41 }
 0x29c   :  { %v256_v49 = vsel %vm160_vm5, %v255_v48, -inf }
 0x29d   :  { %257 = vmax.xlane.f32.xlu0 %v256_v49 }
 0x2ad   :  { %267 = vrot.lane.b32.xlu2 %v2215_v35, %s2077_s28 }
 0x2b5   :  { %299 = vrot.lane.b32.xlu2 %v2215_v35, %s2751_s1 }
 0x2bd   :  { %372 = vrot.lane.b32.xlu2 %v2215_v35, %s2747_s29 }
 0x308   :  { %v190_v50 = vpop.xlane.xlu2 %189 }
 0x309   :  { %v191_v51 = vsub.f32 %v187_v44, %v190_v50 }
 0x30b   :  { %v192_v52 = vmul.f32 1.442695, %v191_v51 }
 0x30d   :  { %1982 = vpow2.f32 %v192_v52 }
 0x310   :  { %v268_v53 = vpop.permute.xlu2 %267  ;;  %v258_v54 = vpop.xlane.xlu0 %257 }
 0x311   :  { %v259_v55 = vsub.f32 %v255_v48, %v258_v54  ;;  %288 = vmatpush.msrb.mxu2 %v268_v53 }
 0x313   :  { %v1983_v56 = vpop.eup %1982  ;;  %v260_v57 = vmul.f32 1.442695, %v259_v55 }
 0x314   :  { %v194_v58 = vsel %vm160_vm5, %v1983_v56, 0.0 }
 0x315   :  { %1984 = vpow2.f32 %v260_v57  ;;  %195 = vadd.xlane.f32.xlu1 %v194_v58 }
 0x318   :  { %v300_v5 = vpop.permute.xlu2 %299 }
 0x31b   :  { %v1985_v59 = vpop.eup %1984 }
 0x31c   :  { %v262_v60 = vsel %vm160_vm5, %v1985_v59, 0.0 }
 0x31d   :  { %263 = vadd.xlane.f32.xlu0 %v262_v60 }
 0x320   :  { %v373_v7 = vpop.permute.xlu2 %372 }
 0x32e   :  { %374 = vrot.lane.b32.xlu1 %v2215_v35, %s2753_s30 }
 0x331   :  { %301 = vrot.lane.b32.xlu0 %v2215_v35, %s2081_s0 }
 0x35b   :  { %63 = vadd.xlane.f32.xlu0 %v62_v62 }
 0x388   :  { %v196_v63 = vpop.xlane.xlu1 %195 }
 0x389   :  { %1986 = vrcp.f32 %v196_v63 }
 0x38f   :  { %v1987_v0 = vpop.eup %1986 }
 0x390   :  { %v264_v1 = vpop.xlane.xlu0 %263  ;;  %v198_v2 = vmul.f32 %v1987_v0, %v1983_v56 }
 0x391   :  { %1988 = vrcp.f32 %v264_v1 }
 0x392   :  { %1857 = vmatmul.msk.f32.vlgmr.msra.gmra.mxu2 %vm160_vm5, %v198_v2  ;;  %v2314_v2 = vperm.slane %v2233_v40, 1 }
 0x397   :  { %v1989_v3 = vpop.eup %1988 }
 0x398   :  { %v266_v4 = vmul.f32 %v1989_v3, %v1985_v59 }
 0x39a   :  { %1860 = vmatmul.msk.f32.vlgmr.msrb.gmra.mxu2 %vm160_vm5, %v266_v4 }
 0x3a0   :  { %v375_v6 = vpop.permute.xlu1 %374 }
 0x3a1   :  { %1864 = vmatpush.xpose.msk.msra.mxu2 %vm160_vm5, %v375_v6 }
 0x3a3   :  { %v302_v9 = vpop.permute.xlu0 %301 }
 0x3a4   :  { %1861 = vmatpush.xpose.msk.msra.mxu1 %vm160_vm5, %v302_v9  ;;  %1865 = vmatmul.msk.f32.vlgmr.msra.gmra.mxu2 %vm160_vm5, %v373_v7 }
 0x3a7   :  { %1862 = vmatmul.msk.f32.vlgmr.msra.gmra.mxu1 %vm160_vm5, %v300_v5 }
 0x3ce   :  { %v64_v10 = vpop.xlane.xlu0 %63 }
 0x3cf   :  { %v73_v11 = vmul.f32 %v2176_v8, %v64_v10 }
 0x3d1   :  { %v75_v12 = vsub.f32 %v55_v61, %v73_v11 }
 0x3d3   :  { %v77_v13 = vmul.f32 %v75_v12, %v75_v12 }
 0x3d5   :  { %v81_v14 = vsel %vm58_vm0, %v77_v13, 0.0 }
 0x3d6   :  { %82 = vadd.xlane.f32.xlu1 %v81_v14 }
 0x3ef   :  { %340 = vrot.lane.b32.xlu1 %v2215_v35, %s2082_s23 }
 0x415   :  { %v222_v15 = vpop.f32.mrf.mxu2 }
 0x416   :  { %225 = vst.msk [vmem:[#allocation2] sm:$0xff] %vm160_vm5, %v222_v15 }
 0x424   :  { %v324_v16 = vpop.f32.mrf.mxu1 }
 0x425   :  { %v327_v17 = vmul.f32 0.35355338, %v324_v16 }
 0x427   :  { %v328_v18 = vadd.f32 %v327_v17, %v2236_v41 }
 0x429   :  { %v329_v19 = vsel %vm160_vm5, %v328_v18, -inf }
 0x42a   :  { %330 = vmax.xlane.f32.xlu2 %v329_v19 }
 0x449   :  { %v83_v20 = vpop.xlane.xlu1 %82 }
 0x44a   :  { %v85_v21 = vmul.f32 %v83_v20, %v2176_v8 }
 0x44c   :  { %v87_v22 = vadd.f32 1e-12, %v85_v21 }
 0x44e   :  { %1990 = vrsqrt.f32 %v87_v22  ;;  %vm104_vm7 = vweird.f32 %v87_v22 }
 0x454   :  { %v1991_v23 = vpop.eup %1990 }
 0x455   :  { %v99_v24 = vmul.f32 %v1991_v23, %v87_v22  ;;  %vm105_vm6 = vweird.f32 %v1991_v23 }
 0x456   :  { %vm106_vm8 = vmor %vm104_vm7, %vm105_vm6 }
 0x457   :  { %v100_v25 = vmul.f32 %v1991_v23, %v99_v24 }
 0x459   :  { %v101_v26 = vmul.f32 0.5, %v100_v25 }
 0x45b   :  { %v102_v28 = vsub.f32 1.5, %v101_v26 }
 0x45d   :  { %v103_v29 = vmul.f32 %v1991_v23, %v102_v28 }
 0x45f   :  { %v107_v31 = vsel %vm106_vm8, %v1991_v23, %v103_v29 }
 0x460   :  { %v109_v34 = vmul.f32 %v107_v31, %v75_v12 }
 0x461   :  { %v341_v36 = vpop.permute.xlu1 %340 }
 0x462   :  { %361 = vmatpush.msra.mxu3 %v341_v36  ;;  %v114_v37 = vmul.f32 %v2196_v27, %v109_v34 }
 0x464   :  { %v2274_v38 = vadd.f32 %v2201_v30, %v114_v37  ;;  %v290_v30 = vpop.f32.mrf.mxu2 }
 0x466   :  { %1854 = vmatmul.msk.f32.gmra.mxu0 %vm58_vm0, %v2274_v38 }
 0x49d   :  { %v331_v39 = vpop.xlane.xlu2 %330 }
 0x49e   :  { %v332_v42 = vsub.f32 %v328_v18, %v331_v39 }
 0x4a0   :  { %v333_v43 = vmul.f32 1.442695, %v332_v42 }
 0x4a2   :  { %1992 = vpow2.f32 %v333_v43 }
 0x4a8   :  { %v1993_v44 = vpop.eup %1992 }
 0x4a9   :  { %v335_v45 = vsel %vm160_vm5, %v1993_v44, 0.0 }
 0x4aa   :  { %336 = vadd.xlane.f32.xlu0 %v335_v45 }
 0x4be   :  { %413 = vrot.lane.b32.xlu0 %v2215_v35, %s2083_s19 }
 0x4e3   :  { %v154_v46 = vpop.f32.mrf.mxu0 }
 0x4e4   :  { %v2282_v27 = vadd.f32 %v2212_v33, %v154_v46  ;;  %v397_v33 = vpop.f32.mrf.mxu2 }
 0x4e5   :  { %v400_v35 = vmul.f32 0.35355338, %v397_v33  ;;  %v733_v33 = vld [vmem:[%s2736_s6 + $0x10] sm:$0xff] }
 0x4e6   :  { %513 = vrot.lane.b32.xlu1 %v2282_v27, %s2074_s3  ;;  %515 = vrot.lane.b32.xlu0 %v2282_v27, %s2076_s25 }
 0x4e7   :  { %446 = vrot.lane.b32.xlu2 %v2282_v27, %s2075_s24  ;;  %v401_v47 = vadd.f32 %v400_v35, %v2236_v41  ;;  %v732_v35 = vld [vmem:[%s2736_s6 + $0x8] sm:$0xff] }
 0x4e9   :  { %v402_v48 = vsel %vm160_vm5, %v401_v47, -inf }
 0x4ee   :  { %585 = vrot.lane.b32.xlu1 %v2282_v27, %s2751_s1  ;;  %s2761_s1 = smov 72  }
 0x4ef   :  { %659 = vrot.lane.b32.xlu2 %v2282_v27, %s2753_s30  ;;  %s2764_s30 = smov 104  }
 0x4f7   :  { %294 = vrot.lane.b32.xlu2 %v290_v30, %s2084_s20  ;;  %v734_v30 = vld [vmem:[%s2736_s6 + $0x18] sm:$0xff] }
 0x510   :  { %403 = vmax.xlane.f32.xlu0 %v402_v48 }
 0x51d   :  { %v337_v49 = vpop.xlane.xlu0 %336 }
 0x51e   :  { %1994 = vrcp.f32 %v337_v49 }
 0x524   :  { %v1995_v50 = vpop.eup %1994  ;;  %587 = vrot.lane.b32.xlu0 %v2282_v27, %s2081_s0 }
 0x525   :  { %v339_v51 = vmul.f32 %v1995_v50, %v1993_v44 }
 0x527   :  { %1863 = vmatmul.msk.f32.vlgmr.msra.gmra.mxu3 %vm160_vm5, %v339_v51 }
 0x530   :  { %v414_v52 = vpop.permute.xlu0 %413 }
 0x531   :  { %434 = vmatpush.msrb.mxu1 %v414_v52 }
 0x541   :  { %v447_v53 = vpop.permute.xlu2 %446 }
 0x542   :  { %1867 = vmatpush.xpose.msk.msrb.mxu3 %vm160_vm5, %v447_v53 }
 0x545   :  { %1868 = vmatmul.msk.f32.vlgmr.msrb.gmra.mxu3 %vm160_vm5, %v2282_v27 }
 0x549   :  { %v660_v54 = vpop.permute.xlu2 %659 }
 0x551   :  { %v295_v55 = vpop.permute.xlu2 %294 }
 0x552   :  { %298 = vst.msk [vmem:[#allocation2] sm:$0xff] %vm297_vm9, %v295_v55 }
 0x558   :  { %v516_v56 = vpop.permute.xlu0 %515  ;;  %v514_v57 = vpop.permute.xlu1 %513 }
 0x559   :  { %1870 = vmatpush.xpose.msk.msrb.mxu2 %vm160_vm5, %v516_v56 }
 0x55c   :  { %1871 = vmatmul.msk.f32.vlgmr.msrb.gmra.mxu2 %vm160_vm5, %v514_v57 }
 0x55d   :  { %1876 = vmatpush.xpose.msk.msra.mxu2 %vm160_vm5, %v660_v54 }
 0x560   :  { %v586_v0 = vpop.permute.xlu1 %585 }
 0x583   :  { %v404_v58 = vpop.xlane.xlu0 %403 }
 0x584   :  { %v405_v59 = vsub.f32 %v401_v47, %v404_v58  ;;  %v731_v47 = vld [vmem:[%s2736_s6] sm:$0xff] }
 0x586   :  { %v406_v60 = vmul.f32 1.442695, %v405_v59 }
 0x588   :  { %1996 = vpow2.f32 %v406_v60 }
 0x58e   :  { %v1997_v61 = vpop.eup %1996 }
 0x58f   :  { %v408_v62 = vsel %vm160_vm5, %v1997_v61, 0.0 }
 0x590   :  { %409 = vadd.xlane.f32.xlu0 %v408_v62 }
 0x596   :  { %v588_v63 = vpop.permute.xlu0 %587 }
 0x597   :  { %1873 = vmatpush.xpose.msk.msra.mxu3 %vm160_vm5, %v588_v63 }
 0x59a   :  { %1874 = vmatmul.msk.f32.vlgmr.msra.gmra.mxu3 %vm160_vm5, %v586_v0 }
 0x59b   :  { %757 = vmatpush.msrb.mxu3 %v734_v30 }
 0x59d   :  { %758 = vmatpush.msrb.mxu3 %v733_v33 }
 0x59f   :  { %759 = vmatpush.msrb.mxu3 %v732_v35 }
 0x5a1   :  { %760 = vmatpush.msrb.mxu3 %v731_v47 }
 0x5a4   :  { %657 = vrot.lane.b32.xlu0 %v2282_v27, %s2747_s29  ;;  %s2763_s29 = smov 64  }
 0x5aa   :  { %v363_v1 = vpop.f32.mrf.mxu3 }
 0x5ab   :  { %367 = vrot.lane.b32.xlu1 %v363_v1, %s2755_s21 }
 0x5c8   :  { %v469_v3 = vpop.f32.mrf.mxu3 }
 0x5c9   :  { %v472_v4 = vmul.f32 0.35355338, %v469_v3 }
 0x5cb   :  { %v474_v5 = vadd.f32 %v2314_v2, %v472_v4 }
 0x5cd   :  { %v475_v6 = vsel %vm160_vm5, %v474_v5, -inf }
 0x5ce   :  { %476 = vmax.xlane.f32.xlu2 %v475_v6 }
 0x5df   :  { %v538_v7 = vpop.f32.mrf.mxu2 }
 0x5e0   :  { %v541_v9 = vmul.f32 0.35355338, %v538_v7 }
 0x5e2   :  { %v542_v10 = vadd.f32 %v541_v9, %v2314_v2 }
 0x5e4   :  { %v543_v11 = vsel %vm160_vm5, %v542_v10, -inf }
 0x5e5   :  { %544 = vmax.xlane.f32.xlu1 %v543_v11 }
 0x603   :  { %v410_v12 = vpop.xlane.xlu0 %409 }
 0x604   :  { %1998 = vrcp.f32 %v410_v12 }
 0x60a   :  { %v1999_v13 = vpop.eup %1998 }
 0x60b   :  { %v412_v14 = vmul.f32 %v1999_v13, %v1997_v61  ;;  %v2362_v61 = vld [vmem:[%s2735_s7] ss:$0 sm:$0xff] }
 0x60d   :  { %1866 = vmatmul.msk.f32.vlgmr.msrb.gmra.mxu1 %vm160_vm5, %v412_v14 }
 0x616   :  { %v658_v40 = vpop.permute.xlu0 %657 }
 0x617   :  { %1877 = vmatmul.msk.f32.vlgmr.msra.gmra.mxu2 %vm160_vm5, %v658_v40 }
 0x61d   :  { %v368_v15 = vpop.permute.xlu1 %367  ;;  %v610_v36 = vpop.f32.mrf.mxu3 }
 0x61e   :  { %371 = vst.msk [vmem:[#allocation2] sm:$0xff] %vm370_vm10, %v368_v15  ;;  %v613_v37 = vmul.f32 0.35355338, %v610_v36 }
 0x620   :  { %v614_v39 = vadd.f32 %v613_v37, %v2314_v2 }
 0x622   :  { %v615_v42 = vsel %vm160_vm5, %v614_v39, -inf }
 0x641   :  { %v477_v16 = vpop.xlane.xlu2 %476 }
 0x642   :  { %v478_v17 = vsub.f32 %v474_v5, %v477_v16 }
 0x644   :  { %v479_v18 = vmul.f32 1.442695, %v478_v17 }
 0x646   :  { %2000 = vpow2.f32 %v479_v18 }
 0x64c   :  { %v2001_v19 = vpop.eup %2000 }
 0x64d   :  { %v481_v20 = vsel %vm160_vm5, %v2001_v19, 0.0 }
 0x64e   :  { %482 = vadd.xlane.f32.xlu1 %v481_v20 }
 0x658   :  { %v545_v22 = vpop.xlane.xlu1 %544 }
 0x659   :  { %v546_v23 = vsub.f32 %v542_v10, %v545_v22  ;;  %v828_v22 = vld [vmem:[%s2740_s10 + $0x10] sm:$0xff] }
 0x65b   :  { %v547_v24 = vmul.f32 1.442695, %v546_v23  ;;  %v827_v23 = vld [vmem:[%s2740_s10 + $0x8] sm:$0xff] }
 0x65d   :  { %2002 = vpow2.f32 %v547_v24  ;;  %v826_v24 = vld [vmem:[%s2740_s10] sm:$0xff] }
 0x663   :  { %v2329_v31 = vpop.eup %2002 }
 0x664   :  { %v549_v34 = vsel %vm160_vm5, %v2329_v31, 0.0 }
 0x667   :  { %486 = vrot.lane.b32.xlu1 %v2282_v27, %s2749_s2 }
 0x68a   :  { %v436_v21 = vpop.f32.mrf.mxu1 }
 0x68b   :  { %440 = vrot.lane.b32.xlu0 %v436_v21, %s2757_s22  ;;  %v829_v21 = vld [vmem:[%s2740_s10 + $0x18] sm:$0xff] }
 0x69a   :  { %v682_v25 = vpop.f32.mrf.mxu2 }
 0x69b   :  { %v685_v26 = vmul.f32 0.35355338, %v682_v25 }
 0x69d   :  { %v686_v28 = vadd.f32 %v685_v26, %v2314_v2 }
 0x69f   :  { %v687_v29 = vsel %vm160_vm5, %v686_v28, -inf }
 0x6a0   :  { %688 = vmax.xlane.f32.xlu2 %v687_v29 }
 0x6a8   :  { %550 = vadd.xlane.f32.xlu2 %v549_v34 }
 0x6b5   :  { %616 = vmax.xlane.f32.xlu0 %v615_v42  ;;  %v2392_v42 = vld [vmem:[%s2737_s8] ss:$0 sm:$0xff] }
 0x6c1   :  { %v483_v43 = vpop.xlane.xlu1 %482 }
 0x6c2   :  { %2004 = vrcp.f32 %v483_v43 }
 0x6c8   :  { %v2005_v44 = vpop.eup %2004 }
 0x6c9   :  { %v485_v46 = vmul.f32 %v2005_v44, %v2001_v19 }
 0x6d9   :  { %v487_v45 = vpop.permute.xlu1 %486 }
 0x6da   :  { %507 = vmatpush.msrb.mxu0 %v487_v45  ;;  %v2397_v45 = vld [vmem:[%s2738_s9] ss:$0 sm:$0xff] }
 0x6db   :  { %1869 = vmatmul.msk.f32.vlgmr.msrb.gmra.mxu0 %vm160_vm5, %v485_v46 }
 0x6fd   :  { %v441_v48 = vpop.permute.xlu0 %440 }
 0x6fe   :  { %444 = vst.msk [vmem:[#allocation2] sm:$0xff] %vm443_vm11, %v441_v48 }
 0x705   :  { %v729_v49 = vld [vmem:[#allocation2] sm:$0xff] }
 0x706   :  { %1879 = vmatmul.msk.f32.vlgmr.msrb.gmra.mxu3 %vm58_vm0, %v729_v49  ;;  %v888_v49 = vld [vmem:[%s2741_s12 + $0x38] sm:$0xff] }
 0x707   :  { %908 = vmatpush.msrb.mxu2 %v888_v49 }
 0x713   :  { %v689_v50 = vpop.xlane.xlu2 %688 }
 0x714   :  { %v690_v51 = vsub.f32 %v686_v28, %v689_v50  ;;  %v887_v50 = vld [vmem:[%s2741_s12 + $0x30] sm:$0xff] }
 0x715   :  { %909 = vmatpush.msrb.mxu2 %v887_v50 }
 0x716   :  { %v691_v52 = vmul.f32 1.442695, %v690_v51  ;;  %v886_v51 = vld [vmem:[%s2741_s12 + $0x28] sm:$0xff] }
 0x717   :  { %910 = vmatpush.msrb.mxu2 %v886_v51 }
 0x718   :  { %2006 = vpow2.f32 %v691_v52  ;;  %v885_v52 = vld [vmem:[%s2741_s12 + $0x20] sm:$0xff] }
 0x719   :  { %911 = vmatpush.msrb.mxu2 %v885_v52 }
 0x71b   :  { %v551_v0 = vpop.xlane.xlu2 %550 }
 0x71e   :  { %v2007_v53 = vpop.eup %2006 }
 0x71f   :  { %v693_v54 = vsel %vm160_vm5, %v2007_v53, 0.0 }
 0x720   :  { %694 = vadd.xlane.f32.xlu2 %v693_v54  ;;  %v883_v54 = vld [vmem:[%s2741_s12 + $0x10] sm:$0xff] }
 0x728   :  { %v617_v55 = vpop.xlane.xlu0 %616 }
 0x729   :  { %v618_v56 = vsub.f32 %v614_v39, %v617_v55  ;;  %v882_v55 = vld [vmem:[%s2741_s12 + $0x8] sm:$0xff] }
 0x72b   :  { %v619_v57 = vmul.f32 1.442695, %v618_v56  ;;  %v881_v56 = vld [vmem:[%s2741_s12] sm:$0xff] }
 0x72d   :  { %2008 = vpow2.f32 %v619_v57  ;;  %v2433_v57 = vld [vmem:[%s2739_s11] ss:$0 sm:$0xff] }
 0x733   :  { %v2009_v58 = vpop.eup %2008 }
 0x734   :  { %v621_v59 = vsel %vm160_vm5, %v2009_v58, 0.0 }
 0x735   :  { %622 = vadd.xlane.f32.xlu0 %v621_v59 }
 0x738   :  { %626 = vrot.lane.b32.xlu2 %v2282_v27, %s2082_s23 }
 0x749   :  { %554 = vrot.lane.b32.xlu0 %v2282_v27, %s2077_s28 }
 0x751   :  { %698 = vrot.lane.b32.xlu0 %v2282_v27, %s2083_s19 }
 0x758   :  { %v509_v60 = vpop.f32.mrf.mxu0 }
 0x759   :  { %512 = vst.msk [vmem:[#allocation2 + $0x8] sm:$0xff] %vm160_vm5, %v509_v60 }
 0x789   :  { %v762_v62 = vpop.f32.mrf.mxu3 }
 0x78a   :  { %v763_v63 = vadd.f32 %v2362_v61, %v762_v62 }
 0x78c   :  { %v768_v1 = vadd.f32 %v763_v63, %v2205_v32 }
 0x78e   :  { %v772_v3 = vsel %vm58_vm0, %v768_v1, 0.0 }
 0x78f   :  { %773 = vadd.xlane.f32.xlu1 %v772_v3 }
 0x793   :  { %v695_v4 = vpop.xlane.xlu2 %694 }
 0x79b   :  { %v627_v5 = vpop.permute.xlu2 %626 }
 0x79c   :  { %647 = vmatpush.msra.mxu0 %v627_v5 }
 0x79e   :  { %852 = vmatpush.msrb.mxu0 %v829_v21 }
 0x7a0   :  { %853 = vmatpush.msrb.mxu0 %v828_v22 }
 0x7a2   :  { %854 = vmatpush.msrb.mxu0 %v827_v23 }
 0x7a4   :  { %855 = vmatpush.msrb.mxu0 %v826_v24 }
 0x7a8   :  { %v623_v27 = vpop.xlane.xlu0 %622 }
 0x7a9   :  { %2010 = vrcp.f32 %v623_v27 }
 0x7aa   :  { %2012 = vrcp.f32 %v551_v0 }
 0x7ab   :  { %2014 = vrcp.f32 %v695_v4 }
 0x7af   :  { %v2011_v6 = vpop.eup %2010 }
 0x7b0   :  { %v625_v7 = vmul.f32 %v2011_v6, %v2009_v58  ;;  %v2013_v9 = vpop.eup %2012 }
 0x7b1   :  { %v553_v10 = vmul.f32 %v2013_v9, %v2329_v31  ;;  %v2015_v32 = vpop.eup %2014 }
 0x7b2   :  { %1875 = vmatmul.msk.f32.vlgmr.msra.gmra.mxu0 %vm160_vm5, %v625_v7  ;;  %v697_v12 = vmul.f32 %v2015_v32, %v2007_v53  ;;  %v884_v53 = vld [vmem:[%s2741_s12 + $0x18] sm:$0xff] }
 0x7b3   :  { %912 = vmatpush.msrb.mxu2 %v884_v53  ;;  %v2471_v53 = vld [vmem:[%s2743_s14] ss:$0 sm:$0xff] }
 0x7b5   :  { %913 = vmatpush.msrb.mxu2 %v883_v54 }
 0x7b7   :  { %914 = vmatpush.msrb.mxu2 %v882_v55 }
 0x7b9   :  { %915 = vmatpush.msrb.mxu2 %v881_v56  ;;  %v2476_v56 = vld [vmem:[%s2744_s15] ss:$0 sm:$0xff] }
 0x7bb   :  { %v555_v11 = vpop.permute.xlu0 %554 }
 0x7bc   :  { %575 = vmatpush.msra.mxu1 %v555_v11 }
 0x7bd   :  { %1872 = vmatmul.msk.f32.vlgmr.msra.gmra.mxu1 %vm160_vm5, %v553_v10 }
 0x7c3   :  { %v699_v13 = vpop.permute.xlu0 %698 }
 0x7c4   :  { %719 = vmatpush.msrb.mxu1 %v699_v13 }
 0x7c5   :  { %1878 = vmatmul.msk.f32.vlgmr.msrb.gmra.mxu1 %vm160_vm5, %v697_v12 }
 0x802   :  { %v774_v14 = vpop.xlane.xlu1 %773 }
 0x803   :  { %v778_v40 = vmul.f32 %v774_v14, %v2176_v8  ;;  %v2444_v14 = vld [vmem:[%s2742_s13] ss:$0 sm:$0xff] }
 0x805   :  { %v780_v15 = vsub.f32 %v768_v1, %v778_v40 }
 0x807   :  { %v782_v16 = vmul.f32 %v780_v15, %v780_v15 }
 0x809   :  { %v784_v17 = vsel %vm58_vm0, %v782_v16, 0.0 }
 0x80a   :  { %785 = vadd.xlane.f32.xlu0 %v784_v17 }
 0x82f   :  { %v649_v19 = vpop.f32.mrf.mxu0 }
 0x83a   :  { %v577_v18 = vpop.f32.mrf.mxu1 }
 0x83b   :  { %581 = vrot.lane.b32.xlu2 %v577_v18, %s2084_s20 }
 0x842   :  { %v721_v20 = vpop.f32.mrf.mxu1 }
 0x843   :  { %653 = vrot.lane.b32.xlu2 %v649_v19, %s2755_s21 }
 0x84b   :  { %725 = vrot.lane.b32.xlu2 %v721_v20, %s2757_s22 }
 0x87d   :  { %v786_v25 = vpop.xlane.xlu0 %785 }
 0x87e   :  { %v790_v26 = vmul.f32 %v786_v25, %v2176_v8 }
 0x880   :  { %v792_v28 = vadd.f32 1e-12, %v790_v26 }
 0x882   :  { %2016 = vrsqrt.f32 %v792_v28  ;;  %vm800_vm13 = vweird.f32 %v792_v28 }
 0x888   :  { %v2017_v29 = vpop.eup %2016 }
 0x889   :  { %v795_v31 = vmul.f32 %v2017_v29, %v792_v28  ;;  %vm801_vm12 = vweird.f32 %v2017_v29 }
 0x88a   :  { %vm802_vm14 = vmor %vm800_vm13, %vm801_vm12 }
 0x88b   :  { %v796_v34 = vmul.f32 %v2017_v29, %v795_v31 }
 0x88d   :  { %v797_v36 = vmul.f32 0.5, %v796_v34 }
 0x88f   :  { %v798_v37 = vsub.f32 1.5, %v797_v36 }
 0x891   :  { %v799_v39 = vmul.f32 %v2017_v29, %v798_v37 }
 0x893   :  { %v803_v43 = vsel %vm802_vm14, %v2017_v29, %v799_v39 }
 0x894   :  { %v814_v44 = vmul.f32 %v803_v43, %v780_v15 }
 0x895   :  { %v582_v46 = vpop.permute.xlu2 %581 }
 0x896   :  { %v819_v30 = vmul.f32 %v2392_v42, %v814_v44  ;;  %584 = vst.msk [vmem:[#allocation2 + $0x8] sm:$0xff] %vm297_vm9, %v582_v46  ;;  %v1888_v44 = vld [vmem:[%s2733_s4 + $0x38] sm:$0xff]  ;;  %v1887_v46 = vld [vmem:[%s2733_s4 + $0x30] sm:$0xff] }
 0x897   :  { %1009 = vmatpush.msra.mxu1 %v1888_v44 }
 0x898   :  { %v824_v33 = vadd.f32 %v2397_v45, %v819_v30  ;;  %v1886_v30 = vld [vmem:[%s2733_s4 + $0x28] sm:$0xff] }
 0x899   :  { %1010 = vmatpush.msra.mxu1 %v1887_v46 }
 0x89a   :  { %1881 = vmatmul.msk.f32.vlgmr.msrb.gmra.mxu0 %vm58_vm0, %v824_v33 }
 0x89b   :  { %1011 = vmatpush.msra.mxu1 %v1886_v30 }
 0x89d   :  { %v654_v35 = vpop.permute.xlu2 %653 }
 0x89e   :  { %656 = vst.msk [vmem:[#allocation2 + $0x8] sm:$0xff] %vm370_vm10, %v654_v35 }
 0x8a5   :  { %v726_v47 = vpop.permute.xlu2 %725 }
 0x8a6   :  { %728 = vst.msk [vmem:[#allocation2 + $0x8] sm:$0xff] %vm443_vm11, %v726_v47 }
 0x8ad   :  { %v730_v48 = vld [vmem:[#allocation2 + $0x8] sm:$0xff] }
 0x8ae   :  { %1880 = vmatmul.msk.f32.gmra.mxu3 %vm58_vm0, %v730_v48 }
 0x917   :  { %v857_v58 = vpop.f32.mrf.mxu0 }
 0x918   :  { %v858_v59 = vadd.f32 %v2433_v57, %v857_v58 }
 0x91a   :  { %v865_v60 = vmul.f32 0.044715, %v858_v59  ;;  %v863_v4 = vmul.f32 0.5, %v858_v59 }
 0x91c   :  { %v867_v62 = vmul.f32 %v865_v60, %v858_v59 }
 0x91e   :  { %v869_v63 = vmul.f32 %v867_v62, %v858_v59 }
 0x920   :  { %v871_v0 = vadd.f32 %v869_v63, %v858_v59 }
 0x922   :  { %v873_v1 = vmul.f32 0.7978846, %v871_v0 }
 0x924   :  { %2018 = vtanh.f32 %v873_v1 }
 0x92a   :  { %v2019_v3 = vpop.eup %2018 }
 0x92b   :  { %v877_v5 = vadd.f32 1.0, %v2019_v3 }
 0x92d   :  { %v879_v27 = vmul.f32 %v877_v5, %v863_v4 }
 0x92f   :  { %1883 = vmatmul.msk.f32.vlgmr.msrb.gmra.mxu2 %vm893_vm15, %v879_v27 }
 0x931   :  { %v765_v6 = vpop.f32.mrf.mxu3 }
 0x932   :  { %v766_v7 = vadd.f32 %v2362_v61, %v765_v6 }
 0x934   :  { %v769_v9 = vadd.f32 %v766_v7, %v2274_v38 }
 0x936   :  { %v775_v10 = vsel %vm58_vm0, %v769_v9, 0.0 }
 0x937   :  { %776 = vadd.xlane.f32.xlu2 %v775_v10 }
 0x9aa   :  { %v777_v11 = vpop.xlane.xlu2 %776 }
 0x9ab   :  { %v779_v32 = vmul.f32 %v777_v11, %v2176_v8 }
 0x9ad   :  { %v781_v12 = vsub.f32 %v769_v9, %v779_v32 }
 0x9af   :  { %v783_v13 = vmul.f32 %v781_v12, %v781_v12 }
 0x9b1   :  { %v787_v40 = vsel %vm58_vm0, %v783_v13, 0.0 }
 0x9b2   :  { %788 = vadd.xlane.f32.xlu1 %v787_v40  ;;  %v917_v15 = vpop.f32.mrf.mxu2 }
 0x9b3   :  { %v918_v61 = vadd.f32 %v2444_v14, %v917_v15 }
 0x9b5   :  { %v923_v38 = vadd.f32 %v918_v61, %v824_v33 }
 0x9b7   :  { %v927_v16 = vsel %vm58_vm0, %v923_v38, 0.0 }
 0x9b8   :  { %928 = vadd.xlane.f32.xlu0 %v927_v16 }
 0xa25   :  { %v789_v17 = vpop.xlane.xlu1 %788 }
 0xa26   :  { %v791_v18 = vmul.f32 %v789_v17, %v2176_v8 }
 0xa28   :  { %v793_v19 = vadd.f32 1e-12, %v791_v18 }
 0xa2a   :  { %2020 = vrsqrt.f32 %v793_v19  ;;  %vm810_vm2 = vweird.f32 %v793_v19 }
 0xa2b   :  { %v929_v20 = vpop.xlane.xlu0 %928 }
 0xa2c   :  { %v933_v21 = vmul.f32 %v929_v20, %v2176_v8 }
 0xa2e   :  { %v935_v22 = vsub.f32 %v923_v38, %v933_v21 }
 0xa30   :  { %v2021_v23 = vpop.eup %2020  ;;  %v937_v24 = vmul.f32 %v935_v22, %v935_v22 }
 0xa31   :  { %v805_v25 = vmul.f32 %v2021_v23, %v793_v19  ;;  %vm811_vm1 = vweird.f32 %v2021_v23 }
 0xa32   :  { %v939_v26 = vsel %vm58_vm0, %v937_v24, 0.0  ;;  %vm812_vm3 = vmor %vm810_vm2, %vm811_vm1 }
 0xa33   :  { %v806_v28 = vmul.f32 %v2021_v23, %v805_v25  ;;  %940 = vadd.xlane.f32.xlu1 %v939_v26 }
 0xa35   :  { %v807_v29 = vmul.f32 0.5, %v806_v28 }
 0xa37   :  { %v808_v31 = vsub.f32 1.5, %v807_v29 }
 0xa39   :  { %v809_v34 = vmul.f32 %v2021_v23, %v808_v31 }
 0xa3b   :  { %v813_v36 = vsel %vm812_vm3, %v2021_v23, %v809_v34 }
 0xa3c   :  { %v815_v37 = vmul.f32 %v813_v36, %v781_v12 }
 0xa3e   :  { %v820_v39 = vmul.f32 %v2392_v42, %v815_v37  ;;  %v1885_v42 = vld [vmem:[%s2733_s4 + $0x20] sm:$0xff] }
 0xa3f   :  { %1012 = vmatpush.msra.mxu1 %v1885_v42 }
 0xa40   :  { %v825_v43 = vadd.f32 %v2397_v45, %v820_v39 }
 0xa42   :  { %1882 = vmatmul.msk.f32.gmra.mxu0 %vm58_vm0, %v825_v43 }
 0xaa6   :  { %v941_v45 = vpop.xlane.xlu1 %940 }
 0xaa7   :  { %v945_v33 = vmul.f32 %v941_v45, %v2176_v8 }
 0xaa9   :  { %v947_v35 = vadd.f32 1e-12, %v945_v33 }
 0xaab   :  { %2022 = vrsqrt.f32 %v947_v35  ;;  %vm955_vm6 = vweird.f32 %v947_v35 }
 0xab1   :  { %v2023_v47 = vpop.eup %2022 }
 0xab2   :  { %v950_v48 = vmul.f32 %v2023_v47, %v947_v35  ;;  %vm956_vm4 = vweird.f32 %v2023_v47 }
 0xab3   :  { %vm957_vm7 = vmor %vm955_vm6, %vm956_vm4 }
 0xab4   :  { %v951_v49 = vmul.f32 %v2023_v47, %v950_v48 }
 0xab6   :  { %v952_v50 = vmul.f32 0.5, %v951_v49 }
 0xab8   :  { %v953_v51 = vsub.f32 1.5, %v952_v50 }
 0xaba   :  { %v954_v52 = vmul.f32 %v2023_v47, %v953_v51 }
 0xabc   :  { %v958_v54 = vsel %vm957_vm7, %v2023_v47, %v954_v52 }
 0xabd   :  { %v969_v55 = vmul.f32 %v958_v54, %v935_v22 }
 0xabf   :  { %v974_v58 = vmul.f32 %v2471_v53, %v969_v55  ;;  %v860_v59 = vpop.f32.mrf.mxu0 }
 0xac0   :  { %v861_v60 = vadd.f32 %v2433_v57, %v860_v59  ;;  %v1970_v57 = vld [vmem:[%s2732_s5 + $0x1] ss:$0 sm:$0xff]  ;;  %s2762_s5 = smov 112  }
 0xac1   :  { %v2481_v62 = vadd.f32 %v2476_v56, %v974_v58 }
 0xac2   :  { %v866_v63 = vmul.f32 0.044715, %v861_v60  ;;  %v864_v27 = vmul.f32 0.5, %v861_v60 }
 0xac3   :  { %1890 = vmatmul.msk.f32.vlgmr.msra.gmra.mxu1 %vm58_vm0, %v2481_v62 }
 0xac4   :  { %v868_v0 = vmul.f32 %v866_v63, %v861_v60 }
 0xac6   :  { %v870_v1 = vmul.f32 %v868_v0, %v861_v60 }
 0xac8   :  { %v872_v3 = vadd.f32 %v870_v1, %v861_v60 }
 0xaca   :  { %v874_v4 = vmul.f32 0.7978846, %v872_v3 }
 0xacc   :  { %2024 = vtanh.f32 %v874_v4 }
 0xad2   :  { %v2025_v5 = vpop.eup %2024 }
 0xad3   :  { %v878_v6 = vadd.f32 1.0, %v2025_v5 }
 0xad5   :  { %v880_v7 = vmul.f32 %v878_v6, %v864_v27 }
 0xad7   :  { %1884 = vmatmul.msk.f32.gmra.mxu2 %vm893_vm15, %v880_v7 }
 0xb40   :  { %v1014_v9 = vpop.f32.mrf.mxu1 }
 0xb41   :  { %v2489_v10 = vadd.f32 %v1970_v57, %v1014_v9 }
 0xb43   :  { %1087 = vrot.lane.b32.xlu2 %v2489_v10, %s2074_s3  ;;  %1021 = vrot.lane.b32.xlu0 %v2489_v10, %s2075_s24 }
 0xb4b   :  { %1089 = vrot.lane.b32.xlu0 %v2489_v10, %s2076_s25 }
 0xb53   :  { %1161 = vrot.lane.b32.xlu0 %v2489_v10, %s2081_s0 }
 0xb5a   :  { %v920_v11 = vpop.f32.mrf.mxu2 }
 0xb5b   :  { %v921_v32 = vadd.f32 %v2444_v14, %v920_v11  ;;  %1233 = vrot.lane.b32.xlu0 %v2489_v10, %s2761_s1 }
 0xb5d   :  { %v924_v12 = vadd.f32 %v921_v32, %v825_v43 }
 0xb5f   :  { %v930_v13 = vsel %vm58_vm0, %v924_v12, 0.0 }
 0xb60   :  { %931 = vadd.xlane.f32.xlu1 %v930_v13 }
 0xb63   :  { %1159 = vrot.lane.b32.xlu0 %v2489_v10, %s2762_s5 }
 0xb9d   :  { %v1088_v30 = vpop.permute.xlu2 %1087 }
 0xbb5   :  { %v1022_v40 = vpop.permute.xlu0 %1021 }
 0xbb6   :  { %1892 = vmatpush.xpose.msk.msra.mxu3 %vm160_vm5, %v1022_v40 }
 0xbb9   :  { %1893 = vmatmul.msk.f32.vlgmr.msra.gmra.mxu3 %vm160_vm5, %v2489_v10 }
 0xbbd   :  { %v1090_v15 = vpop.permute.xlu0 %1089 }
 0xbbe   :  { %1895 = vmatpush.xpose.msk.msrb.mxu1 %vm160_vm5, %v1090_v15 }
 0xbc5   :  { %v1162_v14 = vpop.permute.xlu0 %1161 }
 0xbcd   :  { %v1234_v61 = vpop.permute.xlu0 %1233 }
 0xbce   :  { %1901 = vmatpush.xpose.msk.msra.mxu1 %vm160_vm5, %v1234_v61 }
 0xbd3   :  { %v932_v38 = vpop.xlane.xlu1 %931 }
 0xbd4   :  { %v934_v16 = vmul.f32 %v932_v38, %v2176_v8 }
 0xbd5   :  { %v1160_v58 = vpop.permute.xlu0 %1159 }
 0xbd6   :  { %v936_v17 = vsub.f32 %v924_v12, %v934_v16 }
 0xbd8   :  { %v938_v18 = vmul.f32 %v936_v17, %v936_v17 }
 0xbda   :  { %v942_v19 = vsel %vm58_vm0, %v938_v18, 0.0 }
 0xbdb   :  { %943 = vadd.xlane.f32.xlu1 %v942_v19 }
 0xc3c   :  { %v1044_v20 = vpop.f32.mrf.mxu3 }
 0xc3d   :  { %v1047_v21 = vmul.f32 0.35355338, %v1044_v20 }
 0xc3f   :  { %v1048_v22 = vadd.f32 %v1047_v21, %v2236_v41 }
 0xc41   :  { %v1049_v23 = vsel %vm160_vm5, %v1048_v22, -inf }
 0xc42   :  { %1050 = vmax.xlane.f32.xlu1 %v1049_v23 }
 0xc4e   :  { %v944_v24 = vpop.xlane.xlu1 %943 }
 0xc4f   :  { %v946_v25 = vmul.f32 %v944_v24, %v2176_v8 }
 0xc51   :  { %v948_v26 = vadd.f32 1e-12, %v946_v25 }
 0xc53   :  { %2026 = vrsqrt.f32 %v948_v26  ;;  %vm965_vm12 = vweird.f32 %v948_v26 }
 0xc59   :  { %v2027_v28 = vpop.eup %2026 }
 0xc5a   :  { %v960_v29 = vmul.f32 %v2027_v28, %v948_v26  ;;  %vm966_vm8 = vweird.f32 %v2027_v28 }
 0xc5b   :  { %1060 = vrot.lane.b32.xlu1 %v2489_v10, %s2763_s29  ;;  %vm967_vm13 = vmor %vm965_vm12, %vm966_vm8 }
 0xc5c   :  { %v961_v31 = vmul.f32 %v2027_v28, %v960_v29 }
 0xc5e   :  { %v962_v34 = vmul.f32 0.5, %v961_v31 }
 0xc60   :  { %v963_v36 = vsub.f32 1.5, %v962_v34 }
 0xc62   :  { %v964_v37 = vmul.f32 %v2027_v28, %v963_v36 }
 0xc63   :  { %1231 = vrot.lane.b32.xlu1 %v2489_v10, %s2764_s30 }
 0xc64   :  { %v968_v39 = vsel %vm967_vm13, %v2027_v28, %v964_v37 }
 0xc65   :  { %v970_v43 = vmul.f32 %v968_v39, %v936_v17 }
 0xc67   :  { %v975_v44 = vmul.f32 %v2471_v53, %v970_v43 }
 0xc69   :  { %v2521_v46 = vadd.f32 %v2476_v56, %v975_v44 }
 0xc6b   :  { %1891 = vmatmul.msk.f32.gmra.mxu1 %vm58_vm0, %v2521_v46 }
 0xc73   :  { %1896 = vmatmul.msk.f32.vlgmr.msrb.gmra.mxu1 %vm160_vm5, %v1088_v30 }
 0xcb5   :  { %v1051_v42 = vpop.xlane.xlu1 %1050 }
 0xcb6   :  { %v1052_v48 = vsub.f32 %v1048_v22, %v1051_v42 }
 0xcb8   :  { %v1053_v49 = vmul.f32 1.442695, %v1052_v48 }
 0xcba   :  { %2028 = vpow2.f32 %v1053_v49 }
 0xcc0   :  { %v2029_v53 = vpop.eup %2028 }
 0xcc1   :  { %v1055_v54 = vsel %vm160_vm5, %v2029_v53, 0.0 }
 0xccd   :  { %v1061_v45 = vpop.permute.xlu1 %1060 }
 0xcce   :  { %1081 = vmatpush.msra.mxu0 %v1061_v45 }
 0xcd0   :  { %1898 = vmatpush.xpose.msk.msrb.mxu0 %vm160_vm5, %v1162_v14 }
 0xcd5   :  { %v1232_v33 = vpop.permute.xlu1 %1231 }
 0xcd6   :  { %1902 = vmatmul.msk.f32.vlgmr.msra.gmra.mxu1 %vm160_vm5, %v1232_v33 }
 0xce8   :  { %v1017_v35 = vpop.f32.mrf.mxu1 }
 0xce9   :  { %v2528_v47 = vadd.f32 %v1970_v57, %v1017_v35 }
 0xceb   :  { %1370 = vrot.lane.b32.xlu1 %v2528_v47, %s2074_s3  ;;  %1372 = vrot.lane.b32.xlu0 %v2528_v47, %s2076_s25  ;;  %s2765_s3 = smov 24  }
 0xcec   :  { %1304 = vrot.lane.b32.xlu2 %v2528_v47, %s2075_s24  ;;  %s2766_s24 = smov 16  }
 0xcf0   :  { %v1112_v50 = vpop.f32.mrf.mxu1 }
 0xcf1   :  { %v1115_v51 = vmul.f32 0.35355338, %v1112_v50 }
 0xcf3   :  { %1442 = vrot.lane.b32.xlu1 %v2528_v47, %s2762_s5  ;;  %1516 = vrot.lane.b32.xlu0 %v2528_v47, %s2761_s1  ;;  %v1116_v52 = vadd.f32 %v1115_v51, %v2236_v41 }
 0xcf4   :  { %1444 = vrot.lane.b32.xlu2 %v2528_v47, %s2081_s0 }
 0xcf5   :  { %v1117_v55 = vsel %vm160_vm5, %v1116_v52, -inf }
 0xd1d   :  { %1056 = vadd.xlane.f32.xlu2 %v1055_v54  ;;  %1118 = vmax.xlane.f32.xlu0 %v1117_v55 }
 0xd35   :  { %1514 = vrot.lane.b32.xlu2 %v2528_v47, %s2764_s30 }
 0xd46   :  { %v1305_v4 = vpop.permute.xlu2 %1304 }
 0xd4e   :  { %v1445_v5 = vpop.permute.xlu2 %1444 }
 0xd53   :  { %v1256_v56 = vpop.f32.mrf.mxu1 }
 0xd54   :  { %v1259_v59 = vmul.f32 0.35355338, %v1256_v56 }
 0xd56   :  { %v1260_v60 = vadd.f32 %v1259_v59, %v2236_v41 }
 0xd58   :  { %v1261_v0 = vsel %vm160_vm5, %v1260_v60, -inf }
 0xd5d   :  { %v1373_v63 = vpop.permute.xlu0 %1372  ;;  %v1371_v1 = vpop.permute.xlu1 %1370 }
 0xd5e   :  { %1262 = vmax.xlane.f32.xlu2 %v1261_v0  ;;  %1907 = vmatpush.xpose.msk.msrb.mxu1 %vm160_vm5, %v1373_v63 }
 0xd61   :  { %1908 = vmatmul.msk.f32.vlgmr.msrb.gmra.mxu1 %vm160_vm5, %v1371_v1 }
 0xd65   :  { %v1517_v3 = vpop.permute.xlu0 %1516  ;;  %v1443_v9 = vpop.permute.xlu1 %1442 }
 0xd66   :  { %1913 = vmatpush.xpose.msk.msra.mxu1 %vm160_vm5, %v1517_v3 }
 0xd90   :  { %v1057_v27 = vpop.xlane.xlu2 %1056  ;;  %v1119_v11 = vpop.xlane.xlu0 %1118 }
 0xd91   :  { %2030 = vrcp.f32 %v1057_v27  ;;  %v1120_v32 = vsub.f32 %v1116_v52, %v1119_v11 }
 0xd93   :  { %v1121_v12 = vmul.f32 1.442695, %v1120_v32 }
 0xd95   :  { %2032 = vpow2.f32 %v1121_v12 }
 0xd97   :  { %v2031_v6 = vpop.eup %2030 }
 0xd98   :  { %v1059_v7 = vmul.f32 %v2031_v6, %v2029_v53  ;;  %v1515_v57 = vpop.permute.xlu2 %1514 }
 0xd99   :  { %1914 = vmatmul.msk.f32.vlgmr.msra.gmra.mxu1 %vm160_vm5, %v1515_v57 }
 0xd9a   :  { %1894 = vmatmul.msk.f32.vlgmr.msra.gmra.mxu0 %vm160_vm5, %v1059_v7 }
 0xd9b   :  { %1904 = vmatpush.xpose.msk.msra.mxu0 %vm160_vm5, %v1305_v4  ;;  %v2033_v61 = vpop.eup %2032 }
 0xd9c   :  { %v1123_v38 = vsel %vm160_vm5, %v2033_v61, 0.0 }
 0xda2   :  { %1899 = vmatmul.msk.f32.vlgmr.msrb.gmra.mxu0 %vm160_vm5, %v1160_v58 }
 0xda3   :  { %1910 = vmatpush.xpose.msk.msrb.mxu0 %vm160_vm5, %v1445_v5 }
 0xdaa   :  { %1905 = vmatmul.msk.f32.vlgmr.msra.gmra.mxu0 %vm160_vm5, %v2528_v47 }
 0xdb2   :  { %1911 = vmatmul.msk.f32.vlgmr.msrb.gmra.mxu0 %vm160_vm5, %v1443_v9 }
 0xdd1   :  { %v1263_v16 = vpop.xlane.xlu2 %1262 }
 0xdd2   :  { %v1264_v17 = vsub.f32 %v1260_v60, %v1263_v16 }
 0xdd4   :  { %v1265_v18 = vmul.f32 1.442695, %v1264_v17 }
 0xdd6   :  { %2034 = vpow2.f32 %v1265_v18 }
 0xddc   :  { %v2570_v25 = vpop.eup %2034 }
 0xddd   :  { %v1267_v29 = vsel %vm160_vm5, %v2570_v25, 0.0 }
 0xdde   :  { %v1395_v13 = vpop.f32.mrf.mxu1 }
 0xddf   :  { %v1398_v40 = vmul.f32 0.35355338, %v1395_v13 }
 0xde1   :  { %v1399_v15 = vadd.f32 %v1398_v40, %v2314_v2 }
 0xde3   :  { %v1400_v14 = vsel %vm160_vm5, %v1399_v15, -inf }
 0xde4   :  { %1401 = vmax.xlane.f32.xlu2 %v1400_v14 }
 0xdec   :  { %1124 = vadd.xlane.f32.xlu2 %v1123_v38 }
 0xe04   :  { %1128 = vrot.lane.b32.xlu2 %v2489_v10, %s2077_s28 }
 0xe0c   :  { %1343 = vrot.lane.b32.xlu2 %v2528_v47, %s2763_s29 }
 0xe16   :  { %v1539_v19 = vpop.f32.mrf.mxu1 }
 0xe17   :  { %v1542_v20 = vmul.f32 0.35355338, %v1539_v19  ;;  %v1083_v21 = vpop.f32.mrf.mxu0 }
 0xe18   :  { %1086 = vst.msk [vmem:[#allocation2] sm:$0xff] %vm160_vm5, %v1083_v21 }
 0xe19   :  { %v1543_v22 = vadd.f32 %v1542_v20, %v2314_v2 }
 0xe1b   :  { %v1544_v23 = vsel %vm160_vm5, %v1543_v22, -inf }
 0xe1c   :  { %1545 = vmax.xlane.f32.xlu0 %v1544_v23 }
 0xe1f   :  { %v1184_v24 = vpop.f32.mrf.mxu0 }
 0xe20   :  { %v1187_v26 = vmul.f32 0.35355338, %v1184_v24 }
 0xe22   :  { %v1188_v28 = vadd.f32 %v1187_v26, %v2236_v41 }
 0xe24   :  { %1268 = vadd.xlane.f32.xlu0 %v1267_v29  ;;  %v1189_v31 = vsel %vm160_vm5, %v1188_v28, -inf }
 0xe25   :  { %1190 = vmax.xlane.f32.xlu1 %v1189_v31 }
 0xe27   :  { %v1327_v34 = vpop.f32.mrf.mxu0 }
 0xe28   :  { %v1330_v36 = vmul.f32 0.35355338, %v1327_v34 }
 0xe2a   :  { %v1331_v37 = vadd.f32 %v1330_v36, %v2314_v2 }
 0xe2c   :  { %v1332_v39 = vsel %vm160_vm5, %v1331_v37, -inf }
 0xe2d   :  { %1333 = vmax.xlane.f32.xlu0 %v1332_v39 }
 0xe2f   :  { %v1467_v55 = vpop.f32.mrf.mxu0 }
 0xe30   :  { %v1470_v59 = vmul.f32 0.35355338, %v1467_v55  ;;  %v1971_v55 = vld [vmem:[%s2735_s7 + $0x1] ss:$0 sm:$0xff] }
 0xe32   :  { %v1471_v0 = vadd.f32 %v1470_v59, %v2314_v2 }
 0xe34   :  { %v1472_v1 = vsel %vm160_vm5, %v1471_v0, -inf }
 0xe41   :  { %1200 = vrot.lane.b32.xlu0 %v2489_v10, %s2082_s23 }
 0xe57   :  { %v1402_v43 = vpop.xlane.xlu2 %1401 }
 0xe58   :  { %v1403_v44 = vsub.f32 %v1399_v15, %v1402_v43 }
 0xe5a   :  { %v1404_v41 = vmul.f32 1.442695, %v1403_v44 }
 0xe5c   :  { %2036 = vpow2.f32 %v1404_v41 }
 0xe5f   :  { %v1125_v30 = vpop.xlane.xlu2 %1124 }
 0xe60   :  { %2038 = vrcp.f32 %v1125_v30  ;;  %v1919_v30 = vld [vmem:[%s2736_s6 + $0x38] sm:$0xff] }
 0xe61   :  { %1616 = vmatpush.msra.mxu0 %v1919_v30  ;;  %v1939_v30 = vld [vmem:[%s2741_s12 + $0x78] sm:$0xff] }
 0xe62   :  { %v2580_v42 = vpop.eup %2036  ;;  %1772 = vmatpush.msrb.mxu1 %v1939_v30 }
 0xe63   :  { %v1406_v45 = vsel %vm160_vm5, %v2580_v42, 0.0 }
 0xe64   :  { %1407 = vadd.xlane.f32.xlu1 %v1406_v45  ;;  %v1917_v45 = vld [vmem:[%s2736_s6 + $0x28] sm:$0xff] }
 0xe66   :  { %v2039_v33 = vpop.eup %2038 }
 0xe67   :  { %v1127_v35 = vmul.f32 %v2039_v33, %v2033_v61  ;;  %v1129_v48 = vpop.permute.xlu2 %1128 }
 0xe68   :  { %1149 = vmatpush.msrb.mxu3 %v1129_v48 }
 0xe69   :  { %1897 = vmatmul.msk.f32.vlgmr.msrb.gmra.mxu3 %vm160_vm5, %v1127_v35  ;;  %v1916_v35 = vld [vmem:[%s2736_s6 + $0x20] sm:$0xff] }
 0xe6f   :  { %v1344_v7 = vpop.permute.xlu2 %1343 }
 0xe7d   :  { %1272 = vrot.lane.b32.xlu1 %v2489_v10, %s2083_s19 }
 0xe8f   :  { %v1546_v49 = vpop.xlane.xlu0 %1545 }
 0xe90   :  { %v1547_v50 = vsub.f32 %v1543_v22, %v1546_v49 }
 0xe92   :  { %v1548_v51 = vmul.f32 1.442695, %v1547_v50 }
 0xe94   :  { %2040 = vpow2.f32 %v1548_v51 }
 0xe97   :  { %v1269_v52 = vpop.xlane.xlu0 %1268 }
 0xe98   :  { %v1191_v54 = vpop.xlane.xlu1 %1190 }
 0xe99   :  { %v1192_v58 = vsub.f32 %v1188_v28, %v1191_v54 }
 0xe9a   :  { %v2587_v53 = vpop.eup %2040 }
 0xe9b   :  { %v1550_v56 = vsel %vm160_vm5, %v2587_v53, 0.0  ;;  %v1193_v60 = vmul.f32 1.442695, %v1192_v58 }
 0xe9c   :  { %1551 = vadd.xlane.f32.xlu2 %v1550_v56 }
 0xe9d   :  { %2042 = vpow2.f32 %v1193_v60 }
 0xea0   :  { %v1334_v63 = vpop.xlane.xlu0 %1333 }
 0xea1   :  { %v1335_v10 = vsub.f32 %v1331_v37, %v1334_v63 }
 0xea3   :  { %v1336_v3 = vmul.f32 1.442695, %v1335_v10  ;;  %v2043_v4 = vpop.eup %2042 }
 0xea4   :  { %v1195_v5 = vsel %vm160_vm5, %v2043_v4, 0.0 }
 0xea5   :  { %2044 = vpow2.f32 %v1336_v3 }
 0xea6   :  { %2046 = vrcp.f32 %v1269_v52 }
 0xea7   :  { %1473 = vmax.xlane.f32.xlu1 %v1472_v1 }
 0xeab   :  { %v2045_v27 = vpop.eup %2044 }
 0xeac   :  { %v1338_v57 = vsel %vm160_vm5, %v2045_v27, 0.0  ;;  %v2047_v9 = vpop.eup %2046 }
 0xead   :  { %v1271_v11 = vmul.f32 %v2047_v9, %v2570_v25 }
 0xeaf   :  { %1196 = vadd.xlane.f32.xlu1 %v1195_v5 }
 0xeb3   :  { %v1201_v6 = vpop.permute.xlu0 %1200 }
 0xeb4   :  { %1221 = vmatpush.msra.mxu2 %v1201_v6 }
 0xeb6   :  { %1364 = vmatpush.msrb.mxu2 %v1344_v7 }
 0xeb7   :  { %1339 = vadd.xlane.f32.xlu1 %v1338_v57 }
 0xed0   :  { %1411 = vrot.lane.b32.xlu1 %v2528_v47, %s2077_s28 }
 0xed7   :  { %v1408_v2 = vpop.xlane.xlu1 %1407 }
 0xed8   :  { %1483 = vrot.lane.b32.xlu1 %v2528_v47, %s2082_s23 }
 0xee0   :  { %1555 = vrot.lane.b32.xlu1 %v2528_v47, %s2083_s19 }
 0xeec   :  { %v1151_v19 = vpop.f32.mrf.mxu3 }
 0xeef   :  { %v1273_v32 = vpop.permute.xlu1 %1272 }
 0xef0   :  { %1293 = vmatpush.msra.mxu3 %v1273_v32  ;;  %v1926_v32 = vld [vmem:[%s2740_s10 + $0x28] sm:$0xff] }
 0xef1   :  { %1903 = vmatmul.msk.f32.vlgmr.msra.gmra.mxu3 %vm160_vm5, %v1271_v11  ;;  %v1927_v11 = vld [vmem:[%s2740_s10 + $0x30] sm:$0xff] }
 0xf0f   :  { %v1552_v23 = vpop.xlane.xlu2 %1551 }
 0xf1a   :  { %v1474_v12 = vpop.xlane.xlu1 %1473 }
 0xf1b   :  { %v1475_v13 = vsub.f32 %v1471_v0, %v1474_v12  ;;  %v1925_v12 = vld [vmem:[%s2740_s10 + $0x20] sm:$0xff] }
 0xf1d   :  { %v1476_v40 = vmul.f32 1.442695, %v1475_v13 }
 0xf1f   :  { %2048 = vpow2.f32 %v1476_v40 }
 0xf22   :  { %v1197_v15 = vpop.xlane.xlu1 %1196 }
 0xf23   :  { %2050 = vrcp.f32 %v1197_v15 }
 0xf25   :  { %v2049_v14 = vpop.eup %2048 }
 0xf26   :  { %v1478_v61 = vsel %vm160_vm5, %v2049_v14, 0.0 }
 0xf27   :  { %1479 = vadd.xlane.f32.xlu0 %v1478_v61 }
 0xf29   :  { %v2051_v47 = vpop.eup %2050 }
 0xf2a   :  { %v1199_v38 = vmul.f32 %v2051_v47, %v2043_v4  ;;  %v1340_v16 = vpop.xlane.xlu1 %1339 }
 0xf2b   :  { %2052 = vrcp.f32 %v1340_v16 }
 0xf2c   :  { %1900 = vmatmul.msk.f32.vlgmr.msra.gmra.mxu2 %vm160_vm5, %v1199_v38  ;;  %2054 = vrcp.f32 %v1408_v2 }
 0xf2d   :  { %2056 = vrcp.f32 %v1552_v23 }
 0xf31   :  { %v2053_v17 = vpop.eup %2052 }
 0xf32   :  { %v1342_v18 = vmul.f32 %v2053_v17, %v2045_v27  ;;  %v2055_v20 = vpop.eup %2054 }
 0xf33   :  { %v1410_v21 = vmul.f32 %v2055_v20, %v2580_v42  ;;  %v2057_v25 = vpop.eup %2056  ;;  %v1918_v42 = vld [vmem:[%s2736_s6 + $0x30] sm:$0xff] }
 0xf34   :  { %1906 = vmatmul.msk.f32.vlgmr.msrb.gmra.mxu2 %vm160_vm5, %v1342_v18  ;;  %v1554_v26 = vmul.f32 %v2057_v25, %v2587_v53  ;;  %1617 = vmatpush.msra.mxu0 %v1918_v42  ;;  %v1972_v18 = vld [vmem:[%s2737_s8 + $0x1] ss:$0 sm:$0xff]  ;;  %v1938_v42 = vld [vmem:[%s2741_s12 + $0x70] sm:$0xff] }
 0xf35   :  { %1773 = vmatpush.msrb.mxu1 %v1938_v42 }
 0xf36   :  { %1618 = vmatpush.msra.mxu0 %v1917_v45  ;;  %v1937_v45 = vld [vmem:[%s2741_s12 + $0x68] sm:$0xff] }
 0xf37   :  { %1774 = vmatpush.msrb.mxu1 %v1937_v45 }
 0xf38   :  { %1619 = vmatpush.msra.mxu0 %v1916_v35  ;;  %v1935_v35 = vld [vmem:[%s2741_s12 + $0x58] sm:$0xff] }
 0xf3b   :  { %1155 = vrot.lane.b32.xlu0 %v1151_v19, %s2084_s20 }
 0xf42   :  { %v1412_v22 = vpop.permute.xlu1 %1411 }
 0xf43   :  { %1432 = vmatpush.msrb.mxu3 %v1412_v22 }
 0xf44   :  { %1909 = vmatmul.msk.f32.vlgmr.msrb.gmra.mxu3 %vm160_vm5, %v1410_v21  ;;  %v1973_v21 = vld [vmem:[%s2738_s9 + $0x1] ss:$0 sm:$0xff] }
 0xf4a   :  { %v1484_v24 = vpop.permute.xlu1 %1483 }
 0xf4b   :  { %1504 = vmatpush.msra.mxu2 %v1484_v24 }
 0xf52   :  { %v1556_v28 = vpop.permute.xlu1 %1555 }
 0xf53   :  { %1576 = vmatpush.msra.mxu3 %v1556_v28 }
 0xf54   :  { %1915 = vmatmul.msk.f32.vlgmr.msra.gmra.mxu3 %vm160_vm5, %v1554_v26 }
 0xf74   :  { %v1295_v29 = vpop.f32.mrf.mxu3 }
 0xf75   :  { %1299 = vrot.lane.b32.xlu2 %v1295_v29, %s2765_s3 }
 0xf9a   :  { %v1480_v31 = vpop.xlane.xlu0 %1479 }
 0xf9b   :  { %2058 = vrcp.f32 %v1480_v31 }
 0xfa1   :  { %v2059_v34 = vpop.eup %2058 }
 0xfa2   :  { %v1482_v36 = vmul.f32 %v2059_v34, %v2049_v14 }
 0xfa4   :  { %1912 = vmatmul.msk.f32.vlgmr.msra.gmra.mxu2 %vm160_vm5, %v1482_v36 }
 0xfad   :  { %v1156_v37 = vpop.permute.xlu0 %1155 }
 0xfae   :  { %1158 = vst.msk [vmem:[#allocation2] sm:$0xff] %vm297_vm9, %v1156_v37 }
 0xfaf   :  { %v1223_v39 = vpop.f32.mrf.mxu2 }
 0xfb7   :  { %v1366_v43 = vpop.f32.mrf.mxu2 }
 0xfb8   :  { %1369 = vst.msk [vmem:[#allocation2 + $0x8] sm:$0xff] %vm160_vm5, %v1366_v43 }
 0xfc7   :  { %v1434_v44 = vpop.f32.mrf.mxu3 }
 0xfc8   :  { %1438 = vrot.lane.b32.xlu1 %v1434_v44, %s2084_s20 }
 0xfcf   :  { %v1300_v50 = vpop.permute.xlu2 %1299 }
 0xfd0   :  { %1227 = vrot.lane.b32.xlu1 %v1223_v39, %s2766_s24 }
 0xfd7   :  { %v1578_v41 = vpop.f32.mrf.mxu3 }
 0xfd8   :  { %1582 = vrot.lane.b32.xlu0 %v1578_v41, %s2765_s3 }
0x1027   :  { %v1506_v33 = vpop.f32.mrf.mxu2 }
0x1028   :  { %1510 = vrot.lane.b32.xlu1 %v1506_v33, %s2766_s24  ;;  %v1936_v33 = vld [vmem:[%s2741_s12 + $0x60] sm:$0xff] }
0x1029   :  { %1775 = vmatpush.msrb.mxu1 %v1936_v33 }
0x102b   :  { %1776 = vmatpush.msrb.mxu1 %v1935_v35 }
0x103a   :  { %v1439_v48 = vpop.permute.xlu1 %1438 }
0x103b   :  { %1441 = vst.msk [vmem:[#allocation2 + $0x8] sm:$0xff] %vm297_vm9, %v1439_v48  ;;  %v1934_v48 = vld [vmem:[%s2741_s12 + $0x50] sm:$0xff] }
0x103c   :  { %1777 = vmatpush.msrb.mxu1 %v1934_v48 }
0x1042   :  { %v1228_v49 = vpop.permute.xlu1 %1227 }
0x1043   :  { %1230 = vst.msk [vmem:[#allocation2] sm:$0xff] %vm370_vm10, %v1228_v49  ;;  %v1933_v49 = vld [vmem:[%s2741_s12 + $0x48] sm:$0xff] }
0x1044   :  { %1302 = vst.msk [vmem:[#allocation2] sm:$0xff] %vm443_vm11, %v1300_v50  ;;  %v1932_v50 = vld [vmem:[%s2741_s12 + $0x40] sm:$0xff]  ;;  %1778 = vmatpush.msrb.mxu1 %v1933_v49 }
0x1046   :  { %1779 = vmatpush.msrb.mxu1 %v1932_v50 }
0x104a   :  { %v1583_v53 = vpop.permute.xlu0 %1582 }
0x104b   :  { %v1586_v51 = vld [vmem:[#allocation2] sm:$0xff] }
0x104c   :  { %1921 = vmatmul.msk.f32.vlgmr.msra.gmra.mxu0 %vm58_vm0, %v1586_v51  ;;  %v1974_v51 = vld [vmem:[%s2739_s11 + $0x1] ss:$0 sm:$0xff] }
0x109a   :  { %v1511_v52 = vpop.permute.xlu1 %1510 }
0x109b   :  { %1513 = vst.msk [vmem:[#allocation2 + $0x8] sm:$0xff] %vm370_vm10, %v1511_v52 }
0x109c   :  { %1585 = vst.msk [vmem:[#allocation2 + $0x8] sm:$0xff] %vm443_vm11, %v1583_v53 }
0x10a3   :  { %v1587_v54 = vld [vmem:[#allocation2 + $0x8] sm:$0xff] }
0x10a4   :  { %1922 = vmatmul.msk.f32.gmra.mxu0 %vm58_vm0, %v1587_v54 }
0x10c9   :  { %v1621_v56 = vpop.f32.mrf.mxu0 }
0x10ca   :  { %v1622_v58 = vadd.f32 %v1971_v55, %v1621_v56 }
0x10cc   :  { %v1627_v59 = vadd.f32 %v1622_v58, %v2481_v62 }
0x10ce   :  { %v1633_v60 = vsel %vm58_vm0, %v1627_v59, 0.0 }
0x10cf   :  { %1634 = vadd.xlane.f32.xlu1 %v1633_v60 }
0x1121   :  { %v1624_v63 = vpop.f32.mrf.mxu0 }
0x1122   :  { %v1625_v0 = vadd.f32 %v1971_v55, %v1624_v63 }
0x1124   :  { %v1628_v10 = vadd.f32 %v1625_v0, %v2521_v46  ;;  %v1928_v46 = vld [vmem:[%s2740_s10 + $0x38] sm:$0xff] }
0x1125   :  { %1715 = vmatpush.msrb.mxu2 %v1928_v46  ;;  %v1975_v46 = vld [vmem:[%s2742_s13 + $0x1] ss:$0 sm:$0xff] }
0x1126   :  { %v1636_v1 = vsel %vm58_vm0, %v1628_v10, 0.0 }
0x1127   :  { %1637 = vadd.xlane.f32.xlu0 %v1636_v1  ;;  %1716 = vmatpush.msrb.mxu2 %v1927_v11 }
0x1129   :  { %1717 = vmatpush.msrb.mxu2 %v1926_v32 }
0x112b   :  { %1718 = vmatpush.msrb.mxu2 %v1925_v12 }
0x1142   :  { %v1635_v3 = vpop.xlane.xlu1 %1634 }
0x1143   :  { %v1639_v4 = vmul.f32 %v1635_v3, %v2176_v8 }
0x1145   :  { %v1641_v5 = vsub.f32 %v1627_v59, %v1639_v4 }
0x1147   :  { %v1643_v27 = vmul.f32 %v1641_v5, %v1641_v5 }
0x1149   :  { %v1645_v6 = vsel %vm58_vm0, %v1643_v27, 0.0 }
0x114a   :  { %1646 = vadd.xlane.f32.xlu2 %v1645_v6 }
0x119a   :  { %v1638_v7 = vpop.xlane.xlu0 %1637 }
0x119b   :  { %v1640_v62 = vmul.f32 %v1638_v7, %v2176_v8 }
0x119d   :  { %v1642_v57 = vsub.f32 %v1628_v10, %v1640_v62 }
0x119f   :  { %v1644_v2 = vmul.f32 %v1642_v57, %v1642_v57 }
0x11a1   :  { %v1648_v9 = vsel %vm58_vm0, %v1644_v2, 0.0 }
0x11a2   :  { %1649 = vadd.xlane.f32.xlu1 %v1648_v9 }
0x11bd   :  { %v1647_v13 = vpop.xlane.xlu2 %1646 }
0x11be   :  { %v1651_v40 = vmul.f32 %v1647_v13, %v2176_v8 }
0x11c0   :  { %v1653_v15 = vadd.f32 1e-12, %v1651_v40 }
0x11c2   :  { %2060 = vrsqrt.f32 %v1653_v15  ;;  %vm1661_vm9 = vweird.f32 %v1653_v15 }
0x11c8   :  { %v2061_v14 = vpop.eup %2060 }
0x11c9   :  { %v1656_v61 = vmul.f32 %v2061_v14, %v1653_v15  ;;  %vm1662_vm5 = vweird.f32 %v2061_v14 }
0x11ca   :  { %vm1663_vm10 = vmor %vm1661_vm9, %vm1662_vm5 }
0x11cb   :  { %v1657_v47 = vmul.f32 %v2061_v14, %v1656_v61 }
0x11cd   :  { %v1658_v38 = vmul.f32 0.5, %v1657_v47 }
0x11cf   :  { %v1659_v16 = vsub.f32 1.5, %v1658_v38 }
0x11d1   :  { %v1660_v17 = vmul.f32 %v2061_v14, %v1659_v16 }
0x11d3   :  { %v1664_v19 = vsel %vm1663_vm10, %v2061_v14, %v1660_v17 }
0x11d4   :  { %v1675_v20 = vmul.f32 %v1664_v19, %v1641_v5 }
0x11d6   :  { %v1680_v22 = vmul.f32 %v1972_v18, %v1675_v20 }
0x11d8   :  { %v2668_v23 = vadd.f32 %v1973_v21, %v1680_v22 }
0x11da   :  { %1930 = vmatmul.msk.f32.vlgmr.msrb.gmra.mxu2 %vm58_vm0, %v2668_v23 }
0x1215   :  { %v1650_v24 = vpop.xlane.xlu1 %1649 }
0x1216   :  { %v1652_v25 = vmul.f32 %v1650_v24, %v2176_v8 }
0x1218   :  { %v1654_v26 = vadd.f32 1e-12, %v1652_v25 }
0x121a   :  { %2062 = vrsqrt.f32 %v1654_v26  ;;  %vm1671_vm14 = vweird.f32 %v1654_v26 }
0x1220   :  { %v2063_v28 = vpop.eup %2062 }
0x1221   :  { %v1666_v29 = vmul.f32 %v2063_v28, %v1654_v26  ;;  %vm1672_vm11 = vweird.f32 %v2063_v28 }
0x1222   :  { %vm1673_vm1 = vmor %vm1671_vm14, %vm1672_vm11 }
0x1223   :  { %v1667_v31 = vmul.f32 %v2063_v28, %v1666_v29 }
0x1225   :  { %v1668_v34 = vmul.f32 0.5, %v1667_v31 }
0x1227   :  { %v1669_v36 = vsub.f32 1.5, %v1668_v34 }
0x1229   :  { %v1670_v37 = vmul.f32 %v2063_v28, %v1669_v36 }
0x122b   :  { %v1674_v39 = vsel %vm1673_vm1, %v2063_v28, %v1670_v37 }
0x122c   :  { %v1676_v43 = vmul.f32 %v1674_v39, %v1642_v57  ;;  %v1976_v39 = vld [vmem:[%s2743_s14 + $0x1] ss:$0 sm:$0xff] }
0x122e   :  { %v1681_v44 = vmul.f32 %v1972_v18, %v1676_v43 }
0x1230   :  { %v1686_v41 = vadd.f32 %v1973_v21, %v1681_v44  ;;  %v1977_v44 = vld [vmem:[%s2744_s15 + $0x1] ss:$0 sm:$0xff] }
0x1232   :  { %1931 = vmatmul.msk.f32.gmra.mxu2 %vm58_vm0, %v1686_v41 }
0x125d   :  { %v1720_v52 = vpop.f32.mrf.mxu2 }
0x125e   :  { %v1721_v53 = vadd.f32 %v1974_v51, %v1720_v52 }
0x1260   :  { %v1728_v54 = vmul.f32 0.044715, %v1721_v53  ;;  %v1726_v63 = vmul.f32 0.5, %v1721_v53 }
0x1262   :  { %v1730_v55 = vmul.f32 %v1728_v54, %v1721_v53 }
0x1264   :  { %v1732_v56 = vmul.f32 %v1730_v55, %v1721_v53 }
0x1266   :  { %v1734_v58 = vadd.f32 %v1732_v56, %v1721_v53 }
0x1268   :  { %v1736_v59 = vmul.f32 0.7978846, %v1734_v58 }
0x126a   :  { %2064 = vtanh.f32 %v1736_v59 }
0x1270   :  { %v2065_v60 = vpop.eup %2064 }
0x1271   :  { %v1740_v0 = vadd.f32 1.0, %v2065_v60 }
0x1273   :  { %v1742_v10 = vmul.f32 %v1740_v0, %v1726_v63 }
0x1275   :  { %1941 = vmatmul.msk.f32.vlgmr.msrb.gmra.mxu1 %vm893_vm15, %v1742_v10 }
0x12b5   :  { %v1723_v1 = vpop.f32.mrf.mxu2 }
0x12b6   :  { %v1724_v3 = vadd.f32 %v1974_v51, %v1723_v1 }
0x12b8   :  { %v1729_v4 = vmul.f32 0.044715, %v1724_v3  ;;  %v1727_v57 = vmul.f32 0.5, %v1724_v3 }
0x12ba   :  { %v1731_v5 = vmul.f32 %v1729_v4, %v1724_v3 }
0x12bc   :  { %v1733_v27 = vmul.f32 %v1731_v5, %v1724_v3 }
0x12be   :  { %v1735_v6 = vadd.f32 %v1733_v27, %v1724_v3 }
0x12c0   :  { %v1737_v7 = vmul.f32 0.7978846, %v1735_v6 }
0x12c2   :  { %2066 = vtanh.f32 %v1737_v7 }
0x12c8   :  { %v2067_v62 = vpop.eup %2066 }
0x12c9   :  { %v1741_v2 = vadd.f32 1.0, %v2067_v62 }
0x12cb   :  { %v1743_v9 = vmul.f32 %v1741_v2, %v1727_v57 }
0x12cd   :  { %1942 = vmatmul.msk.f32.gmra.mxu1 %vm893_vm15, %v1743_v9 }
0x12f2   :  { %v1781_v11 = vpop.f32.mrf.mxu1 }
0x12f3   :  { %v1782_v32 = vadd.f32 %v1975_v46, %v1781_v11 }
0x12f5   :  { %v1787_v12 = vadd.f32 %v1782_v32, %v2668_v23 }
0x12f7   :  { %v1793_v13 = vsel %vm58_vm0, %v1787_v12, 0.0 }
0x12f8   :  { %1794 = vadd.xlane.f32.xlu0 %v1793_v13 }
0x134a   :  { %v1784_v40 = vpop.f32.mrf.mxu1 }
0x134b   :  { %v1785_v15 = vadd.f32 %v1975_v46, %v1784_v40 }
0x134d   :  { %v1788_v14 = vadd.f32 %v1785_v15, %v1686_v41 }
0x134f   :  { %v1796_v61 = vsel %vm58_vm0, %v1788_v14, 0.0 }
0x1350   :  { %1797 = vadd.xlane.f32.xlu2 %v1796_v61 }
0x136b   :  { %v1795_v47 = vpop.xlane.xlu0 %1794 }
0x136c   :  { %v1799_v38 = vmul.f32 %v1795_v47, %v2176_v8 }
0x136e   :  { %v1801_v16 = vsub.f32 %v1787_v12, %v1799_v38 }
0x1370   :  { %v1803_v17 = vmul.f32 %v1801_v16, %v1801_v16 }
0x1372   :  { %v1805_v18 = vsel %vm58_vm0, %v1803_v17, 0.0 }
0x1373   :  { %1806 = vadd.xlane.f32.xlu1 %v1805_v18 }
0x13c3   :  { %v1798_v19 = vpop.xlane.xlu2 %1797 }
0x13c4   :  { %v1800_v20 = vmul.f32 %v1798_v19, %v2176_v8 }
0x13c6   :  { %v1802_v21 = vsub.f32 %v1788_v14, %v1800_v20 }
0x13c8   :  { %v1804_v22 = vmul.f32 %v1802_v21, %v1802_v21 }
0x13ca   :  { %v1808_v23 = vsel %vm58_vm0, %v1804_v22, 0.0 }
0x13cb   :  { %1809 = vadd.xlane.f32.xlu0 %v1808_v23 }
0x13e6   :  { %v1807_v24 = vpop.xlane.xlu1 %1806 }
0x13e7   :  { %v1811_v25 = vmul.f32 %v1807_v24, %v2176_v8 }
0x13e9   :  { %v1813_v26 = vadd.f32 1e-12, %v1811_v25 }
0x13eb   :  { %2068 = vrsqrt.f32 %v1813_v26  ;;  %vm1821_vm2 = vweird.f32 %v1813_v26 }
0x13f1   :  { %v2069_v28 = vpop.eup %2068 }
0x13f2   :  { %v1816_v29 = vmul.f32 %v2069_v28, %v1813_v26  ;;  %vm1822_vm15 = vweird.f32 %v2069_v28 }
0x13f3   :  { %vm1823_vm3 = vmor %vm1821_vm2, %vm1822_vm15 }
0x13f4   :  { %v1817_v31 = vmul.f32 %v2069_v28, %v1816_v29 }
0x13f6   :  { %v1818_v34 = vmul.f32 0.5, %v1817_v31 }
0x13f8   :  { %v1819_v36 = vsub.f32 1.5, %v1818_v34 }
0x13fa   :  { %v1820_v37 = vmul.f32 %v2069_v28, %v1819_v36 }
0x13fc   :  { %v1824_v43 = vsel %vm1823_vm3, %v2069_v28, %v1820_v37 }
0x13fd   :  { %v1835_v41 = vmul.f32 %v1824_v43, %v1801_v16 }
0x13ff   :  { %v1840_v30 = vmul.f32 %v1976_v39, %v1835_v41 }
0x1401   :  { %v1845_v42 = vadd.f32 %v1977_v44, %v1840_v30 }
0x1403   :  { %1847 = vst.msk [vmem:[%s2745_s16] sm:$0xff] %vm58_vm0, %v1845_v42 }
0x143e   :  { %v1810_v45 = vpop.xlane.xlu0 %1809 }
0x143f   :  { %v1812_v33 = vmul.f32 %v1810_v45, %v2176_v8 }
0x1441   :  { %v1814_v35 = vadd.f32 1e-12, %v1812_v33 }
0x1443   :  { %2070 = vrsqrt.f32 %v1814_v35  ;;  %vm1831_vm6 = vweird.f32 %v1814_v35 }
0x1449   :  { %v2071_v48 = vpop.eup %2070 }
0x144a   :  { %v1826_v49 = vmul.f32 %v2071_v48, %v1814_v35  ;;  %vm1832_vm4 = vweird.f32 %v2071_v48 }
0x144b   :  { %vm1833_vm7 = vmor %vm1831_vm6, %vm1832_vm4 }
0x144c   :  { %v1827_v50 = vmul.f32 %v2071_v48, %v1826_v49 }
0x144e   :  { %v1828_v51 = vmul.f32 0.5, %v1827_v50 }
0x1450   :  { %v1829_v52 = vsub.f32 1.5, %v1828_v51 }
0x1452   :  { %v1830_v53 = vmul.f32 %v2071_v48, %v1829_v52 }
0x1454   :  { %v1834_v54 = vsel %vm1833_vm7, %v2071_v48, %v1830_v53 }
0x1455   :  { %v1836_v55 = vmul.f32 %v1834_v54, %v1802_v21 }
0x1457   :  { %v1841_v56 = vmul.f32 %v1976_v39, %v1836_v55 }
0x1459   :  { %v1846_v58 = vadd.f32 %v1977_v44, %v1841_v56 }
0x145b   :  { %1848 = vst.msk [vmem:[%s2745_s16 + $0x8] sm:$0xff] %vm58_vm0, %v1846_v58 }

</bundles_post_ra>
